<compile_context>
chip_gen: v7x
topology: tpu7x:2x2x1
jax: 0.10.0
libtpu: 0.0.40
codegen_flags: <defaults>
</compile_context>

<pallas_src>
import functools
import math

import jax
import jax.numpy as jnp
from jax.experimental import pallas as pl
from jax.experimental.pallas import tpu as pltpu


# ------------------------------ model config ------------------------------

CFG = dict(
    batch=2,
    in_chans=3,
    img_size=28,
    patch=14,             # DINOv2 uses 14x14 patches
    dim=128,              # scaled-down, lane-dense embed dim (stand-in for 768)
    depth=2,
    num_heads=2,          # head_dim = 64
    mlp_ratio=4,
    num_classes={"view": 3, "condition": 7, "severity": 3},
    head_hidden={"view": 256, "condition": 512, "severity": 256},
    logits_pad=128,       # lane-dense fused-head output width (3 + 7 + 3 -> 128)
    eps=1e-6,
    batch_per_step=1,     # samples per grid step (grid=(batch/bps,), parallel)
    approx_softmax_recip=True,   # set False for exact-parity validation runs
)


# ------------------------------ kernel helpers -----------------------------

def _layernorm(x, g, b, eps):
    mean = jnp.mean(x, axis=-1, keepdims=True)
    var = jnp.mean((x - mean) ** 2, axis=-1, keepdims=True)
    return (x - mean) * jax.lax.rsqrt(var + eps) * g + b


def _gelu_exact(x):
    # matches torch.nn.GELU default (exact erf form)
    return 0.5 * x * (1.0 + jax.lax.erf(x * (1.0 / math.sqrt(2.0))))


def _bf16(x):
    return x.astype(jnp.bfloat16)


# ------------------------------ fused kernel -------------------------------

def _fused_forward_kernel(
        # inputs
        patches_ref, pw_ref, pb_ref, cls_ref, pos_ref,
        ln1_g_ref, ln1_b_ref, qkv_w_ref, qkv_b_ref, proj_w_ref, proj_b_ref,
        ls1_ref, ln2_g_ref, ln2_b_ref, fc1_w_ref, fc1_b_ref, fc2_w_ref,
        fc2_b_ref, ls2_ref, norm_g_ref, norm_b_ref, hw1_ref, hb1_ref,
        hw2_ref, hb2_ref,
        # outputs
        emb_ref, log_ref,
        # scratch
        x_scr,
        *, bt, n_tok, depth, heads, hd, eps, approx_recip):
    d = heads * hd
    n_patch = n_tok - 1
    m = bt * n_tok

    # --- patch embed (conv-as-matmul) + cls token + positional embedding ----
    patches = patches_ref[...].reshape(bt * n_patch, -1)          # (bt*Np, CPP)
    tok = jnp.dot(_bf16(patches), pw_ref[...],
                  preferred_element_type=jnp.float32) + pb_ref[...]
    cls_row = cls_ref[...] + pos_ref[0:1, :]                       # (1, D)
    # write cls / patch tokens to disjoint row ranges (no concatenate relayout)
    x_scr[:, 0:1, :] = jnp.broadcast_to(cls_row[None], (bt, 1, d))
    x_scr[:, 1:, :] = tok.reshape(bt, n_patch, d) + pos_ref[1:, :][None]

    # --- transformer blocks, fully VMEM-resident -----------------------------
    x = x_scr[...].reshape(m, d)                                   # (bt*N, D)
    for l in range(depth):                                         # static loop
        # attention branch (scale already folded into qkv_w / qkv_b)
        h = _layernorm(x, ln1_g_ref[l], ln1_b_ref[l], eps)
        qkv = jnp.dot(_bf16(h), qkv_w_ref[l],
                      preferred_element_type=jnp.float32) + qkv_b_ref[l]

        # TODO(synk): at hd=64 the per-head column slices sit at half-vreg
        # lane offsets; negligible at N=5, but switch to a head-batched
        # dot_general (or head-stacked weights) when scaling to real DINOv2.
        sample_outs = []
        for si in range(bt):                                       # static loop
            r0 = si * n_tok
            head_outs = []
            for hh in range(heads):                                # static loop
                q = qkv[r0:r0 + n_tok, hh * hd:(hh + 1) * hd]
                k = qkv[r0:r0 + n_tok, d + hh * hd: d + (hh + 1) * hd]
                v = qkv[r0:r0 + n_tok, 2 * d + hh * hd: 2 * d + (hh + 1) * hd]
                s = jnp.einsum("qd,kd->qk", _bf16(q), _bf16(k),
                               preferred_element_type=jnp.float32)
                s = s - jnp.max(s, axis=-1, keepdims=True)
                p = jnp.exp(s)
                denom = jnp.sum(p, axis=-1, keepdims=True)
                if approx_recip:
                    p = p * pl.reciprocal(denom, approx=True)
                else:
                    p = p / denom
                head_outs.append(jnp.dot(_bf16(p), _bf16(v),
                                         preferred_element_type=jnp.float32))
            sample_outs.append(jnp.concatenate(head_outs, axis=-1))
        attn = sample_outs[0] if bt == 1 else jnp.concatenate(sample_outs, axis=0)

        proj = jnp.dot(_bf16(attn), proj_w_ref[l],
                       preferred_element_type=jnp.float32) + proj_b_ref[l]
        x = x + proj * ls1_ref[l]                                  # LayerScale

        # MLP branch
        h = _layernorm(x, ln2_g_ref[l], ln2_b_ref[l], eps)
        mm = jnp.dot(_bf16(h), fc1_w_ref[l],
                     preferred_element_type=jnp.float32) + fc1_b_ref[l]
        mm = _gelu_exact(mm)
        mm = jnp.dot(_bf16(mm), fc2_w_ref[l],
                     preferred_element_type=jnp.float32) + fc2_b_ref[l]
        x = x + mm * ls2_ref[l]                                    # LayerScale

    # --- final norm on cls token (x_norm_clstoken) + fused multi-task heads --
    cls_tok = x.reshape(bt, n_tok, d)[:, 0, :]                     # (bt, D)
    emb = _layernorm(cls_tok, norm_g_ref[...], norm_b_ref[...], eps)
    emb_ref[...] = emb.reshape(bt, 1, d)

    # Linear -> ReLU -> Dropout(identity at eval) -> Linear, all three heads
    # folded into one wide fc1 + block-diagonal, lane-dense fc2.
    hh = jnp.dot(_bf16(emb), hw1_ref[...],
                 preferred_element_type=jnp.float32) + hb1_ref[...]
    hh = jnp.maximum(hh, 0.0)
    logits = jnp.dot(_bf16(hh), hw2_ref[...],
                     preferred_element_type=jnp.float32) + hb2_ref[...]
    log_ref[...] = logits.reshape(bt, 1, -1)


# --------------------------- pallas_call wrapper ----------------------------

_WEIGHT_ORDER = (
    "patch_w", "patch_b", "cls_token", "pos_embed",
    "ln1_g", "ln1_b", "qkv_w", "qkv_b", "proj_w", "proj_b", "ls1",
    "ln2_g", "ln2_b", "fc1_w", "fc1_b", "fc2_w", "fc2_b", "ls2",
    "norm_g", "norm_b", "head_w1", "head_b1", "head_w2", "head_b2",
)


def pallas_forward(patches, params, cfg):
    B, Np, CPP = patches.shape
    N = Np + 1
    D = cfg["dim"]
    pad = cfg["logits_pad"]
    heads = cfg["num_heads"]
    hd = D // heads
    bt = cfg["batch_per_step"]
    assert B % bt == 0

    kernel = functools.partial(
        _fused_forward_kernel, bt=bt, n_tok=N, depth=cfg["depth"],
        heads=heads, hd=hd, eps=cfg["eps"],
        approx_recip=cfg["approx_softmax_recip"])

    weights = [params[k] for k in _WEIGHT_ORDER]

    def bcast(a):
        # Same full-array block for every grid step (weights never re-DMA'd).
        nd = a.ndim
        return pl.BlockSpec(a.shape, lambda b, nd=nd: (0,) * nd)

    in_specs = ([pl.BlockSpec((bt, Np, CPP), lambda b: (b, 0, 0))]
                + [bcast(w) for w in weights])
    out_specs = (pl.BlockSpec((bt, 1, D), lambda b: (b, 0, 0)),
                 pl.BlockSpec((bt, 1, pad), lambda b: (b, 0, 0)))

    emb, logits = pl.pallas_call(
        kernel,
        out_shape=(jax.ShapeDtypeStruct((B, 1, D), jnp.float32),
                   jax.ShapeDtypeStruct((B, 1, pad), jnp.float32)),
        grid=(B // bt,),
        in_specs=in_specs,
        out_specs=out_specs,
        scratch_shapes=[pltpu.VMEM((bt, N, D), jnp.float32)],
        compiler_params=pltpu.CompilerParams(
            dimension_semantics=("parallel",)),   # keeps v7x's 2nd TC busy
    )(patches, *weights)
    return emb.reshape(B, D), logits.reshape(B, pad)


# ------------------------------ parameters ---------------------------------

def init_params(key, cfg):
    D = cfg["dim"]
    C = cfg["in_chans"]
    P = cfg["patch"]
    Np = (cfg["img_size"] // P) ** 2
    N = Np + 1
    mlp_h = cfg["mlp_ratio"] * D
    depth = cfg["depth"]
    heads = cfg["num_heads"]
    hd = D // heads
    pad = cfg["logits_pad"]
    bf = jnp.bfloat16

    keys = iter(jax.random.split(key, 64))

    def nrm(shape, std=0.02, dtype=jnp.float32):
        return (std * jax.random.normal(next(keys), shape)).astype(dtype)

    # attention scale folded into q-columns of qkv weights/bias (free win):
    # q' = scale*(x@Wq + bq)  ==  x@(scale*Wq) + scale*bq
    scale = hd ** -0.5
    q_scale = jnp.concatenate(
        [jnp.full((D,), scale, jnp.float32), jnp.ones((2 * D,), jnp.float32)])
    qkv_w = nrm((depth, D, 3 * D)) * q_scale[None, None, :]
    qkv_b = nrm((depth, 1, 3 * D)) * q_scale[None, None, :]

    params = dict(
        # conv weight flattened (c, kH, kW) -> D; for real torch weights use
        # (out,in,kH,kW).reshape(out, -1).T
        patch_w=nrm((C * P * P, D), dtype=bf),
        patch_b=nrm((1, D)),
        cls_token=nrm((1, D)),
        pos_embed=nrm((N, D)),
        ln1_g=jnp.ones((depth, 1, D), jnp.float32),
        ln1_b=jnp.zeros((depth, 1, D), jnp.float32),
        qkv_w=qkv_w.astype(bf),
        qkv_b=qkv_b,
        proj_w=nrm((depth, D, D), dtype=bf),
        proj_b=nrm((depth, 1, D)),
        ls1=jnp.full((depth, 1, D), 0.1, jnp.float32),   # LayerScale gamma
        ln2_g=jnp.ones((depth, 1, D), jnp.float32),
        ln2_b=jnp.zeros((depth, 1, D), jnp.float32),
        fc1_w=nrm((depth, D, mlp_h), dtype=bf),
        fc1_b=nrm((depth, 1, mlp_h)),
        fc2_w=nrm((depth, mlp_h, D), dtype=bf),
        fc2_b=nrm((depth, 1, D)),
        ls2=jnp.full((depth, 1, D), 0.1, jnp.float32),
        norm_g=jnp.ones((1, D), jnp.float32),
        norm_b=jnp.zeros((1, D), jnp.float32),
    )

    # Fused multi-task heads: concatenated fc1 + block-diagonal fc2 whose
    # output is padded to a lane-dense 128-wide slab.  Mathematically equal to
    # the three independent nn.Sequential heads (ReLU elementwise; dropout is
    # identity at inference).
    hid_total = sum(cfg["head_hidden"].values())
    w1_parts, b1_parts = [], []
    w2 = jnp.zeros((hid_total, pad), jnp.float32)
    b2 = jnp.zeros((1, pad), jnp.float32)
    row, col = 0, 0
    for name in ("view", "condition", "severity"):
        hid = cfg["head_hidden"][name]
        ncls = cfg["num_classes"][name]
        w1_parts.append(nrm((D, hid)))
        b1_parts.append(nrm((1, hid)))
        w2 = w2.at[row:row + hid, col:col + ncls].set(nrm((hid, ncls)))
        b2 = b2.at[0, col:col + ncls].set(nrm((ncls,)))
        row += hid
        col += ncls
    params["head_w1"] = jnp.concatenate(w1_parts, axis=1).astype(bf)
    params["head_b1"] = jnp.concatenate(b1_parts, axis=1)
    params["head_w2"] = w2.astype(bf)
    params["head_b2"] = b2
    return params


# ------------------------------ forward pass --------------------------------

def dinov2_multitask_forward(x_nchw, params, cfg, return_features=False):
    B, C, H, W = x_nchw.shape
    P = cfg["patch"]
    nH, nW = H // P, W // P
    Np = nH * nW

    # Patch extraction is pure layout glue that XLA fuses under jit; the
    # embedding matmul itself runs inside the fused Pallas kernel.
    # TODO(synk): could be folded into the kernel via in-kernel slicing if the
    # extra XLA op ever shows up in the profile.
    patches = x_nchw.reshape(B, C, nH, P, nW, P)
    patches = patches.transpose(0, 2, 4, 1, 3, 5).reshape(B, Np, C * P * P)

    embeddings, logits = pallas_forward(patches, params, cfg)

    outputs, col = {}, 0
    for name in ("view", "condition", "severity"):
        ncls = cfg["num_classes"][name]
        outputs[name] = logits[:, col:col + ncls]
        col += ncls
    if return_features:
        return outputs, embeddings
    return outputs


# --------------------------------- driver ----------------------------------

if __name__ == "__main__":
    key = jax.random.PRNGKey(0)
    k_param, k_x = jax.random.split(key)

    params = init_params(k_param, CFG)
    x = jax.random.normal(
        k_x, (CFG["batch"], CFG["in_chans"], CFG["img_size"], CFG["img_size"]),
        dtype=jnp.float32,
    )

    @jax.jit
    def run(x_in, p):
        return dinov2_multitask_forward(x_in, p, CFG, return_features=True)

    outputs, emb = run(x, params)
    jax.block_until_ready((outputs, emb))

    assert outputs["view"].shape == (CFG["batch"], CFG["num_classes"]["view"])
    assert outputs["condition"].shape == (CFG["batch"], CFG["num_classes"]["condition"])
    assert outputs["severity"].shape == (CFG["batch"], CFG["num_classes"]["severity"])
    assert emb.shape == (CFG["batch"], CFG["dim"])
    assert all(bool(jnp.all(jnp.isfinite(v))) for v in outputs.values())
    assert bool(jnp.all(jnp.isfinite(emb)))

    print("KERNEL_OK")
</pallas_src>

<mosaic_0001>
module attributes {stable_mosaic.version = 11 : i64} {
  func.func @_fused_forward_kernel(%arg0: i32, %arg1: memref<1x4x588xf32, #tpu.memory_space<vmem>>, %arg2: memref<588x128xbf16, #tpu.memory_space<vmem>>, %arg3: memref<1x128xf32, #tpu.memory_space<vmem>>, %arg4: memref<1x128xf32, #tpu.memory_space<vmem>>, %arg5: memref<5x128xf32, #tpu.memory_space<vmem>>, %arg6: memref<2x1x128xf32, #tpu.memory_space<vmem>>, %arg7: memref<2x1x128xf32, #tpu.memory_space<vmem>>, %arg8: memref<2x128x384xbf16, #tpu.memory_space<vmem>>, %arg9: memref<2x1x384xf32, #tpu.memory_space<vmem>>, %arg10: memref<2x128x128xbf16, #tpu.memory_space<vmem>>, %arg11: memref<2x1x128xf32, #tpu.memory_space<vmem>>, %arg12: memref<2x1x128xf32, #tpu.memory_space<vmem>>, %arg13: memref<2x1x128xf32, #tpu.memory_space<vmem>>, %arg14: memref<2x1x128xf32, #tpu.memory_space<vmem>>, %arg15: memref<2x128x512xbf16, #tpu.memory_space<vmem>>, %arg16: memref<2x1x512xf32, #tpu.memory_space<vmem>>, %arg17: memref<2x512x128xbf16, #tpu.memory_space<vmem>>, %arg18: memref<2x1x128xf32, #tpu.memory_space<vmem>>, %arg19: memref<2x1x128xf32, #tpu.memory_space<vmem>>, %arg20: memref<1x128xf32, #tpu.memory_space<vmem>>, %arg21: memref<1x128xf32, #tpu.memory_space<vmem>>, %arg22: memref<128x1024xbf16, #tpu.memory_space<vmem>>, %arg23: memref<1x1024xf32, #tpu.memory_space<vmem>>, %arg24: memref<1024x128xbf16, #tpu.memory_space<vmem>>, %arg25: memref<1x128xf32, #tpu.memory_space<vmem>>, %arg26: memref<1x1x128xf32, #tpu.memory_space<vmem>>, %arg27: memref<1x1x128xf32, #tpu.memory_space<vmem>>, %arg28: memref<1x5x128xf32, #tpu.memory_space<vmem>>) attributes {dimension_semantics = [#tpu.dimension_semantics<parallel>], iteration_bounds = array<i64: 2>, scalar_prefetch = 0 : i64, scratch_operands = 1 : i64, tpu.core_type = #tpu.core_type<tc>, window_params = [{transform_indices = @transform_0, window_bounds = array<i64: 1, 4, 588>}, {pipeline_mode = #tpu.pipeline_mode<synchronous>, transform_indices = @transform_1, window_bounds = array<i64: 588, 128>}, {pipeline_mode = #tpu.pipeline_mode<synchronous>, transform_indices = @transform_2, window_bounds = array<i64: 1, 128>}, {pipeline_mode = #tpu.pipeline_mode<synchronous>, transform_indices = @transform_3, window_bounds = array<i64: 1, 128>}, {pipeline_mode = #tpu.pipeline_mode<synchronous>, transform_indices = @transform_4, window_bounds = array<i64: 5, 128>}, {pipeline_mode = #tpu.pipeline_mode<synchronous>, transform_indices = @transform_5, window_bounds = array<i64: 2, 1, 128>}, {pipeline_mode = #tpu.pipeline_mode<synchronous>, transform_indices = @transform_6, window_bounds = array<i64: 2, 1, 128>}, {pipeline_mode = #tpu.pipeline_mode<synchronous>, transform_indices = @transform_7, window_bounds = array<i64: 2, 128, 384>}, {pipeline_mode = #tpu.pipeline_mode<synchronous>, transform_indices = @transform_8, window_bounds = array<i64: 2, 1, 384>}, {pipeline_mode = #tpu.pipeline_mode<synchronous>, transform_indices = @transform_9, window_bounds = array<i64: 2, 128, 128>}, {pipeline_mode = #tpu.pipeline_mode<synchronous>, transform_indices = @transform_10, window_bounds = array<i64: 2, 1, 128>}, {pipeline_mode = #tpu.pipeline_mode<synchronous>, transform_indices = @transform_11, window_bounds = array<i64: 2, 1, 128>}, {pipeline_mode = #tpu.pipeline_mode<synchronous>, transform_indices = @transform_12, window_bounds = array<i64: 2, 1, 128>}, {pipeline_mode = #tpu.pipeline_mode<synchronous>, transform_indices = @transform_13, window_bounds = array<i64: 2, 1, 128>}, {pipeline_mode = #tpu.pipeline_mode<synchronous>, transform_indices = @transform_14, window_bounds = array<i64: 2, 128, 512>}, {pipeline_mode = #tpu.pipeline_mode<synchronous>, transform_indices = @transform_15, window_bounds = array<i64: 2, 1, 512>}, {pipeline_mode = #tpu.pipeline_mode<synchronous>, transform_indices = @transform_16, window_bounds = array<i64: 2, 512, 128>}, {pipeline_mode = #tpu.pipeline_mode<synchronous>, transform_indices = @transform_17, window_bounds = array<i64: 2, 1, 128>}, {pipeline_mode = #tpu.pipeline_mode<synchronous>, transform_indices = @transform_18, window_bounds = array<i64: 2, 1, 128>}, {pipeline_mode = #tpu.pipeline_mode<synchronous>, transform_indices = @transform_19, window_bounds = array<i64: 1, 128>}, {pipeline_mode = #tpu.pipeline_mode<synchronous>, transform_indices = @transform_20, window_bounds = array<i64: 1, 128>}, {pipeline_mode = #tpu.pipeline_mode<synchronous>, transform_indices = @transform_21, window_bounds = array<i64: 128, 1024>}, {pipeline_mode = #tpu.pipeline_mode<synchronous>, transform_indices = @transform_22, window_bounds = array<i64: 1, 1024>}, {pipeline_mode = #tpu.pipeline_mode<synchronous>, transform_indices = @transform_23, window_bounds = array<i64: 1024, 128>}, {pipeline_mode = #tpu.pipeline_mode<synchronous>, transform_indices = @transform_24, window_bounds = array<i64: 1, 128>}, {transform_indices = @transform_25, window_bounds = array<i64: 1, 1, 128>}, {transform_indices = @transform_26, window_bounds = array<i64: 1, 1, 128>}]} {
    %c0 = arith.constant 0 : index
    %c0_0 = arith.constant 0 : index
    %c0_1 = arith.constant 0 : index
    %0 = vector.load %arg1[%c0, %c0_0, %c0_1] : memref<1x4x588xf32, #tpu.memory_space<vmem>>, vector<1x4x588xf32>
    %1 = vector.shape_cast %0 : vector<1x4x588xf32> to vector<4x588xf32>
    %2 = arith.truncf %1 : vector<4x588xf32> to vector<4x588xbf16>
    %c0_2 = arith.constant 0 : index
    %c0_3 = arith.constant 0 : index
    %3 = vector.load %arg2[%c0_2, %c0_3] : memref<588x128xbf16, #tpu.memory_space<vmem>>, vector<588x128xbf16>
    %cst = arith.constant dense<0.000000e+00> : vector<4x128xf32>
    %4 = tpu.matmul %2, %3, %cst {dimension_numbers = #tpu.dot_dimension_numbers<[1], [0], [0], [1], [0, 0, 1, 1], [], []>} : vector<4x588xbf16>, vector<588x128xbf16>, vector<4x128xf32> -> vector<4x128xf32>
    %c0_4 = arith.constant 0 : index
    %c0_5 = arith.constant 0 : index
    %5 = vector.load %arg3[%c0_4, %c0_5] : memref<1x128xf32, #tpu.memory_space<vmem>>, vector<1x128xf32>
    %6 = vector.broadcast %5 : vector<1x128xf32> to vector<4x128xf32>
    %7 = arith.addf %4, %6 : vector<4x128xf32>
    %c0_6 = arith.constant 0 : index
    %c0_7 = arith.constant 0 : index
    %8 = vector.load %arg4[%c0_6, %c0_7] : memref<1x128xf32, #tpu.memory_space<vmem>>, vector<1x128xf32>
    %c0_8 = arith.constant 0 : index
    %c0_9 = arith.constant 0 : index
    %9 = vector.load %arg5[%c0_8, %c0_9] : memref<5x128xf32, #tpu.memory_space<vmem>>, vector<1x128xf32>
    %10 = arith.addf %8, %9 : vector<1x128xf32>
    %11 = vector.shape_cast %10 : vector<1x128xf32> to vector<1x1x128xf32>
    %c0_10 = arith.constant 0 : index
    %c0_11 = arith.constant 0 : index
    %c0_12 = arith.constant 0 : index
    %12 = vector.load %arg28[%c0_10, %c0_11, %c0_12] : memref<1x5x128xf32, #tpu.memory_space<vmem>>, vector<1x1x128xf32>
    tpu.vector_store %arg28[%c0_10, %c0_11, %c0_12], %11 {strides = array<i32>} : memref<1x5x128xf32, #tpu.memory_space<vmem>>, vector<1x1x128xf32>,
    %13 = vector.shape_cast %7 : vector<4x128xf32> to vector<1x4x128xf32>
    %c1 = arith.constant 1 : index
    %c0_13 = arith.constant 0 : index
    %14 = vector.load %arg5[%c1, %c0_13] : memref<5x128xf32, #tpu.memory_space<vmem>>, vector<4x128xf32>
    %15 = vector.shape_cast %14 : vector<4x128xf32> to vector<1x4x128xf32>
    %16 = arith.addf %13, %15 : vector<1x4x128xf32>
    %c0_14 = arith.constant 0 : index
    %c1_15 = arith.constant 1 : index
    %c0_16 = arith.constant 0 : index
    %17 = vector.load %arg28[%c0_14, %c1_15, %c0_16] : memref<1x5x128xf32, #tpu.memory_space<vmem>>, vector<1x4x128xf32>
    tpu.vector_store %arg28[%c0_14, %c1_15, %c0_16], %16 {strides = array<i32>} : memref<1x5x128xf32, #tpu.memory_space<vmem>>, vector<1x4x128xf32>,
    %c0_17 = arith.constant 0 : index
    %c0_18 = arith.constant 0 : index
    %c0_19 = arith.constant 0 : index
    %18 = vector.load %arg28[%c0_17, %c0_18, %c0_19] : memref<1x5x128xf32, #tpu.memory_space<vmem>>, vector<1x5x128xf32>
    %19 = vector.shape_cast %18 : vector<1x5x128xf32> to vector<5x128xf32>
    %c0_20 = arith.constant 0 : index
    %c0_21 = arith.constant 0 : index
    %c0_22 = arith.constant 0 : index
    %20 = vector.load %arg6[%c0_20, %c0_21, %c0_22] : memref<2x1x128xf32, #tpu.memory_space<vmem>>, vector<1x1x128xf32>
    %21 = vector.shape_cast %20 : vector<1x1x128xf32> to vector<1x128xf32>
    %c0_23 = arith.constant 0 : index
    %c0_24 = arith.constant 0 : index
    %c0_25 = arith.constant 0 : index
    %22 = vector.load %arg7[%c0_23, %c0_24, %c0_25] : memref<2x1x128xf32, #tpu.memory_space<vmem>>, vector<1x1x128xf32>
    %23 = vector.shape_cast %22 : vector<1x1x128xf32> to vector<1x128xf32>
    %cst_26 = arith.constant dense<0.000000e+00> : vector<5xf32>
    %24 = vector.multi_reduction <add>, %19, %cst_26 [1] : vector<5x128xf32> to vector<5xf32>
    %25 = vector.shape_cast %24 : vector<5xf32> to vector<5x1xf32>
    %cst_27 = arith.constant 1.280000e+02 : f32
    %26 = vector.broadcast %cst_27 : f32 to vector<5x1xf32>
    %27 = arith.divf %25, %26 : vector<5x1xf32>
    %28 = vector.broadcast %27 : vector<5x1xf32> to vector<5x128xf32>
    %29 = arith.subf %19, %28 : vector<5x128xf32>
    %30 = arith.mulf %29, %29 : vector<5x128xf32>
    %cst_28 = arith.constant dense<0.000000e+00> : vector<5xf32>
    %31 = vector.multi_reduction <add>, %30, %cst_28 [1] : vector<5x128xf32> to vector<5xf32>
    %32 = vector.shape_cast %31 : vector<5xf32> to vector<5x1xf32>
    %cst_29 = arith.constant 1.280000e+02 : f32
    %33 = vector.broadcast %cst_29 : f32 to vector<5x1xf32>
    %34 = arith.divf %32, %33 : vector<5x1xf32>
    %35 = vector.broadcast %27 : vector<5x1xf32> to vector<5x128xf32>
    %36 = arith.subf %19, %35 : vector<5x128xf32>
    %cst_30 = arith.constant 9.99999997E-7 : f32
    %37 = vector.broadcast %cst_30 : f32 to vector<5x1xf32>
    %38 = arith.addf %34, %37 : vector<5x1xf32>
    %39 = math.rsqrt %38 : vector<5x1xf32>
    %40 = vector.broadcast %39 : vector<5x1xf32> to vector<5x128xf32>
    %41 = arith.mulf %36, %40 : vector<5x128xf32>
    %42 = vector.broadcast %21 : vector<1x128xf32> to vector<5x128xf32>
    %43 = arith.mulf %41, %42 : vector<5x128xf32>
    %44 = vector.broadcast %23 : vector<1x128xf32> to vector<5x128xf32>
    %45 = arith.addf %43, %44 : vector<5x128xf32>
    %46 = arith.truncf %45 : vector<5x128xf32> to vector<5x128xbf16>
    %c0_31 = arith.constant 0 : index
    %c0_32 = arith.constant 0 : index
    %c0_33 = arith.constant 0 : index
    %47 = vector.load %arg8[%c0_31, %c0_32, %c0_33] : memref<2x128x384xbf16, #tpu.memory_space<vmem>>, vector<1x128x384xbf16>
    %48 = vector.shape_cast %47 : vector<1x128x384xbf16> to vector<128x384xbf16>
    %cst_34 = arith.constant dense<0.000000e+00> : vector<5x384xf32>
    %49 = tpu.matmul %46, %48, %cst_34 {dimension_numbers = #tpu.dot_dimension_numbers<[1], [0], [0], [1], [0, 0, 1, 1], [], []>} : vector<5x128xbf16>, vector<128x384xbf16>, vector<5x384xf32> -> vector<5x384xf32>
    %c0_35 = arith.constant 0 : index
    %c0_36 = arith.constant 0 : index
    %c0_37 = arith.constant 0 : index
    %50 = vector.load %arg9[%c0_35, %c0_36, %c0_37] : memref<2x1x384xf32, #tpu.memory_space<vmem>>, vector<1x1x384xf32>
    %51 = vector.shape_cast %50 : vector<1x1x384xf32> to vector<1x384xf32>
    %52 = vector.broadcast %51 : vector<1x384xf32> to vector<5x384xf32>
    %53 = arith.addf %49, %52 : vector<5x384xf32>
    %54 = vector.extract_strided_slice %53 {offsets = [0, 0], sizes = [5, 64], strides = [1, 1]} : vector<5x384xf32> to vector<5x64xf32>
    %55 = vector.extract_strided_slice %53 {offsets = [0, 128], sizes = [5, 64], strides = [1, 1]} : vector<5x384xf32> to vector<5x64xf32>
    %56 = vector.extract_strided_slice %53 {offsets = [0, 256], sizes = [5, 64], strides = [1, 1]} : vector<5x384xf32> to vector<5x64xf32>
    %57 = arith.truncf %54 : vector<5x64xf32> to vector<5x64xbf16>
    %58 = arith.truncf %55 : vector<5x64xf32> to vector<5x64xbf16>
    "tpu.trace_start"() <{level = 10 : i32, message = "qd,kd->qk"}> : () -> ()
    %cst_38 = arith.constant dense<0.000000e+00> : vector<5x5xf32>
    %59 = tpu.matmul %57, %58, %cst_38 {dimension_numbers = #tpu.dot_dimension_numbers<[1], [1], [0], [0], [0, 0, 1, 0], [], []>} : vector<5x64xbf16>, vector<5x64xbf16>, vector<5x5xf32> -> vector<5x5xf32>
    "tpu.trace_stop"() : () -> ()
    %cst_39 = arith.constant dense<0xFF800000> : vector<5xf32>
    %60 = vector.multi_reduction <maximumf>, %59, %cst_39 [1] : vector<5x5xf32> to vector<5xf32>
    %61 = vector.shape_cast %60 : vector<5xf32> to vector<5x1xf32>
    %62 = vector.broadcast %61 : vector<5x1xf32> to vector<5x5xf32>
    %63 = arith.subf %59, %62 : vector<5x5xf32>
    %64 = math.exp %63 : vector<5x5xf32>
    %cst_40 = arith.constant dense<0.000000e+00> : vector<5xf32>
    %65 = vector.multi_reduction <add>, %64, %cst_40 [1] : vector<5x5xf32> to vector<5xf32>
    %66 = vector.shape_cast %65 : vector<5xf32> to vector<5x1xf32>
    %67 = tpu.reciprocal %66 {approx = true} : vector<5x1xf32> -> vector<5x1xf32>
    %68 = vector.broadcast %67 : vector<5x1xf32> to vector<5x5xf32>
    %69 = arith.mulf %64, %68 : vector<5x5xf32>
    %70 = arith.truncf %69 : vector<5x5xf32> to vector<5x5xbf16>
    %71 = arith.truncf %56 : vector<5x64xf32> to vector<5x64xbf16>
    %cst_41 = arith.constant dense<0.000000e+00> : vector<5x64xf32>
    %72 = tpu.matmul %70, %71, %cst_41 {dimension_numbers = #tpu.dot_dimension_numbers<[1], [0], [0], [1], [0, 0, 1, 1], [], []>} : vector<5x5xbf16>, vector<5x64xbf16>, vector<5x64xf32> -> vector<5x64xf32>
    %73 = vector.extract_strided_slice %53 {offsets = [0, 64], sizes = [5, 64], strides = [1, 1]} : vector<5x384xf32> to vector<5x64xf32>
    %74 = vector.extract_strided_slice %53 {offsets = [0, 192], sizes = [5, 64], strides = [1, 1]} : vector<5x384xf32> to vector<5x64xf32>
    %75 = vector.extract_strided_slice %53 {offsets = [0, 320], sizes = [5, 64], strides = [1, 1]} : vector<5x384xf32> to vector<5x64xf32>
    %76 = arith.truncf %73 : vector<5x64xf32> to vector<5x64xbf16>
    %77 = arith.truncf %74 : vector<5x64xf32> to vector<5x64xbf16>
    "tpu.trace_start"() <{level = 10 : i32, message = "qd,kd->qk"}> : () -> ()
    %cst_42 = arith.constant dense<0.000000e+00> : vector<5x5xf32>
    %78 = tpu.matmul %76, %77, %cst_42 {dimension_numbers = #tpu.dot_dimension_numbers<[1], [1], [0], [0], [0, 0, 1, 0], [], []>} : vector<5x64xbf16>, vector<5x64xbf16>, vector<5x5xf32> -> vector<5x5xf32>
    "tpu.trace_stop"() : () -> ()
    %cst_43 = arith.constant dense<0xFF800000> : vector<5xf32>
    %79 = vector.multi_reduction <maximumf>, %78, %cst_43 [1] : vector<5x5xf32> to vector<5xf32>
    %80 = vector.shape_cast %79 : vector<5xf32> to vector<5x1xf32>
    %81 = vector.broadcast %80 : vector<5x1xf32> to vector<5x5xf32>
    %82 = arith.subf %78, %81 : vector<5x5xf32>
    %83 = math.exp %82 : vector<5x5xf32>
    %cst_44 = arith.constant dense<0.000000e+00> : vector<5xf32>
    %84 = vector.multi_reduction <add>, %83, %cst_44 [1] : vector<5x5xf32> to vector<5xf32>
    %85 = vector.shape_cast %84 : vector<5xf32> to vector<5x1xf32>
    %86 = tpu.reciprocal %85 {approx = true} : vector<5x1xf32> -> vector<5x1xf32>
    %87 = vector.broadcast %86 : vector<5x1xf32> to vector<5x5xf32>
    %88 = arith.mulf %83, %87 : vector<5x5xf32>
    %89 = arith.truncf %88 : vector<5x5xf32> to vector<5x5xbf16>
    %90 = arith.truncf %75 : vector<5x64xf32> to vector<5x64xbf16>
    %cst_45 = arith.constant dense<0.000000e+00> : vector<5x64xf32>
    %91 = tpu.matmul %89, %90, %cst_45 {dimension_numbers = #tpu.dot_dimension_numbers<[1], [0], [0], [1], [0, 0, 1, 1], [], []>} : vector<5x5xbf16>, vector<5x64xbf16>, vector<5x64xf32> -> vector<5x64xf32>
    %92 = tpu.concatenate %72, %91 in 1 : vector<5x64xf32>, vector<5x64xf32> -> vector<5x128xf32>
    %93 = arith.truncf %92 : vector<5x128xf32> to vector<5x128xbf16>
    %c0_46 = arith.constant 0 : index
    %c0_47 = arith.constant 0 : index
    %c0_48 = arith.constant 0 : index
    %94 = vector.load %arg10[%c0_46, %c0_47, %c0_48] : memref<2x128x128xbf16, #tpu.memory_space<vmem>>, vector<1x128x128xbf16>
    %95 = vector.shape_cast %94 : vector<1x128x128xbf16> to vector<128x128xbf16>
    %cst_49 = arith.constant dense<0.000000e+00> : vector<5x128xf32>
    %96 = tpu.matmul %93, %95, %cst_49 {dimension_numbers = #tpu.dot_dimension_numbers<[1], [0], [0], [1], [0, 0, 1, 1], [], []>} : vector<5x128xbf16>, vector<128x128xbf16>, vector<5x128xf32> -> vector<5x128xf32>
    %c0_50 = arith.constant 0 : index
    %c0_51 = arith.constant 0 : index
    %c0_52 = arith.constant 0 : index
    %97 = vector.load %arg11[%c0_50, %c0_51, %c0_52] : memref<2x1x128xf32, #tpu.memory_space<vmem>>, vector<1x1x128xf32>
    %98 = vector.shape_cast %97 : vector<1x1x128xf32> to vector<1x128xf32>
    %99 = vector.broadcast %98 : vector<1x128xf32> to vector<5x128xf32>
    %100 = arith.addf %96, %99 : vector<5x128xf32>
    %c0_53 = arith.constant 0 : index
    %c0_54 = arith.constant 0 : index
    %c0_55 = arith.constant 0 : index
    %101 = vector.load %arg12[%c0_53, %c0_54, %c0_55] : memref<2x1x128xf32, #tpu.memory_space<vmem>>, vector<1x1x128xf32>
    %102 = vector.shape_cast %101 : vector<1x1x128xf32> to vector<1x128xf32>
    %103 = vector.broadcast %102 : vector<1x128xf32> to vector<5x128xf32>
    %104 = arith.mulf %100, %103 : vector<5x128xf32>
    %105 = arith.addf %19, %104 : vector<5x128xf32>
    %c0_56 = arith.constant 0 : index
    %c0_57 = arith.constant 0 : index
    %c0_58 = arith.constant 0 : index
    %106 = vector.load %arg13[%c0_56, %c0_57, %c0_58] : memref<2x1x128xf32, #tpu.memory_space<vmem>>, vector<1x1x128xf32>
    %107 = vector.shape_cast %106 : vector<1x1x128xf32> to vector<1x128xf32>
    %c0_59 = arith.constant 0 : index
    %c0_60 = arith.constant 0 : index
    %c0_61 = arith.constant 0 : index
    %108 = vector.load %arg14[%c0_59, %c0_60, %c0_61] : memref<2x1x128xf32, #tpu.memory_space<vmem>>, vector<1x1x128xf32>
    %109 = vector.shape_cast %108 : vector<1x1x128xf32> to vector<1x128xf32>
    %cst_62 = arith.constant dense<0.000000e+00> : vector<5xf32>
    %110 = vector.multi_reduction <add>, %105, %cst_62 [1] : vector<5x128xf32> to vector<5xf32>
    %111 = vector.shape_cast %110 : vector<5xf32> to vector<5x1xf32>
    %cst_63 = arith.constant 1.280000e+02 : f32
    %112 = vector.broadcast %cst_63 : f32 to vector<5x1xf32>
    %113 = arith.divf %111, %112 : vector<5x1xf32>
    %114 = vector.broadcast %113 : vector<5x1xf32> to vector<5x128xf32>
    %115 = arith.subf %105, %114 : vector<5x128xf32>
    %116 = arith.mulf %115, %115 : vector<5x128xf32>
    %cst_64 = arith.constant dense<0.000000e+00> : vector<5xf32>
    %117 = vector.multi_reduction <add>, %116, %cst_64 [1] : vector<5x128xf32> to vector<5xf32>
    %118 = vector.shape_cast %117 : vector<5xf32> to vector<5x1xf32>
    %cst_65 = arith.constant 1.280000e+02 : f32
    %119 = vector.broadcast %cst_65 : f32 to vector<5x1xf32>
    %120 = arith.divf %118, %119 : vector<5x1xf32>
    %121 = vector.broadcast %113 : vector<5x1xf32> to vector<5x128xf32>
    %122 = arith.subf %105, %121 : vector<5x128xf32>
    %cst_66 = arith.constant 9.99999997E-7 : f32
    %123 = vector.broadcast %cst_66 : f32 to vector<5x1xf32>
    %124 = arith.addf %120, %123 : vector<5x1xf32>
    %125 = math.rsqrt %124 : vector<5x1xf32>
    %126 = vector.broadcast %125 : vector<5x1xf32> to vector<5x128xf32>
    %127 = arith.mulf %122, %126 : vector<5x128xf32>
    %128 = vector.broadcast %107 : vector<1x128xf32> to vector<5x128xf32>
    %129 = arith.mulf %127, %128 : vector<5x128xf32>
    %130 = vector.broadcast %109 : vector<1x128xf32> to vector<5x128xf32>
    %131 = arith.addf %129, %130 : vector<5x128xf32>
    %132 = arith.truncf %131 : vector<5x128xf32> to vector<5x128xbf16>
    %c0_67 = arith.constant 0 : index
    %c0_68 = arith.constant 0 : index
    %c0_69 = arith.constant 0 : index
    %133 = vector.load %arg15[%c0_67, %c0_68, %c0_69] : memref<2x128x512xbf16, #tpu.memory_space<vmem>>, vector<1x128x512xbf16>
    %134 = vector.shape_cast %133 : vector<1x128x512xbf16> to vector<128x512xbf16>
    %cst_70 = arith.constant dense<0.000000e+00> : vector<5x512xf32>
    %135 = tpu.matmul %132, %134, %cst_70 {dimension_numbers = #tpu.dot_dimension_numbers<[1], [0], [0], [1], [0, 0, 1, 1], [], []>} : vector<5x128xbf16>, vector<128x512xbf16>, vector<5x512xf32> -> vector<5x512xf32>
    %c0_71 = arith.constant 0 : index
    %c0_72 = arith.constant 0 : index
    %c0_73 = arith.constant 0 : index
    %136 = vector.load %arg16[%c0_71, %c0_72, %c0_73] : memref<2x1x512xf32, #tpu.memory_space<vmem>>, vector<1x1x512xf32>
    %137 = vector.shape_cast %136 : vector<1x1x512xf32> to vector<1x512xf32>
    %138 = vector.broadcast %137 : vector<1x512xf32> to vector<5x512xf32>
    %139 = arith.addf %135, %138 : vector<5x512xf32>
    %cst_74 = arith.constant 5.000000e-01 : f32
    %140 = vector.broadcast %cst_74 : f32 to vector<5x512xf32>
    %141 = arith.mulf %140, %139 : vector<5x512xf32>
    %cst_75 = arith.constant 0.707106769 : f32
    %142 = vector.broadcast %cst_75 : f32 to vector<5x512xf32>
    %143 = arith.mulf %139, %142 : vector<5x512xf32>
    %144 = math.erf %143 : vector<5x512xf32>
    %cst_76 = arith.constant 1.000000e+00 : f32
    %145 = vector.broadcast %cst_76 : f32 to vector<5x512xf32>
    %146 = arith.addf %145, %144 : vector<5x512xf32>
    %147 = arith.mulf %141, %146 : vector<5x512xf32>
    %148 = arith.truncf %147 : vector<5x512xf32> to vector<5x512xbf16>
    %c0_77 = arith.constant 0 : index
    %c0_78 = arith.constant 0 : index
    %c0_79 = arith.constant 0 : index
    %149 = vector.load %arg17[%c0_77, %c0_78, %c0_79] : memref<2x512x128xbf16, #tpu.memory_space<vmem>>, vector<1x512x128xbf16>
    %150 = vector.shape_cast %149 : vector<1x512x128xbf16> to vector<512x128xbf16>
    %cst_80 = arith.constant dense<0.000000e+00> : vector<5x128xf32>
    %151 = tpu.matmul %148, %150, %cst_80 {dimension_numbers = #tpu.dot_dimension_numbers<[1], [0], [0], [1], [0, 0, 1, 1], [], []>} : vector<5x512xbf16>, vector<512x128xbf16>, vector<5x128xf32> -> vector<5x128xf32>
    %c0_81 = arith.constant 0 : index
    %c0_82 = arith.constant 0 : index
    %c0_83 = arith.constant 0 : index
    %152 = vector.load %arg18[%c0_81, %c0_82, %c0_83] : memref<2x1x128xf32, #tpu.memory_space<vmem>>, vector<1x1x128xf32>
    %153 = vector.shape_cast %152 : vector<1x1x128xf32> to vector<1x128xf32>
    %154 = vector.broadcast %153 : vector<1x128xf32> to vector<5x128xf32>
    %155 = arith.addf %151, %154 : vector<5x128xf32>
    %c0_84 = arith.constant 0 : index
    %c0_85 = arith.constant 0 : index
    %c0_86 = arith.constant 0 : index
    %156 = vector.load %arg19[%c0_84, %c0_85, %c0_86] : memref<2x1x128xf32, #tpu.memory_space<vmem>>, vector<1x1x128xf32>
    %157 = vector.shape_cast %156 : vector<1x1x128xf32> to vector<1x128xf32>
    %158 = vector.broadcast %157 : vector<1x128xf32> to vector<5x128xf32>
    %159 = arith.mulf %155, %158 : vector<5x128xf32>
    %160 = arith.addf %105, %159 : vector<5x128xf32>
    %c1_87 = arith.constant 1 : index
    %c0_88 = arith.constant 0 : index
    %c0_89 = arith.constant 0 : index
    %161 = vector.load %arg6[%c1_87, %c0_88, %c0_89] : memref<2x1x128xf32, #tpu.memory_space<vmem>>, vector<1x1x128xf32>
    %162 = vector.shape_cast %161 : vector<1x1x128xf32> to vector<1x128xf32>
    %c1_90 = arith.constant 1 : index
    %c0_91 = arith.constant 0 : index
    %c0_92 = arith.constant 0 : index
    %163 = vector.load %arg7[%c1_90, %c0_91, %c0_92] : memref<2x1x128xf32, #tpu.memory_space<vmem>>, vector<1x1x128xf32>
    %164 = vector.shape_cast %163 : vector<1x1x128xf32> to vector<1x128xf32>
    %cst_93 = arith.constant dense<0.000000e+00> : vector<5xf32>
    %165 = vector.multi_reduction <add>, %160, %cst_93 [1] : vector<5x128xf32> to vector<5xf32>
    %166 = vector.shape_cast %165 : vector<5xf32> to vector<5x1xf32>
    %cst_94 = arith.constant 1.280000e+02 : f32
    %167 = vector.broadcast %cst_94 : f32 to vector<5x1xf32>
    %168 = arith.divf %166, %167 : vector<5x1xf32>
    %169 = vector.broadcast %168 : vector<5x1xf32> to vector<5x128xf32>
    %170 = arith.subf %160, %169 : vector<5x128xf32>
    %171 = arith.mulf %170, %170 : vector<5x128xf32>
    %cst_95 = arith.constant dense<0.000000e+00> : vector<5xf32>
    %172 = vector.multi_reduction <add>, %171, %cst_95 [1] : vector<5x128xf32> to vector<5xf32>
    %173 = vector.shape_cast %172 : vector<5xf32> to vector<5x1xf32>
    %cst_96 = arith.constant 1.280000e+02 : f32
    %174 = vector.broadcast %cst_96 : f32 to vector<5x1xf32>
    %175 = arith.divf %173, %174 : vector<5x1xf32>
    %176 = vector.broadcast %168 : vector<5x1xf32> to vector<5x128xf32>
    %177 = arith.subf %160, %176 : vector<5x128xf32>
    %cst_97 = arith.constant 9.99999997E-7 : f32
    %178 = vector.broadcast %cst_97 : f32 to vector<5x1xf32>
    %179 = arith.addf %175, %178 : vector<5x1xf32>
    %180 = math.rsqrt %179 : vector<5x1xf32>
    %181 = vector.broadcast %180 : vector<5x1xf32> to vector<5x128xf32>
    %182 = arith.mulf %177, %181 : vector<5x128xf32>
    %183 = vector.broadcast %162 : vector<1x128xf32> to vector<5x128xf32>
    %184 = arith.mulf %182, %183 : vector<5x128xf32>
    %185 = vector.broadcast %164 : vector<1x128xf32> to vector<5x128xf32>
    %186 = arith.addf %184, %185 : vector<5x128xf32>
    %187 = arith.truncf %186 : vector<5x128xf32> to vector<5x128xbf16>
    %c1_98 = arith.constant 1 : index
    %c0_99 = arith.constant 0 : index
    %c0_100 = arith.constant 0 : index
    %188 = vector.load %arg8[%c1_98, %c0_99, %c0_100] : memref<2x128x384xbf16, #tpu.memory_space<vmem>>, vector<1x128x384xbf16>
    %189 = vector.shape_cast %188 : vector<1x128x384xbf16> to vector<128x384xbf16>
    %cst_101 = arith.constant dense<0.000000e+00> : vector<5x384xf32>
    %190 = tpu.matmul %187, %189, %cst_101 {dimension_numbers = #tpu.dot_dimension_numbers<[1], [0], [0], [1], [0, 0, 1, 1], [], []>} : vector<5x128xbf16>, vector<128x384xbf16>, vector<5x384xf32> -> vector<5x384xf32>
    %c1_102 = arith.constant 1 : index
    %c0_103 = arith.constant 0 : index
    %c0_104 = arith.constant 0 : index
    %191 = vector.load %arg9[%c1_102, %c0_103, %c0_104] : memref<2x1x384xf32, #tpu.memory_space<vmem>>, vector<1x1x384xf32>
    %192 = vector.shape_cast %191 : vector<1x1x384xf32> to vector<1x384xf32>
    %193 = vector.broadcast %192 : vector<1x384xf32> to vector<5x384xf32>
    %194 = arith.addf %190, %193 : vector<5x384xf32>
    %195 = vector.extract_strided_slice %194 {offsets = [0, 0], sizes = [5, 64], strides = [1, 1]} : vector<5x384xf32> to vector<5x64xf32>
    %196 = vector.extract_strided_slice %194 {offsets = [0, 128], sizes = [5, 64], strides = [1, 1]} : vector<5x384xf32> to vector<5x64xf32>
    %197 = vector.extract_strided_slice %194 {offsets = [0, 256], sizes = [5, 64], strides = [1, 1]} : vector<5x384xf32> to vector<5x64xf32>
    %198 = arith.truncf %195 : vector<5x64xf32> to vector<5x64xbf16>
    %199 = arith.truncf %196 : vector<5x64xf32> to vector<5x64xbf16>
    "tpu.trace_start"() <{level = 10 : i32, message = "qd,kd->qk"}> : () -> ()
    %cst_105 = arith.constant dense<0.000000e+00> : vector<5x5xf32>
    %200 = tpu.matmul %198, %199, %cst_105 {dimension_numbers = #tpu.dot_dimension_numbers<[1], [1], [0], [0], [0, 0, 1, 0], [], []>} : vector<5x64xbf16>, vector<5x64xbf16>, vector<5x5xf32> -> vector<5x5xf32>
    "tpu.trace_stop"() : () -> ()
    %cst_106 = arith.constant dense<0xFF800000> : vector<5xf32>
    %201 = vector.multi_reduction <maximumf>, %200, %cst_106 [1] : vector<5x5xf32> to vector<5xf32>
    %202 = vector.shape_cast %201 : vector<5xf32> to vector<5x1xf32>
    %203 = vector.broadcast %202 : vector<5x1xf32> to vector<5x5xf32>
    %204 = arith.subf %200, %203 : vector<5x5xf32>
    %205 = math.exp %204 : vector<5x5xf32>
    %cst_107 = arith.constant dense<0.000000e+00> : vector<5xf32>
    %206 = vector.multi_reduction <add>, %205, %cst_107 [1] : vector<5x5xf32> to vector<5xf32>
    %207 = vector.shape_cast %206 : vector<5xf32> to vector<5x1xf32>
    %208 = tpu.reciprocal %207 {approx = true} : vector<5x1xf32> -> vector<5x1xf32>
    %209 = vector.broadcast %208 : vector<5x1xf32> to vector<5x5xf32>
    %210 = arith.mulf %205, %209 : vector<5x5xf32>
    %211 = arith.truncf %210 : vector<5x5xf32> to vector<5x5xbf16>
    %212 = arith.truncf %197 : vector<5x64xf32> to vector<5x64xbf16>
    %cst_108 = arith.constant dense<0.000000e+00> : vector<5x64xf32>
    %213 = tpu.matmul %211, %212, %cst_108 {dimension_numbers = #tpu.dot_dimension_numbers<[1], [0], [0], [1], [0, 0, 1, 1], [], []>} : vector<5x5xbf16>, vector<5x64xbf16>, vector<5x64xf32> -> vector<5x64xf32>
    %214 = vector.extract_strided_slice %194 {offsets = [0, 64], sizes = [5, 64], strides = [1, 1]} : vector<5x384xf32> to vector<5x64xf32>
    %215 = vector.extract_strided_slice %194 {offsets = [0, 192], sizes = [5, 64], strides = [1, 1]} : vector<5x384xf32> to vector<5x64xf32>
    %216 = vector.extract_strided_slice %194 {offsets = [0, 320], sizes = [5, 64], strides = [1, 1]} : vector<5x384xf32> to vector<5x64xf32>
    %217 = arith.truncf %214 : vector<5x64xf32> to vector<5x64xbf16>
    %218 = arith.truncf %215 : vector<5x64xf32> to vector<5x64xbf16>
    "tpu.trace_start"() <{level = 10 : i32, message = "qd,kd->qk"}> : () -> ()
    %cst_109 = arith.constant dense<0.000000e+00> : vector<5x5xf32>
    %219 = tpu.matmul %217, %218, %cst_109 {dimension_numbers = #tpu.dot_dimension_numbers<[1], [1], [0], [0], [0, 0, 1, 0], [], []>} : vector<5x64xbf16>, vector<5x64xbf16>, vector<5x5xf32> -> vector<5x5xf32>
    "tpu.trace_stop"() : () -> ()
    %cst_110 = arith.constant dense<0xFF800000> : vector<5xf32>
    %220 = vector.multi_reduction <maximumf>, %219, %cst_110 [1] : vector<5x5xf32> to vector<5xf32>
    %221 = vector.shape_cast %220 : vector<5xf32> to vector<5x1xf32>
    %222 = vector.broadcast %221 : vector<5x1xf32> to vector<5x5xf32>
    %223 = arith.subf %219, %222 : vector<5x5xf32>
    %224 = math.exp %223 : vector<5x5xf32>
    %cst_111 = arith.constant dense<0.000000e+00> : vector<5xf32>
    %225 = vector.multi_reduction <add>, %224, %cst_111 [1] : vector<5x5xf32> to vector<5xf32>
    %226 = vector.shape_cast %225 : vector<5xf32> to vector<5x1xf32>
    %227 = tpu.reciprocal %226 {approx = true} : vector<5x1xf32> -> vector<5x1xf32>
    %228 = vector.broadcast %227 : vector<5x1xf32> to vector<5x5xf32>
    %229 = arith.mulf %224, %228 : vector<5x5xf32>
    %230 = arith.truncf %229 : vector<5x5xf32> to vector<5x5xbf16>
    %231 = arith.truncf %216 : vector<5x64xf32> to vector<5x64xbf16>
    %cst_112 = arith.constant dense<0.000000e+00> : vector<5x64xf32>
    %232 = tpu.matmul %230, %231, %cst_112 {dimension_numbers = #tpu.dot_dimension_numbers<[1], [0], [0], [1], [0, 0, 1, 1], [], []>} : vector<5x5xbf16>, vector<5x64xbf16>, vector<5x64xf32> -> vector<5x64xf32>
    %233 = tpu.concatenate %213, %232 in 1 : vector<5x64xf32>, vector<5x64xf32> -> vector<5x128xf32>
    %234 = arith.truncf %233 : vector<5x128xf32> to vector<5x128xbf16>
    %c1_113 = arith.constant 1 : index
    %c0_114 = arith.constant 0 : index
    %c0_115 = arith.constant 0 : index
    %235 = vector.load %arg10[%c1_113, %c0_114, %c0_115] : memref<2x128x128xbf16, #tpu.memory_space<vmem>>, vector<1x128x128xbf16>
    %236 = vector.shape_cast %235 : vector<1x128x128xbf16> to vector<128x128xbf16>
    %cst_116 = arith.constant dense<0.000000e+00> : vector<5x128xf32>
    %237 = tpu.matmul %234, %236, %cst_116 {dimension_numbers = #tpu.dot_dimension_numbers<[1], [0], [0], [1], [0, 0, 1, 1], [], []>} : vector<5x128xbf16>, vector<128x128xbf16>, vector<5x128xf32> -> vector<5x128xf32>
    %c1_117 = arith.constant 1 : index
    %c0_118 = arith.constant 0 : index
    %c0_119 = arith.constant 0 : index
    %238 = vector.load %arg11[%c1_117, %c0_118, %c0_119] : memref<2x1x128xf32, #tpu.memory_space<vmem>>, vector<1x1x128xf32>
    %239 = vector.shape_cast %238 : vector<1x1x128xf32> to vector<1x128xf32>
    %240 = vector.broadcast %239 : vector<1x128xf32> to vector<5x128xf32>
    %241 = arith.addf %237, %240 : vector<5x128xf32>
    %c1_120 = arith.constant 1 : index
    %c0_121 = arith.constant 0 : index
    %c0_122 = arith.constant 0 : index
    %242 = vector.load %arg12[%c1_120, %c0_121, %c0_122] : memref<2x1x128xf32, #tpu.memory_space<vmem>>, vector<1x1x128xf32>
    %243 = vector.shape_cast %242 : vector<1x1x128xf32> to vector<1x128xf32>
    %244 = vector.broadcast %243 : vector<1x128xf32> to vector<5x128xf32>
    %245 = arith.mulf %241, %244 : vector<5x128xf32>
    %246 = arith.addf %160, %245 : vector<5x128xf32>
    %c1_123 = arith.constant 1 : index
    %c0_124 = arith.constant 0 : index
    %c0_125 = arith.constant 0 : index
    %247 = vector.load %arg13[%c1_123, %c0_124, %c0_125] : memref<2x1x128xf32, #tpu.memory_space<vmem>>, vector<1x1x128xf32>
    %248 = vector.shape_cast %247 : vector<1x1x128xf32> to vector<1x128xf32>
    %c1_126 = arith.constant 1 : index
    %c0_127 = arith.constant 0 : index
    %c0_128 = arith.constant 0 : index
    %249 = vector.load %arg14[%c1_126, %c0_127, %c0_128] : memref<2x1x128xf32, #tpu.memory_space<vmem>>, vector<1x1x128xf32>
    %250 = vector.shape_cast %249 : vector<1x1x128xf32> to vector<1x128xf32>
    %cst_129 = arith.constant dense<0.000000e+00> : vector<5xf32>
    %251 = vector.multi_reduction <add>, %246, %cst_129 [1] : vector<5x128xf32> to vector<5xf32>
    %252 = vector.shape_cast %251 : vector<5xf32> to vector<5x1xf32>
    %cst_130 = arith.constant 1.280000e+02 : f32
    %253 = vector.broadcast %cst_130 : f32 to vector<5x1xf32>
    %254 = arith.divf %252, %253 : vector<5x1xf32>
    %255 = vector.broadcast %254 : vector<5x1xf32> to vector<5x128xf32>
    %256 = arith.subf %246, %255 : vector<5x128xf32>
    %257 = arith.mulf %256, %256 : vector<5x128xf32>
    %cst_131 = arith.constant dense<0.000000e+00> : vector<5xf32>
    %258 = vector.multi_reduction <add>, %257, %cst_131 [1] : vector<5x128xf32> to vector<5xf32>
    %259 = vector.shape_cast %258 : vector<5xf32> to vector<5x1xf32>
    %cst_132 = arith.constant 1.280000e+02 : f32
    %260 = vector.broadcast %cst_132 : f32 to vector<5x1xf32>
    %261 = arith.divf %259, %260 : vector<5x1xf32>
    %262 = vector.broadcast %254 : vector<5x1xf32> to vector<5x128xf32>
    %263 = arith.subf %246, %262 : vector<5x128xf32>
    %cst_133 = arith.constant 9.99999997E-7 : f32
    %264 = vector.broadcast %cst_133 : f32 to vector<5x1xf32>
    %265 = arith.addf %261, %264 : vector<5x1xf32>
    %266 = math.rsqrt %265 : vector<5x1xf32>
    %267 = vector.broadcast %266 : vector<5x1xf32> to vector<5x128xf32>
    %268 = arith.mulf %263, %267 : vector<5x128xf32>
    %269 = vector.broadcast %248 : vector<1x128xf32> to vector<5x128xf32>
    %270 = arith.mulf %268, %269 : vector<5x128xf32>
    %271 = vector.broadcast %250 : vector<1x128xf32> to vector<5x128xf32>
    %272 = arith.addf %270, %271 : vector<5x128xf32>
    %273 = arith.truncf %272 : vector<5x128xf32> to vector<5x128xbf16>
    %c1_134 = arith.constant 1 : index
    %c0_135 = arith.constant 0 : index
    %c0_136 = arith.constant 0 : index
    %274 = vector.load %arg15[%c1_134, %c0_135, %c0_136] : memref<2x128x512xbf16, #tpu.memory_space<vmem>>, vector<1x128x512xbf16>
    %275 = vector.shape_cast %274 : vector<1x128x512xbf16> to vector<128x512xbf16>
    %cst_137 = arith.constant dense<0.000000e+00> : vector<5x512xf32>
    %276 = tpu.matmul %273, %275, %cst_137 {dimension_numbers = #tpu.dot_dimension_numbers<[1], [0], [0], [1], [0, 0, 1, 1], [], []>} : vector<5x128xbf16>, vector<128x512xbf16>, vector<5x512xf32> -> vector<5x512xf32>
    %c1_138 = arith.constant 1 : index
    %c0_139 = arith.constant 0 : index
    %c0_140 = arith.constant 0 : index
    %277 = vector.load %arg16[%c1_138, %c0_139, %c0_140] : memref<2x1x512xf32, #tpu.memory_space<vmem>>, vector<1x1x512xf32>
    %278 = vector.shape_cast %277 : vector<1x1x512xf32> to vector<1x512xf32>
    %279 = vector.broadcast %278 : vector<1x512xf32> to vector<5x512xf32>
    %280 = arith.addf %276, %279 : vector<5x512xf32>
    %cst_141 = arith.constant 5.000000e-01 : f32
    %281 = vector.broadcast %cst_141 : f32 to vector<5x512xf32>
    %282 = arith.mulf %281, %280 : vector<5x512xf32>
    %cst_142 = arith.constant 0.707106769 : f32
    %283 = vector.broadcast %cst_142 : f32 to vector<5x512xf32>
    %284 = arith.mulf %280, %283 : vector<5x512xf32>
    %285 = math.erf %284 : vector<5x512xf32>
    %cst_143 = arith.constant 1.000000e+00 : f32
    %286 = vector.broadcast %cst_143 : f32 to vector<5x512xf32>
    %287 = arith.addf %286, %285 : vector<5x512xf32>
    %288 = arith.mulf %282, %287 : vector<5x512xf32>
    %289 = arith.truncf %288 : vector<5x512xf32> to vector<5x512xbf16>
    %c1_144 = arith.constant 1 : index
    %c0_145 = arith.constant 0 : index
    %c0_146 = arith.constant 0 : index
    %290 = vector.load %arg17[%c1_144, %c0_145, %c0_146] : memref<2x512x128xbf16, #tpu.memory_space<vmem>>, vector<1x512x128xbf16>
    %291 = vector.shape_cast %290 : vector<1x512x128xbf16> to vector<512x128xbf16>
    %cst_147 = arith.constant dense<0.000000e+00> : vector<5x128xf32>
    %292 = tpu.matmul %289, %291, %cst_147 {dimension_numbers = #tpu.dot_dimension_numbers<[1], [0], [0], [1], [0, 0, 1, 1], [], []>} : vector<5x512xbf16>, vector<512x128xbf16>, vector<5x128xf32> -> vector<5x128xf32>
    %c1_148 = arith.constant 1 : index
    %c0_149 = arith.constant 0 : index
    %c0_150 = arith.constant 0 : index
    %293 = vector.load %arg18[%c1_148, %c0_149, %c0_150] : memref<2x1x128xf32, #tpu.memory_space<vmem>>, vector<1x1x128xf32>
    %294 = vector.shape_cast %293 : vector<1x1x128xf32> to vector<1x128xf32>
    %295 = vector.broadcast %294 : vector<1x128xf32> to vector<5x128xf32>
    %296 = arith.addf %292, %295 : vector<5x128xf32>
    %c1_151 = arith.constant 1 : index
    %c0_152 = arith.constant 0 : index
    %c0_153 = arith.constant 0 : index
    %297 = vector.load %arg19[%c1_151, %c0_152, %c0_153] : memref<2x1x128xf32, #tpu.memory_space<vmem>>, vector<1x1x128xf32>
    %298 = vector.shape_cast %297 : vector<1x1x128xf32> to vector<1x128xf32>
    %299 = vector.broadcast %298 : vector<1x128xf32> to vector<5x128xf32>
    %300 = arith.mulf %296, %299 : vector<5x128xf32>
    %301 = arith.addf %246, %300 : vector<5x128xf32>
    %302 = vector.shape_cast %301 : vector<5x128xf32> to vector<1x5x128xf32>
    %303 = vector.extract_strided_slice %302 {offsets = [0, 0, 0], sizes = [1, 1, 128], strides = [1, 1, 1]} : vector<1x5x128xf32> to vector<1x1x128xf32>
    %304 = vector.shape_cast %303 : vector<1x1x128xf32> to vector<1x128xf32>
    %c0_154 = arith.constant 0 : index
    %c0_155 = arith.constant 0 : index
    %305 = vector.load %arg20[%c0_154, %c0_155] : memref<1x128xf32, #tpu.memory_space<vmem>>, vector<1x128xf32>
    %c0_156 = arith.constant 0 : index
    %c0_157 = arith.constant 0 : index
    %306 = vector.load %arg21[%c0_156, %c0_157] : memref<1x128xf32, #tpu.memory_space<vmem>>, vector<1x128xf32>
    %cst_158 = arith.constant dense<0.000000e+00> : vector<1xf32>
    %307 = vector.multi_reduction <add>, %304, %cst_158 [1] : vector<1x128xf32> to vector<1xf32>
    %308 = vector.shape_cast %307 : vector<1xf32> to vector<1x1xf32>
    %cst_159 = arith.constant 1.280000e+02 : f32
    %309 = vector.broadcast %cst_159 : f32 to vector<1x1xf32>
    %310 = arith.divf %308, %309 : vector<1x1xf32>
    %311 = vector.broadcast %310 : vector<1x1xf32> to vector<1x128xf32>
    %312 = arith.subf %304, %311 : vector<1x128xf32>
    %313 = arith.mulf %312, %312 : vector<1x128xf32>
    %cst_160 = arith.constant dense<0.000000e+00> : vector<1xf32>
    %314 = vector.multi_reduction <add>, %313, %cst_160 [1] : vector<1x128xf32> to vector<1xf32>
    %315 = vector.shape_cast %314 : vector<1xf32> to vector<1x1xf32>
    %cst_161 = arith.constant 1.280000e+02 : f32
    %316 = vector.broadcast %cst_161 : f32 to vector<1x1xf32>
    %317 = arith.divf %315, %316 : vector<1x1xf32>
    %318 = vector.broadcast %310 : vector<1x1xf32> to vector<1x128xf32>
    %319 = arith.subf %304, %318 : vector<1x128xf32>
    %cst_162 = arith.constant 9.99999997E-7 : f32
    %320 = vector.broadcast %cst_162 : f32 to vector<1x1xf32>
    %321 = arith.addf %317, %320 : vector<1x1xf32>
    %322 = math.rsqrt %321 : vector<1x1xf32>
    %323 = vector.broadcast %322 : vector<1x1xf32> to vector<1x128xf32>
    %324 = arith.mulf %319, %323 : vector<1x128xf32>
    %325 = arith.mulf %324, %305 : vector<1x128xf32>
    %326 = arith.addf %325, %306 : vector<1x128xf32>
    %327 = vector.shape_cast %326 : vector<1x128xf32> to vector<1x1x128xf32>
    %c0_163 = arith.constant 0 : index
    %c0_164 = arith.constant 0 : index
    %c0_165 = arith.constant 0 : index
    %328 = vector.load %arg26[%c0_163, %c0_164, %c0_165] : memref<1x1x128xf32, #tpu.memory_space<vmem>>, vector<1x1x128xf32>
    tpu.vector_store %arg26[%c0_163, %c0_164, %c0_165], %327 {strides = array<i32>} : memref<1x1x128xf32, #tpu.memory_space<vmem>>, vector<1x1x128xf32>,
    %329 = arith.truncf %326 : vector<1x128xf32> to vector<1x128xbf16>
    %c0_166 = arith.constant 0 : index
    %c0_167 = arith.constant 0 : index
    %330 = vector.load %arg22[%c0_166, %c0_167] : memref<128x1024xbf16, #tpu.memory_space<vmem>>, vector<128x1024xbf16>
    %cst_168 = arith.constant dense<0.000000e+00> : vector<1x1024xf32>
    %331 = tpu.matmul %329, %330, %cst_168 {dimension_numbers = #tpu.dot_dimension_numbers<[1], [0], [0], [1], [0, 0, 1, 1], [], []>} : vector<1x128xbf16>, vector<128x1024xbf16>, vector<1x1024xf32> -> vector<1x1024xf32>
    %c0_169 = arith.constant 0 : index
    %c0_170 = arith.constant 0 : index
    %332 = vector.load %arg23[%c0_169, %c0_170] : memref<1x1024xf32, #tpu.memory_space<vmem>>, vector<1x1024xf32>
    %333 = arith.addf %331, %332 : vector<1x1024xf32>
    %cst_171 = arith.constant 0.000000e+00 : f32
    %334 = vector.broadcast %cst_171 : f32 to vector<1x1024xf32>
    %335 = arith.maximumf %333, %334 : vector<1x1024xf32>
    %336 = arith.truncf %335 : vector<1x1024xf32> to vector<1x1024xbf16>
    %c0_172 = arith.constant 0 : index
    %c0_173 = arith.constant 0 : index
    %337 = vector.load %arg24[%c0_172, %c0_173] : memref<1024x128xbf16, #tpu.memory_space<vmem>>, vector<1024x128xbf16>
    %cst_174 = arith.constant dense<0.000000e+00> : vector<1x128xf32>
    %338 = tpu.matmul %336, %337, %cst_174 {dimension_numbers = #tpu.dot_dimension_numbers<[1], [0], [0], [1], [0, 0, 1, 1], [], []>} : vector<1x1024xbf16>, vector<1024x128xbf16>, vector<1x128xf32> -> vector<1x128xf32>
    %c0_175 = arith.constant 0 : index
    %c0_176 = arith.constant 0 : index
    %339 = vector.load %arg25[%c0_175, %c0_176] : memref<1x128xf32, #tpu.memory_space<vmem>>, vector<1x128xf32>
    %340 = arith.addf %338, %339 : vector<1x128xf32>
    %341 = vector.shape_cast %340 : vector<1x128xf32> to vector<1x1x128xf32>
    %c0_177 = arith.constant 0 : index
    %c0_178 = arith.constant 0 : index
    %c0_179 = arith.constant 0 : index
    %342 = vector.load %arg27[%c0_177, %c0_178, %c0_179] : memref<1x1x128xf32, #tpu.memory_space<vmem>>, vector<1x1x128xf32>
    tpu.vector_store %arg27[%c0_177, %c0_178, %c0_179], %341 {strides = array<i32>} : memref<1x1x128xf32, #tpu.memory_space<vmem>>, vector<1x1x128xf32>,
    return
  }
  func.func @transform_0(%arg0: i32) -> (i32, i32, i32) {
    %c0_i32 = arith.constant 0 : i32
    %c0_i32_0 = arith.constant 0 : i32
    %c0_i32_1 = arith.constant 0 : i32
    return %arg0, %c0_i32, %c0_i32_0 : i32, i32, i32
  }
  func.func @transform_1(%arg0: i32) -> (i32, i32) {
    %c0_i32 = arith.constant 0 : i32
    %c0_i32_0 = arith.constant 0 : i32
    %c0_i32_1 = arith.constant 0 : i32
    return %c0_i32, %c0_i32_0 : i32, i32
  }
  func.func @transform_2(%arg0: i32) -> (i32, i32) {
    %c0_i32 = arith.constant 0 : i32
    %c0_i32_0 = arith.constant 0 : i32
    %c0_i32_1 = arith.constant 0 : i32
    return %c0_i32, %c0_i32_0 : i32, i32
  }
  func.func @transform_3(%arg0: i32) -> (i32, i32) {
    %c0_i32 = arith.constant 0 : i32
    %c0_i32_0 = arith.constant 0 : i32
    %c0_i32_1 = arith.constant 0 : i32
    return %c0_i32, %c0_i32_0 : i32, i32
  }
  func.func @transform_4(%arg0: i32) -> (i32, i32) {
    %c0_i32 = arith.constant 0 : i32
    %c0_i32_0 = arith.constant 0 : i32
    %c0_i32_1 = arith.constant 0 : i32
    return %c0_i32, %c0_i32_0 : i32, i32
  }
  func.func @transform_5(%arg0: i32) -> (i32, i32, i32) {
    %c0_i32 = arith.constant 0 : i32
    %c0_i32_0 = arith.constant 0 : i32
    %c0_i32_1 = arith.constant 0 : i32
    %c0_i32_2 = arith.constant 0 : i32
    return %c0_i32, %c0_i32_0, %c0_i32_1 : i32, i32, i32
  }
  func.func @transform_6(%arg0: i32) -> (i32, i32, i32) {
    %c0_i32 = arith.constant 0 : i32
    %c0_i32_0 = arith.constant 0 : i32
    %c0_i32_1 = arith.constant 0 : i32
    %c0_i32_2 = arith.constant 0 : i32
    return %c0_i32, %c0_i32_0, %c0_i32_1 : i32, i32, i32
  }
  func.func @transform_7(%arg0: i32) -> (i32, i32, i32) {
    %c0_i32 = arith.constant 0 : i32
    %c0_i32_0 = arith.constant 0 : i32
    %c0_i32_1 = arith.constant 0 : i32
    %c0_i32_2 = arith.constant 0 : i32
    return %c0_i32, %c0_i32_0, %c0_i32_1 : i32, i32, i32
  }
  func.func @transform_8(%arg0: i32) -> (i32, i32, i32) {
    %c0_i32 = arith.constant 0 : i32
    %c0_i32_0 = arith.constant 0 : i32
    %c0_i32_1 = arith.constant 0 : i32
    %c0_i32_2 = arith.constant 0 : i32
    return %c0_i32, %c0_i32_0, %c0_i32_1 : i32, i32, i32
  }
  func.func @transform_9(%arg0: i32) -> (i32, i32, i32) {
    %c0_i32 = arith.constant 0 : i32
    %c0_i32_0 = arith.constant 0 : i32
    %c0_i32_1 = arith.constant 0 : i32
    %c0_i32_2 = arith.constant 0 : i32
    return %c0_i32, %c0_i32_0, %c0_i32_1 : i32, i32, i32
  }
  func.func @transform_10(%arg0: i32) -> (i32, i32, i32) {
    %c0_i32 = arith.constant 0 : i32
    %c0_i32_0 = arith.constant 0 : i32
    %c0_i32_1 = arith.constant 0 : i32
    %c0_i32_2 = arith.constant 0 : i32
    return %c0_i32, %c0_i32_0, %c0_i32_1 : i32, i32, i32
  }
  func.func @transform_11(%arg0: i32) -> (i32, i32, i32) {
    %c0_i32 = arith.constant 0 : i32
    %c0_i32_0 = arith.constant 0 : i32
    %c0_i32_1 = arith.constant 0 : i32
    %c0_i32_2 = arith.constant 0 : i32
    return %c0_i32, %c0_i32_0, %c0_i32_1 : i32, i32, i32
  }
  func.func @transform_12(%arg0: i32) -> (i32, i32, i32) {
    %c0_i32 = arith.constant 0 : i32
    %c0_i32_0 = arith.constant 0 : i32
    %c0_i32_1 = arith.constant 0 : i32
    %c0_i32_2 = arith.constant 0 : i32
    return %c0_i32, %c0_i32_0, %c0_i32_1 : i32, i32, i32
  }
  func.func @transform_13(%arg0: i32) -> (i32, i32, i32) {
    %c0_i32 = arith.constant 0 : i32
    %c0_i32_0 = arith.constant 0 : i32
    %c0_i32_1 = arith.constant 0 : i32
    %c0_i32_2 = arith.constant 0 : i32
    return %c0_i32, %c0_i32_0, %c0_i32_1 : i32, i32, i32
  }
  func.func @transform_14(%arg0: i32) -> (i32, i32, i32) {
    %c0_i32 = arith.constant 0 : i32
    %c0_i32_0 = arith.constant 0 : i32
    %c0_i32_1 = arith.constant 0 : i32
    %c0_i32_2 = arith.constant 0 : i32
    return %c0_i32, %c0_i32_0, %c0_i32_1 : i32, i32, i32
  }
  func.func @transform_15(%arg0: i32) -> (i32, i32, i32) {
    %c0_i32 = arith.constant 0 : i32
    %c0_i32_0 = arith.constant 0 : i32
    %c0_i32_1 = arith.constant 0 : i32
    %c0_i32_2 = arith.constant 0 : i32
    return %c0_i32, %c0_i32_0, %c0_i32_1 : i32, i32, i32
  }
  func.func @transform_16(%arg0: i32) -> (i32, i32, i32) {
    %c0_i32 = arith.constant 0 : i32
    %c0_i32_0 = arith.constant 0 : i32
    %c0_i32_1 = arith.constant 0 : i32
    %c0_i32_2 = arith.constant 0 : i32
    return %c0_i32, %c0_i32_0, %c0_i32_1 : i32, i32, i32
  }
  func.func @transform_17(%arg0: i32) -> (i32, i32, i32) {
    %c0_i32 = arith.constant 0 : i32
    %c0_i32_0 = arith.constant 0 : i32
    %c0_i32_1 = arith.constant 0 : i32
    %c0_i32_2 = arith.constant 0 : i32
    return %c0_i32, %c0_i32_0, %c0_i32_1 : i32, i32, i32
  }
  func.func @transform_18(%arg0: i32) -> (i32, i32, i32) {
    %c0_i32 = arith.constant 0 : i32
    %c0_i32_0 = arith.constant 0 : i32
    %c0_i32_1 = arith.constant 0 : i32
    %c0_i32_2 = arith.constant 0 : i32
    return %c0_i32, %c0_i32_0, %c0_i32_1 : i32, i32, i32
  }
  func.func @transform_19(%arg0: i32) -> (i32, i32) {
    %c0_i32 = arith.constant 0 : i32
    %c0_i32_0 = arith.constant 0 : i32
    %c0_i32_1 = arith.constant 0 : i32
    return %c0_i32, %c0_i32_0 : i32, i32
  }
  func.func @transform_20(%arg0: i32) -> (i32, i32) {
    %c0_i32 = arith.constant 0 : i32
    %c0_i32_0 = arith.constant 0 : i32
    %c0_i32_1 = arith.constant 0 : i32
    return %c0_i32, %c0_i32_0 : i32, i32
  }
  func.func @transform_21(%arg0: i32) -> (i32, i32) {
    %c0_i32 = arith.constant 0 : i32
    %c0_i32_0 = arith.constant 0 : i32
    %c0_i32_1 = arith.constant 0 : i32
    return %c0_i32, %c0_i32_0 : i32, i32
  }
  func.func @transform_22(%arg0: i32) -> (i32, i32) {
    %c0_i32 = arith.constant 0 : i32
    %c0_i32_0 = arith.constant 0 : i32
    %c0_i32_1 = arith.constant 0 : i32
    return %c0_i32, %c0_i32_0 : i32, i32
  }
  func.func @transform_23(%arg0: i32) -> (i32, i32) {
    %c0_i32 = arith.constant 0 : i32
    %c0_i32_0 = arith.constant 0 : i32
    %c0_i32_1 = arith.constant 0 : i32
    return %c0_i32, %c0_i32_0 : i32, i32
  }
  func.func @transform_24(%arg0: i32) -> (i32, i32) {
    %c0_i32 = arith.constant 0 : i32
    %c0_i32_0 = arith.constant 0 : i32
    %c0_i32_1 = arith.constant 0 : i32
    return %c0_i32, %c0_i32_0 : i32, i32
  }
  func.func @transform_25(%arg0: i32) -> (i32, i32, i32) {
    %c0_i32 = arith.constant 0 : i32
    %c0_i32_0 = arith.constant 0 : i32
    %c0_i32_1 = arith.constant 0 : i32
    return %arg0, %c0_i32, %c0_i32_0 : i32, i32, i32
  }
  func.func @transform_26(%arg0: i32) -> (i32, i32, i32) {
    %c0_i32 = arith.constant 0 : i32
    %c0_i32_0 = arith.constant 0 : i32
    %c0_i32_1 = arith.constant 0 : i32
    return %arg0, %c0_i32, %c0_i32_0 : i32, i32, i32
  }
}

</mosaic_0001>

<bundles_post_ra>
// kernel: run.1
= control target key start
LH: loop header
LB: loop body
LE: loop exit
PB: predicated region body
PF: predicated region fallthrough
CT: control target
= control target key end

     0   :  { %s8919_s0 = inlined_call_operand.vmem [shape: f32[2,4,588], index: 0, kind: input, shape index: {}]   ;;  %s8920_s1 = inlined_call_operand.hbm [shape: bf16[588,128], index: 1, kind: input, shape index: {}]   ;;  %s8921_s2 = inlined_call_operand.vmem [shape: f32[1,128], index: 2, kind: input, shape index: {}]   ;;  %s8922_s3 = inlined_call_operand.hbm [shape: f32[1,128], index: 3, kind: input, shape index: {}]   ;;  %s8923_s4 = inlined_call_operand.vmem [shape: f32[5,128], index: 4, kind: input, shape index: {}]   ;;  %s8924_s5 = inlined_call_operand.vmem [shape: f32[2,1,128], index: 5, kind: input, shape index: {}]   ;;  %s8925_s6 = inlined_call_operand.vmem [shape: f32[2,1,128], index: 6, kind: input, shape index: {}]   ;;  %s8926_s7 = inlined_call_operand.hbm [shape: bf16[2,128,384], index: 7, kind: input, shape index: {}]   ;;  %s8927_s8 = inlined_call_operand.vmem [shape: f32[2,1,384], index: 8, kind: input, shape index: {}]   ;;  %s8928_s9 = inlined_call_operand.vmem [shape: bf16[2,128,128], index: 9, kind: input, shape index: {}]   ;;  %s8929_s10 = inlined_call_operand.vmem [shape: f32[2,1,128], index: 10, kind: input, shape index: {}]   ;;  %s8930_s11 = inlined_call_operand.hbm [shape: f32[2,1,128], index: 11, kind: input, shape index: {}]   ;;  %s8931_s12 = inlined_call_operand.hbm [shape: f32[2,1,128], index: 12, kind: input, shape index: {}]   ;;  %s8932_s13 = inlined_call_operand.hbm [shape: f32[2,1,128], index: 13, kind: input, shape index: {}]   ;;  %s8933_s14 = inlined_call_operand.vmem [shape: bf16[2,128,512], index: 14, kind: input, shape index: {}]   ;;  %s8934_s15 = inlined_call_operand.hbm [shape: f32[2,1,512], index: 15, kind: input, shape index: {}]   ;;  %s8935_s16 = inlined_call_operand.vmem [shape: bf16[2,512,128], index: 16, kind: input, shape index: {}]   ;;  %s8936_s17 = inlined_call_operand.hbm [shape: f32[2,1,128], index: 17, kind: input, shape index: {}]   ;;  %s8937_s18 = inlined_call_operand.vmem [shape: f32[2,1,128], index: 18, kind: input, shape index: {}]   ;;  %s8938_s19 = inlined_call_operand.vmem [shape: f32[1,128], index: 19, kind: input, shape index: {}]   ;;  %s8939_s20 = inlined_call_operand.vmem [shape: f32[1,128], index: 20, kind: input, shape index: {}]   ;;  %s8940_s21 = inlined_call_operand.vmem [shape: bf16[128,1024], index: 21, kind: input, shape index: {}]   ;;  %s8941_s22 = inlined_call_operand.hbm [shape: f32[1,1024], index: 22, kind: input, shape index: {}]   ;;  %s8942_s23 = inlined_call_operand.hbm [shape: bf16[1024,128], index: 23, kind: input, shape index: {}]   ;;  %s8943_s24 = inlined_call_operand.hbm [shape: f32[1,128], index: 24, kind: input, shape index: {}]   ;;  %s8944_s25 = inlined_call_operand.hbm [shape: f32[2,1,128], index: 25, kind: output, shape index: {0}]   ;;  %s8945_s26 = inlined_call_operand.vmem [shape: f32[2,1,128], index: 26, kind: output, shape index: {1}]  }
   0x1   :  { %8975 = sst [smem:[#allocation36_spill]] %s8919_s0 }
   0x2   :  { %8976 = sst [smem:[#allocation37_spill]] %s8920_s1 }
   0x3   :  { %8977 = sst [smem:[#allocation38_spill]] %s8921_s2 }
   0x4   :  { %8978 = sst [smem:[#allocation39_spill]] %s8922_s3 }
   0x5   :  { %8979 = sst [smem:[#allocation40_spill]] %s8923_s4 }
   0x6   :  { %8980 = sst [smem:[#allocation41_spill]] %s8924_s5 }
   0x7   :  { %8981 = sst [smem:[#allocation42_spill]] %s8925_s6 }
   0x8   :  { %8982 = sst [smem:[#allocation43_spill]] %s8926_s7 }
   0x9   :  { %8983 = sst [smem:[#allocation44_spill]] %s8927_s8 }
   0xa   :  { %8984 = sst [smem:[#allocation45_spill]] %s8928_s9 }
   0xb   :  { %8985 = sst [smem:[#allocation46_spill]] %s8929_s10 }
   0xc   :  { %8986 = sst [smem:[#allocation47_spill]] %s8930_s11 }
   0xd   :  { %8987 = sst [smem:[#allocation48_spill]] %s8932_s13 }
   0xe   :  { %8988 = sst [smem:[#allocation49_spill]] %s8936_s17 }
   0xf   :  { %8989 = sst [smem:[#allocation50_spill]] %s8939_s20 }
  0x10   :  { %8990 = sst [smem:[#allocation51_spill]] %s8942_s23 }
  0x11   :  { %8991 = sst [smem:[#allocation52_spill]] %s8944_s25 }
  0x12   :  { %8992 = sst [smem:[#allocation53_spill]] %s8945_s26 }
  0x13   :  { %32 = vsyncpa [#allocation4], 0 }
  0x14   :  { %33 = vsyncpa [#allocation7], 0 }
  0x15   :  { %34 = vsyncpa [#allocation10], 0 }
  0x16   :  { %35 = vsyncpa [#allocation13], 0 }
  0x17   :  { %36 = vsyncpa [#allocation16], 0 }
  0x18   :  { %37 = vsyncpa [#allocation19], 0 }
  0x19   :  { %38 = vsyncpa [#allocation5], 0 }
  0x1a   :  { %40 = vsyncpa [#allocation5 + $0x1], 0  ;;  %s7651_s27 = smov 0   ;;  %s7653_s3 = smov 0  }
  0x1b   :  { %s7655_s7 = smov 0   ;;  %s7657_s28 = smov 0  }
  0x1c LB: > { %8993 = sst [smem:[#allocation29_spill]] %s7479_s27  ;;  %s7672_s8 = sadd.s32 4294967295, %s7491_s28   ;;  %s7491_s28 = sphi %s7657_s28, %s9050_s28   ;;  %s7487_s7 = sphi %s7655_s7, %s9052_s7   ;;  %s7483_s3 = sphi %s7653_s3, %s9054_s3   ;;  %s7479_s27 = sphi %s7651_s27, %s9053_s27  }
  0x1d   : > { %8994 = sst [smem:[#allocation30_spill]] %s7487_s7  ;;  %s5600_s4 = sadd.s32 4294967294, %s7491_s28  }
  0x1e   : > { %8995 = sst [smem:[#allocation31_spill]] %s7491_s28  ;;  %s7676_s29 = sadd.s32 1, %s7491_s28  }
  0x1f   : > { %8996 = sst [smem:[#allocation32_spill]] %s7676_s29  ;;  %s583_s0 = sadd.s32 1, %s7487_s7 }
  0x20   : > { %s580_s9 = ssub.s32 %s7491_s28, %s7676_s29  ;;  %p593_p0 = scmp.ne.s32.totalorder %s7487_s7, %s7483_s3 }
  0x21   : > { %p581_p1 = scmp.eq.s32.totalorder %s580_s9, 0  ;;  %p594_p2 = scmp.eq.s32.totalorder %s7672_s8, 1 }
  0x22   : > { %p599_p3 = scmp.ne.s32.totalorder %s7483_s3, %s7479_s27  ;;  %p600_p4 = scmp.eq.s32.totalorder %s5600_s4, 1 }
  0x23   : > { %s7687_s30 = scalar_select %p581_p1, %s7487_s7, %s583_s0  }
  0x24   : > { %p7689_p5 = por %p594_p2, %p593_p0  ;;  %p7693_p6 = por %p600_p4, %p599_p3 }
  0x25   : > { %8997 = sst [smem:[#allocation33_spill]] %s7687_s30  ;;  %p5601_p7 = scmp.ge.s32.totalorder %s7491_s28, 1 }
  0x26   : > { %s8998_s2 = scalar_select %p7689_p5, 1, 0 }
  0x27   : > { %s9000_s5 = scalar_select %p7693_p6, 1, 0 }
  0x28   : > { %8999 = sst [smem:[#allocation34_spill]] %s8998_s2  ;;  %p633_p8 = scmp.lt.s32.totalorder %s7491_s28, 3 }
  0x29   : > { %9001 = sst [smem:[#allocation35_spill]] %s9000_s5  ;;  %p8964_p9 = scmp.eq.s32.totalorder %s7672_s8, 0 }
  0x2a   : > { %p7700_p10 = pnand %p5601_p7, %p633_p8  ;;  %s7493_s6 = smov [#allocation6]  }
  0x2b   : > { %s662_s1 = sshll.u32 %s7493_s6, 4  ;;  %s7494_s4 = smov [#allocation9]   ;;  %s663_s1 = int_to_ptr.vmem [resolvable:$true] %s662_s1 }
  0x2c   : > { %s9002_s10 = scalar_select %p7700_p10, 1, 0 }
  0x2d   : > { %p6597_p11 = pneg %p7700_p10  ;;  %s703_s0 = sshll.u32 %s7494_s4, 4  ;;  %s7712_s0 = int_to_ptr.vmem [resolvable:$true] %s703_s0 }
  0x2e   : > { %s7495_s30 = smov [#allocation12]   ;;  %s9004_s27 = sld [smem:[#allocation39_spill]] }
  0x2f   : > { %p7708_p12 = pnand %p8964_p9, %p6597_p11  ;;  %s7714_s7 = sshll.u32 %s7495_s30, 4  ;;  %s730_s7 = int_to_ptr.vmem [resolvable:$true] %s7714_s7 }
  0x31   : > { %p7724_p0 = pneg %p7708_p12 }
  0x34   : > { %s9005_s26 = smov %s9004_s27  ;;  %s7097_s6 = scalar_lea.hbm %s9004_s27, 16 }
  0x35   : > { %p7098_p13 = scmp.ne.s32.totalorder %s9005_s26, %s7097_s6  ;;  %p7104_p3 = scmp.lt.u32.totalorder %s7097_s6, %s9005_s26 }
  0x37   : > { %p7100_p1 = pnand %p7724_p0, %p7098_p13 }
  0x39   : > { %p7101_p2 = pneg %p7100_p1 }
  0x3b   : > { %p7106_p4 = pnand %p7104_p3, %p7101_p2 }
  0x3d   : > { %7109 = shalt.err (!%p7106_p4)
}
  0x3e   : > { %s7110_s27 = scalar_lea.vmem %s663_s1, 16  ;;  %s7117_s25 = scalar_lea.vmem %s663_s1, 32 }
  0x3f   : > { %p7111_p7 = scmp.ne.s32.totalorder %s663_s1, %s7110_s27  ;;  %p7118_p9 = scmp.lt.s32.totalorder %s663_s1, %s663_s1 }
  0x40   : > { %p7119_p6 = scmp.lt.s32.totalorder %s7117_s25, %s7110_s27 }
  0x41   : > { %p7113_p8 = pnand %p7111_p7, %p7724_p0 }
  0x42   : > { %p7120_p5 = por %p7119_p6, %p7118_p9 }
  0x43   : > { %p7114_p11 = pneg %p7113_p8 }
  0x45   : > { %p7121_p10 = pnand %p7120_p5, %p7114_p11 }
  0x47   : > { %7124 = shalt.err (!%p7121_p10)
}
  0x48   : > { %6603 = dma.hbm_to_vmem [thread:$0]  (!%p7708_p12), %s9005_s26, 16, %s663_s1, [#allocation7]  }
  0x49   : > { %s9007_s11 = sld [smem:[#allocation47_spill]] }
  0x4f   : > { %s7125_s6 = scalar_lea.hbm %s9007_s11, 32 }
  0x50   : > { %p7126_p13 = scmp.ne.s32.totalorder %s9007_s11, %s7125_s6  ;;  %p7132_p5 = scmp.lt.u32.totalorder %s7125_s6, %s9007_s11 }
  0x52   : > { %p7128_p1 = pnand %p7126_p13, %p7724_p0 }
  0x54   : > { %p7129_p6 = pneg %p7128_p1 }
  0x56   : > { %p7134_p9 = pnand %p7132_p5, %p7129_p6 }
  0x58   : > { %7137 = shalt.err (!%p7134_p9)
}
  0x59   : > { %s7138_s1 = scalar_lea.vmem %s7712_s0, 32  ;;  %p7146_p4 = scmp.lt.s32.totalorder %s7712_s0, %s7712_s0 }
  0x5a   : > { %p7139_p10 = scmp.ne.s32.totalorder %s7712_s0, %s7138_s1  ;;  %p7147_p7 = scmp.lt.s32.totalorder %s7138_s1, %s7138_s1 }
  0x5c   : > { %p7141_p2 = pnand %p7139_p10, %p7724_p0  ;;  %p7148_p8 = por %p7147_p7, %p7146_p4 }
  0x5e   : > { %p7142_p3 = pneg %p7141_p2 }
  0x60   : > { %p7149_p11 = pnand %p7148_p8, %p7142_p3 }
  0x62   : > { %7152 = shalt.err (!%p7149_p11)
}
  0x63   : > { %s8968_s20 = smov 16   ;;  %s8969_s28 = smov 1  }
  0x64   : > { %6609 = dma.hbm_to_vmem [thread:$0]  (!%p7708_p12), %s9007_s11, 32, %s7712_s0, [#allocation10], %s8968_s20, %s8968_s20, %s8969_s28  }
  0x65   : > { %s9008_s13 = sld [smem:[#allocation48_spill]] }
  0x6b   : > { %s7153_s30 = scalar_lea.hbm %s9008_s13, 32 }
  0x6c   : > { %p7154_p13 = scmp.ne.s32.totalorder %s9008_s13, %s7153_s30  ;;  %p7160_p5 = scmp.lt.u32.totalorder %s7153_s30, %s9008_s13 }
  0x6e   : > { %p7156_p1 = pnand %p7154_p13, %p7724_p0 }
  0x70   : > { %p7157_p6 = pneg %p7156_p1 }
  0x72   : > { %p7162_p9 = pnand %p7160_p5, %p7157_p6 }
  0x74   : > { %7165 = shalt.err (!%p7162_p9)
}
  0x75   : > { %s7166_s29 = scalar_lea.vmem %s730_s7, 32  ;;  %p7174_p4 = scmp.lt.s32.totalorder %s730_s7, %s730_s7 }
  0x76   : > { %p7167_p10 = scmp.ne.s32.totalorder %s730_s7, %s7166_s29  ;;  %p7175_p7 = scmp.lt.s32.totalorder %s7166_s29, %s7166_s29 }
  0x78   : > { %p7169_p2 = pnand %p7167_p10, %p7724_p0  ;;  %p7176_p8 = por %p7175_p7, %p7174_p4 }
  0x7a   : > { %p7170_p3 = pneg %p7169_p2 }
  0x7c   : > { %p7177_p11 = pnand %p7176_p8, %p7170_p3 }
  0x7e   : > { %7180 = shalt.err (!%p7177_p11)
}
  0x7f   : > { %6615 = dma.hbm_to_vmem [thread:$0]  (!%p7708_p12), %s9008_s13, 32, %s730_s7, [#allocation13], %s8968_s20, %s8968_s20, %s8969_s28  }
  0x80   : > { %s7498_s2 = smov [#allocation15]   ;;  %s9009_s17 = sld [smem:[#allocation49_spill]] }
  0x81   : > { %s761_s5 = sshll.u32 %s7498_s2, 4  ;;  %s762_s5 = int_to_ptr.vmem [resolvable:$true] %s761_s5 }
  0x86   : > { %s7181_s27 = scalar_lea.hbm %s9009_s17, 32 }
  0x87   : > { %p7182_p13 = scmp.ne.s32.totalorder %s9009_s17, %s7181_s27  ;;  %p7188_p5 = scmp.lt.u32.totalorder %s7181_s27, %s9009_s17 }
  0x89   : > { %p7184_p1 = pnand %p7182_p13, %p7724_p0 }
  0x8b   : > { %p7185_p6 = pneg %p7184_p1 }
  0x8d   : > { %p7190_p9 = pnand %p7188_p5, %p7185_p6 }
  0x8f   : > { %7193 = shalt.err (!%p7190_p9)
}
  0x90   : > { %s7194_s7 = scalar_lea.vmem %s762_s5, 32  ;;  %p7202_p4 = scmp.lt.s32.totalorder %s762_s5, %s762_s5 }
  0x91   : > { %p7195_p10 = scmp.ne.s32.totalorder %s762_s5, %s7194_s7  ;;  %p7203_p7 = scmp.lt.s32.totalorder %s7194_s7, %s7194_s7 }
  0x93   : > { %p7197_p2 = pnand %p7195_p10, %p7724_p0  ;;  %p7204_p8 = por %p7203_p7, %p7202_p4 }
  0x95   : > { %p7198_p3 = pneg %p7197_p2 }
  0x97   : > { %p7205_p11 = pnand %p7204_p8, %p7198_p3 }
  0x99   : > { %7208 = shalt.err (!%p7205_p11)
}
  0x9a   : > { %6621 = dma.hbm_to_vmem [thread:$0]  (!%p7708_p12), %s9009_s17, 32, %s762_s5, [#allocation16], %s8968_s20, %s8968_s20, %s8969_s28  }
  0x9b   : > { %s7499_s0 = smov [#allocation18]   ;;  %s7500_s6 = smov [#allocation3]  }
  0x9c   : > { %s797_s2 = sshll.u32 %s7499_s0, 4  ;;  %s645_s30 = sshll.u32 %s7500_s6, 4  ;;  %s798_s2 = int_to_ptr.vmem [resolvable:$true] %s797_s2  ;;  %s7809_s30 = int_to_ptr.vmem [resolvable:$true] %s645_s30 }
  0x9d   : > { %s9010_s23 = sld [smem:[#allocation51_spill]] }
  0xa3   : > { %s7209_s1 = scalar_lea.hbm %s9010_s23, 8192 }
  0xa4   : > { %p7210_p13 = scmp.ne.s32.totalorder %s9010_s23, %s7209_s1  ;;  %p7216_p5 = scmp.lt.u32.totalorder %s7209_s1, %s9010_s23 }
  0xa6   : > { %p7212_p1 = pnand %p7210_p13, %p7724_p0 }
  0xa8   : > { %p7213_p6 = pneg %p7212_p1 }
  0xaa   : > { %p7218_p9 = pnand %p7216_p5, %p7213_p6 }
  0xac   : > { %7221 = shalt.err (!%p7218_p9)
}
  0xad   : > { %s7222_s26 = scalar_lea.vmem %s798_s2, 8192  ;;  %p7230_p4 = scmp.lt.s32.totalorder %s798_s2, %s798_s2 }
  0xae   : > { %p7223_p10 = scmp.ne.s32.totalorder %s798_s2, %s7222_s26  ;;  %p7231_p7 = scmp.lt.s32.totalorder %s7222_s26, %s7222_s26 }
  0xb0   : > { %p7225_p2 = pnand %p7223_p10, %p7724_p0  ;;  %p7232_p8 = por %p7231_p7, %p7230_p4 }
  0xb2   : > { %p7226_p3 = pneg %p7225_p2 }
  0xb4   : > { %p7233_p11 = pnand %p7232_p8, %p7226_p3 }
  0xb6   : > { %7236 = shalt.err (!%p7233_p11)
}
  0xb7   : > { %s8970_s0 = smov 64   ;;  %s8971_s6 = smov 4  }
  0xb8   : > { %6627 = dma.hbm_to_vmem [thread:$0]  (!%p7708_p12), %s9010_s23, 8192, %s798_s2, [#allocation19], %s8970_s0, %s8970_s0, %s8971_s6  }
  0xb9   : > { %s9011_s7 = sld [smem:[#allocation37_spill]] }
  0xbf   : > { %s9012_s11 = smov %s9011_s7  ;;  %s7237_s5 = scalar_lea.hbm %s9011_s7, 4736 }
  0xc0   : > { %p7238_p13 = scmp.ne.s32.totalorder %s9012_s11, %s7237_s5  ;;  %p7244_p5 = scmp.lt.u32.totalorder %s7237_s5, %s9012_s11 }
  0xc2   : > { %p7240_p1 = pnand %p7238_p13, %p7724_p0 }
  0xc4   : > { %p7241_p6 = pneg %p7240_p1 }
  0xc6   : > { %p7246_p9 = pnand %p7244_p5, %p7241_p6 }
  0xc8   : > { %7249 = shalt.err (!%p7246_p9)
}
  0xc9   : > { %s7250_s2 = scalar_lea.vmem %s7809_s30, 4736  ;;  %p7258_p4 = scmp.lt.s32.totalorder %s7809_s30, %s7809_s30 }
  0xca   : > { %p7251_p10 = scmp.ne.s32.totalorder %s7809_s30, %s7250_s2  ;;  %p7259_p7 = scmp.lt.s32.totalorder %s7250_s2, %s7250_s2 }
  0xcc   : > { %p7253_p2 = pnand %p7251_p10, %p7724_p0  ;;  %p7260_p8 = por %p7259_p7, %p7258_p4 }
  0xce   : > { %p7254_p3 = pneg %p7253_p2 }
  0xd0   : > { %p7261_p11 = pnand %p7260_p8, %p7254_p3 }
  0xd2   : > { %7264 = shalt.err (!%p7261_p11)
}
  0xd3   : > { %6600 = dma.hbm_to_vmem [thread:$0]  (!%p7708_p12), %s9012_s11, 4736, %s7809_s30, [#allocation4], %s8970_s0, %s8970_s0, %s8971_s6  }
  0xd4   : > { %s7503_s28 = smov [#allocation8]   ;;  %s9013_s29 = sld [smem:[#allocation43_spill]] }
  0xd5   : > { %s681_s27 = sshll.u32 %s7503_s28, 4  ;;  %s682_s27 = int_to_ptr.vmem [resolvable:$true] %s681_s27 }
  0xda   : > { %s7265_s7 = scalar_lea.hbm %s9013_s29, 6144 }
  0xdb   : > { %p7266_p13 = scmp.ne.s32.totalorder %s9013_s29, %s7265_s7  ;;  %p7272_p5 = scmp.lt.u32.totalorder %s7265_s7, %s9013_s29 }
  0xdd   : > { %p7268_p1 = pnand %p7266_p13, %p7724_p0 }
  0xdf   : > { %p7269_p6 = pneg %p7268_p1 }
  0xe1   : > { %p7274_p9 = pnand %p7272_p5, %p7269_p6 }
  0xe3   : > { %7277 = shalt.err (!%p7274_p9)
}
  0xe4   : > { %s7278_s30 = scalar_lea.vmem %s682_s27, 6144  ;;  %p7286_p4 = scmp.lt.s32.totalorder %s682_s27, %s682_s27 }
  0xe5   : > { %p7279_p10 = scmp.ne.s32.totalorder %s682_s27, %s7278_s30  ;;  %p7287_p7 = scmp.lt.s32.totalorder %s7278_s30, %s7278_s30 }
  0xe7   : > { %p7281_p2 = pnand %p7279_p10, %p7724_p0  ;;  %p7288_p8 = por %p7287_p7, %p7286_p4 }
  0xe9   : > { %p7282_p3 = pneg %p7281_p2 }
  0xeb   : > { %p7289_p11 = pnand %p7288_p8, %p7282_p3 }
  0xed   : > { %7292 = shalt.err (!%p7289_p11)
}
  0xee   : > { %s7504_s13 = smov 192   ;;  %s7505_s20 = smov 12  }
  0xef   : > { %6606 = dma.hbm_to_vmem [thread:$0]  (!%p7708_p12), %s9013_s29, 6144, %s682_s27, [#allocation7], %s7504_s13, %s7504_s13, %s7505_s20  }
  0xf0   : > { %s7506_s25 = smov [#allocation11]   ;;  %s7507_s7 = smov [#allocation14]  }
  0xf1   : > { %s716_s1 = sshll.u32 %s7506_s25, 4  ;;  %s745_s5 = sshll.u32 %s7507_s7, 4  ;;  %s717_s1 = int_to_ptr.vmem [resolvable:$true] %s716_s1  ;;  %s746_s5 = int_to_ptr.vmem [resolvable:$true] %s745_s5 }
  0xf2   : > { %s7293_s30 = scalar_lea.hbm %s8931_s12, 32 }
  0xf3   : > { %p7294_p13 = scmp.ne.s32.totalorder %s8931_s12, %s7293_s30  ;;  %p7300_p5 = scmp.lt.u32.totalorder %s7293_s30, %s8931_s12 }
  0xf5   : > { %p7296_p1 = pnand %p7294_p13, %p7724_p0 }
  0xf7   : > { %p7297_p6 = pneg %p7296_p1 }
  0xf9   : > { %p7302_p9 = pnand %p7300_p5, %p7297_p6 }
  0xfb   : > { %7305 = shalt.err (!%p7302_p9)
}
  0xfc   : > { %s7306_s27 = scalar_lea.vmem %s717_s1, 32  ;;  %p7314_p4 = scmp.lt.s32.totalorder %s717_s1, %s717_s1 }
  0xfd   : > { %p7307_p10 = scmp.ne.s32.totalorder %s717_s1, %s7306_s27  ;;  %p7315_p7 = scmp.lt.s32.totalorder %s7306_s27, %s7306_s27 }
  0xff   : > { %p7309_p2 = pnand %p7307_p10, %p7724_p0  ;;  %p7316_p8 = por %p7315_p7, %p7314_p4 }
 0x101   : > { %p7310_p3 = pneg %p7309_p2 }
 0x103   : > { %p7317_p11 = pnand %p7316_p8, %p7310_p3 }
 0x105   : > { %7320 = shalt.err (!%p7317_p11)
}
 0x106   : > { %s9014_s0 = smov 1   ;;  %s9015_s6 = smov 16  }
 0x107   : > { %6612 = dma.hbm_to_vmem [thread:$0]  (!%p7708_p12), %s8931_s12, 32, %s717_s1, [#allocation10], %s9015_s6, %s9015_s6, %s9014_s0  }
 0x108   : > { %s7321_s17 = scalar_lea.hbm %s8934_s15, 128 }
 0x109   : > { %p7322_p13 = scmp.ne.s32.totalorder %s8934_s15, %s7321_s17  ;;  %p7328_p5 = scmp.lt.u32.totalorder %s7321_s17, %s8934_s15 }
 0x10b   : > { %p7324_p1 = pnand %p7322_p13, %p7724_p0 }
 0x10d   : > { %p7325_p6 = pneg %p7324_p1 }
 0x10f   : > { %p7330_p9 = pnand %p7328_p5, %p7325_p6 }
 0x111   : > { %7333 = shalt.err (!%p7330_p9)
}
 0x112   : > { %s7334_s2 = scalar_lea.vmem %s746_s5, 128  ;;  %p7342_p4 = scmp.lt.s32.totalorder %s746_s5, %s746_s5 }
 0x113   : > { %p7335_p10 = scmp.ne.s32.totalorder %s746_s5, %s7334_s2  ;;  %p7343_p7 = scmp.lt.s32.totalorder %s7334_s2, %s7334_s2 }
 0x115   : > { %p7337_p2 = pnand %p7335_p10, %p7724_p0  ;;  %p7344_p8 = por %p7343_p7, %p7342_p4 }
 0x117   : > { %p7338_p3 = pneg %p7337_p2 }
 0x119   : > { %p7345_p11 = pnand %p7344_p8, %p7338_p3 }
 0x11b   : > { %7348 = shalt.err (!%p7345_p11)
}
 0x11c   : > { %s9016_s1 = smov 4   ;;  %s9017_s30 = smov 64  }
 0x11d   : > { %6618 = dma.hbm_to_vmem [thread:$0]  (!%p7708_p12), %s8934_s15, 128, %s746_s5, [#allocation13], %s9017_s30, %s9017_s30, %s9016_s1  }
 0x11e   : > { %s7508_s6 = smov [#allocation17]   ;;  %s7509_s11 = smov [#allocation20]  }
 0x11f   : > { %s787_s23 = sshll.u32 %s7508_s6, 4  ;;  %s811_s13 = sshll.u32 %s7509_s11, 4  ;;  %s788_s23 = int_to_ptr.vmem [resolvable:$true] %s787_s23  ;;  %s812_s13 = int_to_ptr.vmem [resolvable:$true] %s811_s13 }
 0x120   : > { %s7349_s28 = scalar_lea.hbm %s8941_s22, 128 }
 0x121   : > { %p7350_p13 = scmp.ne.s32.totalorder %s8941_s22, %s7349_s28  ;;  %p7356_p5 = scmp.lt.u32.totalorder %s7349_s28, %s8941_s22 }
 0x123   : > { %p7352_p1 = pnand %p7350_p13, %p7724_p0 }
 0x125   : > { %p7353_p6 = pneg %p7352_p1 }
 0x127   : > { %p7358_p9 = pnand %p7356_p5, %p7353_p6 }
 0x129   : > { %7361 = shalt.err (!%p7358_p9)
}
 0x12a   : > { %s7362_s5 = scalar_lea.vmem %s788_s23, 128  ;;  %p7370_p4 = scmp.lt.s32.totalorder %s788_s23, %s788_s23 }
 0x12b   : > { %p7363_p10 = scmp.ne.s32.totalorder %s788_s23, %s7362_s5  ;;  %p7371_p7 = scmp.lt.s32.totalorder %s7362_s5, %s7362_s5 }
 0x12d   : > { %p7365_p2 = pnand %p7363_p10, %p7724_p0  ;;  %p7372_p8 = por %p7371_p7, %p7370_p4 }
 0x12f   : > { %p7366_p3 = pneg %p7365_p2 }
 0x131   : > { %p7373_p11 = pnand %p7372_p8, %p7366_p3 }
 0x133   : > { %7376 = shalt.err (!%p7373_p11)
}
 0x134   : > { %6624 = dma.hbm_to_vmem [thread:$0]  (!%p7708_p12), %s8941_s22, 128, %s788_s23, [#allocation16]  }
 0x135   : > { %s7377_s6 = scalar_lea.hbm %s8943_s24, 16 }
 0x136   : > { %p7378_p13 = scmp.ne.s32.totalorder %s8943_s24, %s7377_s6  ;;  %p7384_p5 = scmp.lt.u32.totalorder %s7377_s6, %s8943_s24 }
 0x138   : > { %p7380_p1 = pnand %p7378_p13, %p7724_p0 }
 0x13a   : > { %p7381_p6 = pneg %p7380_p1 }
 0x13c   : > { %p7386_p9 = pnand %p7384_p5, %p7381_p6 }
 0x13e   : > { %7389 = shalt.err (!%p7386_p9)
}
 0x13f   : > { %s7390_s25 = scalar_lea.vmem %s812_s13, 16  ;;  %s7397_s23 = scalar_lea.vmem %s812_s13, 32 }
 0x140   : > { %p7391_p10 = scmp.ne.s32.totalorder %s812_s13, %s7390_s25  ;;  %p7398_p4 = scmp.lt.s32.totalorder %s812_s13, %s812_s13 }
 0x141   : > { %p7399_p7 = scmp.lt.s32.totalorder %s7397_s23, %s7390_s25 }
 0x142   : > { %p7393_p2 = pnand %p7391_p10, %p7724_p0 }
 0x143   : > { %p7400_p8 = por %p7399_p7, %p7398_p4 }
 0x144   : > { %p7394_p3 = pneg %p7393_p2 }
 0x146   : > { %p7401_p11 = pnand %p7400_p8, %p7394_p3 }
 0x148   : > { %7404 = shalt.err (!%p7401_p11)
}
 0x149   : > { %6630 = dma.hbm_to_vmem [thread:$0]  (!%p7708_p12), %s8943_s24, 16, %s812_s13, [#allocation19]  }
 0x14a   : > { %p9018_p13 = scmp.ne.s32.totalorder %s9002_s10, 0 }
 0x14b   : > { %p9019_p1 = scmp.eq.s32.totalorder (!%p9018_p13), %s7672_s8, 0 }
 0x14c   : > { %832 = sbr.rel (%p9018_p13) target bundleno = 6851 (0x1ac3), region = 120 }
 0x153   : > { %7450 = dma.done.wait (%p9019_p1), [#allocation4], 4736   ;;  %p9020_p0 = pmov %p9019_p1 }
 0x155   : > { %7452 = vsyncadd (%p9020_p0), [#allocation4], 4294962560  ;;  %p9021_p6 = pmov %p9020_p0 }
 0x156   : > { %p9022_p5 = pmov %p9020_p0 }
 0x157   : > { %7454 = dma.done.wait (%p9021_p6), [#allocation7], 6160  }
 0x158   : > { %7456 = vsyncadd (%p9022_p5), [#allocation7], 4294961136  ;;  %p9023_p9 = pmov %p9020_p0 }
 0x159   : > { %p9024_p12 = pmov %p9020_p0 }
 0x15a   : > { %7458 = dma.done.wait (%p9023_p9), [#allocation10], 64  }
 0x15b   : > { %7460 = vsyncadd (%p9024_p12), [#allocation10], 4294967232  ;;  %p9025_p10 = pmov %p9020_p0 }
 0x15c   : > { %p9026_p2 = pmov %p9020_p0 }
 0x15d   : > { %7462 = dma.done.wait (%p9025_p10), [#allocation13], 160  }
 0x15e   : > { %7464 = vsyncadd (%p9026_p2), [#allocation13], 4294967136  ;;  %p9027_p3 = pmov %p9020_p0 }
 0x15f   : > { %p9028_p4 = pmov %p9020_p0 }
 0x160   : > { %7466 = dma.done.wait (%p9027_p3), [#allocation16], 160  }
 0x161   : > { %7468 = vsyncadd (%p9028_p4), [#allocation16], 4294967136  ;;  %p9029_p7 = pmov %p9020_p0 }
 0x162   : > { %p9030_p8 = pmov %p9020_p0 }
 0x163   : > { %7470 = dma.done.wait (%p9029_p7), [#allocation19], 8208  }
 0x164   : > { %7472 = vsyncadd (%p9030_p8), [#allocation19], 4294959088  ;;  %v6712_v0 = vld [vmem:[#allocation3 + $0x40] sm:$0xff]   ;;  %v6716_v4 = vld [vmem:[#allocation3 + $0x48] sm:$0xff]   ;;  %p944_p11 = scmp.lt.s32.totalorder %s7672_s8, 1  ;;  %s9031_s2 = sld [smem:[#allocation36_spill]] }
 0x165   : > { %v6713_v1 = vld [vmem:[#allocation3] sm:$0xff]   ;;  %6130 = vmatprep.subr.bf16.mxu0 %v6712_v0  ;;  %v6717_v5 = vld [vmem:[#allocation3 + $0x8] sm:$0xff]   ;;  %v6720_v8 = vld [vmem:[#allocation3 + $0x50] sm:$0xff]   ;;  %v7510_v34 = vmov 0.0   ;;  %vm7511_vm0 = vmmov 0   ;;  %vm1273_vm1 = vcmask 1045504  }
 0x166   : > { %v6714_v2 = vld [vmem:[#allocation3 + $0xc0] sm:$0xff]   ;;  %6131 = vmatpush3.bf16.msra.mxu0 %v6713_v1  ;;  %v6718_v6 = vld [vmem:[#allocation3 + $0xc8] sm:$0xff]   ;;  %v6721_v9 = vld [vmem:[#allocation3 + $0x10] sm:$0xff]   ;;  %s7982_s10 = scalar_select %p944_p11, %s7672_s8, 1  ;;  %vm1269_vm2 = vcmask 621568   ;;  %vm1407_vm3 = vcmask 1044480  }
 0x167   : > { %v6715_v3 = vld [vmem:[#allocation3 + $0x80] sm:$0xff]   ;;  %6152 = vmatprep.subr.bf16.mxu1 %v6714_v2  ;;  %6132 = vmatprep.subr.bf16.mxu0 %v6716_v4  ;;  %v6719_v7 = vld [vmem:[#allocation3 + $0x88] sm:$0xff]   ;;  %v6722_v10 = vld [vmem:[#allocation3 + $0xd0] sm:$0xff]   ;;  %s9032_s27 = sld [smem:[#allocation40_spill]]  ;;  %s9034_s20 = sld [smem:[#allocation38_spill]]  ;;  %vm1697_vm4 = vcmask 523264  }
 0x168   : > { %6153 = vmatpush3.bf16.msra.mxu1 %v6715_v3  ;;  %v6723_v11 = vld [vmem:[#allocation3 + $0x90] sm:$0xff]   ;;  %v6724_v12 = vld [vmem:[#allocation3 + $0x58] sm:$0xff]   ;;  %v6728_v16 = vld [vmem:[#allocation3 + $0x60] sm:$0xff]   ;;  %s6550_s9 = smul.u32 20, %s7982_s10  ;;  %s9035_s7 = sld [smem:[#allocation41_spill]]  ;;  %vm1762_vm5 = vcmask 1041408  }
 0x169   : > { %6154 = vmatprep.subr.bf16.mxu1 %v6718_v6  ;;  %v6725_v13 = vld [vmem:[#allocation3 + $0x18] sm:$0xff]   ;;  %v6729_v17 = vld [vmem:[#allocation3 + $0x20] sm:$0xff]   ;;  %v6732_v20 = vld [vmem:[#allocation3 + $0x68] sm:$0xff]   ;;  %s9037_s13 = sld [smem:[#allocation42_spill]]  ;;  %s9038_s1 = sld [smem:[#allocation44_spill]]  ;;  %vm1763_vm6 = vcmask 1042432  }
 0x16a   : > { %6133 = vmatpush3.bf16.msra.mxu0 %v6717_v5  ;;  %v6726_v14 = vld [vmem:[#allocation3 + $0xd8] sm:$0xff]   ;;  %v6730_v18 = vld [vmem:[#allocation3 + $0xe0] sm:$0xff]   ;;  %v6733_v21 = vld [vmem:[#allocation3 + $0x28] sm:$0xff]   ;;  %s7988_s5 = scalar_lea.vmem %s9031_s2, %s6550_s9  ;;  %s7513_s30 = smov 64   ;;  %vm1744_vm7 = vcmask 36864   ;;  %vm1758_vm8 = vcmask 39936  }
 0x16b   : > { %6134 = vmatprep.subr.bf16.mxu0 %v6720_v8  ;;  %v6727_v15 = vld [vmem:[#allocation3 + $0x98] sm:$0xff]   ;;  %v6731_v19 = vld [vmem:[#allocation3 + $0xa0] sm:$0xff]   ;;  %v6734_v22 = vld [vmem:[#allocation3 + $0xe8] sm:$0xff]   ;;  %s9039_s11 = sld [smem:[#allocation45_spill]]  ;;  %s9040_s23 = sld [smem:[#allocation46_spill]]  ;;  %vm4102_vm9 = vcmask 1040384  }
 0x16c   : > { %6155 = vmatpush3.bf16.msra.mxu1 %v6719_v7  ;;  %v6735_v23 = vld [vmem:[#allocation3 + $0xa8] sm:$0xff]   ;;  %v6736_v24 = vld [vmem:[#allocation3 + $0x70] sm:$0xff]   ;;  %v6740_v28 = vld [vmem:[#allocation3 + $0x78] sm:$0xff]   ;;  %s9041_s4 = sld [smem:[#allocation50_spill]]  ;;  %s9042_s28 = sld [smem:[#allocation34_spill]] }
 0x16d   : > { %6156 = vmatprep.subr.bf16.mxu1 %v6722_v10  ;;  %v6737_v25 = vld [vmem:[#allocation3 + $0x30] sm:$0xff]   ;;  %v6741_v29 = vld [vmem:[#allocation3 + $0x38] sm:$0xff]   ;;  %v953_v31 = vld [vmem:[%s7988_s5] sm:$0xff]  ;;  %s9033_s0 = smov %s9032_s27  ;;  %s6127_s25 = sshll.u32 %s7672_s8, 4 }
 0x16e   : > { %6135 = vmatpush3.bf16.msra.mxu0 %v6721_v9  ;;  %v6738_v26 = vld [vmem:[#allocation3 + $0xf0] sm:$0xff]   ;;  %v6742_v30 = vld [vmem:[#allocation3 + $0xf8] sm:$0xff]   ;;  %v958_v32 = vcombine.high %v953_v31, %v953_v31  ;;  %v962_v36 = vpack.c.bf16 %v953_v31, %v953_v31  ;;  %v6746_v40 = vld [vmem:[#allocation3 + $0x100] sm:$0xff]   ;;  %s9036_s26 = smov %s9035_s7  ;;  %s7515_s17 = smov [#allocation21]  }
 0x16f   : > { %6136 = vmatprep.subr.bf16.mxu0 %v6724_v12  ;;  %v6739_v27 = vld [vmem:[#allocation3 + $0xb0] sm:$0xff]   ;;  %v6744_v33 = vld [vmem:[#allocation3 + $0xb8] sm:$0xff]   ;;  %v6747_v42 = vld [vmem:[#allocation3 + $0x108] sm:$0xff]  }
 0x170   : > { %6157 = vmatpush3.bf16.msra.mxu1 %v6723_v11  ;;  %v954_v35 = vld [vmem:[%s7988_s5 + $0x8] sm:$0xff]  ;;  %v963_v38 = vpack.c.bf16 %v958_v32, %v958_v32  ;;  %v6750_v44 = vld [vmem:[#allocation3 + $0x120] sm:$0x3f]   ;;  %v6749_v45 = vld [vmem:[#allocation3 + $0x118] sm:$0xff]  }
 0x171   : > { %6158 = vmatprep.subr.bf16.mxu1 %v6726_v14  ;;  %v959_v37 = vcombine.high %v954_v35, %v954_v35  ;;  %v964_v39 = vpack.c.bf16 %v954_v35, %v954_v35  ;;  %v6748_v43 = vld [vmem:[#allocation3 + $0x110] sm:$0xff]   ;;  %v1275_v46 = vsel %vm1273_vm1, %v6750_v44, 0  ;;  %v955_v47 = vld [vmem:[%s7988_s5 + $0x10] sm:$0xf]  ;;  %v1397_v49 = vld [vmem:[#allocation6] sm:$0x1] }
 0x172   : > { %6137 = vmatpush3.bf16.msra.mxu0 %v6725_v13  ;;  %1309 = vmatprep.mubr.bf16.mxu0 %v963_v38  ;;  %v966_v48 = vpack.c.bf16 %v955_v47, %v955_v47  ;;  %v1398_v50 = vld [vmem:[%s9032_s27] sm:$0x1]  ;;  %v1401_v2 = vld [vmem:[%s9033_s0 + $0x1] sm:$0xf]  ;;  %v6753_v11 = vld [vmem:[#allocation8 + $0x4] ss:$12 sps:$4 sm:$0xff]  }
 0x173   : > { %6138 = vmatprep.subr.bf16.mxu0 %v6728_v16  ;;  %v965_v41 = vpack.c.bf16 %v959_v37, %v959_v37  ;;  %v1399_v51 = vadd.f32 %v1398_v50, %v1397_v49  ;;  %v5627_v53 = vld [vmem:[%s9034_s20] ss:$0 sm:$0xff]  ;;  %v6751_v10 = vld [vmem:[#allocation8] ss:$12 sps:$4 sm:$0xff]   ;;  %v6754_v12 = vld [vmem:[#allocation8 + $0x8] ss:$12 sps:$4 sm:$0xff]  }
 0x174   : > { %6159 = vmatpush3.bf16.msra.mxu1 %v6727_v15  ;;  %v6757_v13 = vld [vmem:[#allocation8 + $0x1c] ss:$12 sps:$4 sm:$0xff]   ;;  %v6758_v14 = vld [vmem:[#allocation8 + $0x20] ss:$12 sps:$4 sm:$0xff]   ;;  %v6755_v15 = vld [vmem:[#allocation8 + $0x18] ss:$12 sps:$4 sm:$0xff]  }
 0x175   : > { %6160 = vmatprep.subr.bf16.mxu1 %v6730_v18  ;;  %1349 = vmatprep.mubr.bf16.mxu1 %v965_v41  ;;  %1400 = vst [vmem:[#allocation2] sm:$0x1] %v1399_v51  ;;  %v6761_v16 = vld [vmem:[#allocation8 + $0x34] ss:$12 sps:$4 sm:$0xff]   ;;  %v6771_v31 = vld [vmem:[#allocation8 + $0x78] ss:$12 sps:$4 sm:$0xff]   ;;  %v1471_v51 = vlaneseq }
 0x176   : > { %6139 = vmatpush3.bf16.msra.mxu0 %v6729_v17  ;;  %v6759_v17 = vld [vmem:[#allocation8 + $0x30] ss:$12 sps:$4 sm:$0xff]   ;;  %v6774_v32 = vld [vmem:[#allocation8 + $0x80] ss:$12 sps:$4 sm:$0xff]   ;;  %v7512_v35 = vmov 0   ;;  %s9043_s5 = sld [smem:[#allocation52_spill]] }
 0x177   : > { %6140 = vmatprep.subr.bf16.mxu0 %v6732_v20  ;;  %v6778_v37 = vld [vmem:[#allocation8 + $0x98] ss:$12 sps:$4 sm:$0xff]   ;;  %v5667_v47 = vld [vmem:[%s9037_s13] ss:$0 sm:$0xff]  ;;  %p9044_p1 = scmp.ne.s32.totalorder %s9042_s28, 0  ;;  %s7409_s0 = sshll.u32 %s7515_s17, 4  ;;  %s7410_s0 = int_to_ptr.vmem [resolvable:$false] %s7409_s0 }
 0x178   : > { %6161 = vmatpush3.bf16.msra.mxu1 %v6731_v19  ;;  %v6781_v38 = vld [vmem:[#allocation8 + $0xac] ss:$12 sps:$4 sm:$0xff]  }
 0x179   : > { %6162 = vmatprep.subr.bf16.mxu1 %v6734_v22 }
 0x17a   : > { %6141 = vmatpush3.bf16.msra.mxu0 %v6733_v21 }
 0x17b   : > { %6142 = vmatprep.subr.bf16.mxu0 %v6736_v24  ;;  %v6765_v24 = vld [vmem:[#allocation8 + $0x4c] ss:$12 sps:$4 sm:$0xff]  }
 0x17c   : > { %6163 = vmatpush3.bf16.msra.mxu1 %v6735_v23  ;;  %v6762_v23 = vld [vmem:[#allocation8 + $0x38] ss:$12 sps:$4 sm:$0xff]   ;;  %s8877_s27 = scalar_lea.hbm %s9043_s5, %s6127_s25 }
 0x17d   : > { %6164 = vmatprep.subr.bf16.mxu1 %v6738_v26  ;;  %v6766_v26 = vld [vmem:[#allocation8 + $0x50] ss:$12 sps:$4 sm:$0xff]  }
 0x17e   : > { %6143 = vmatpush3.bf16.msra.mxu0 %v6737_v25  ;;  %v6763_v25 = vld [vmem:[#allocation8 + $0x48] ss:$12 sps:$4 sm:$0xff]  }
 0x17f   : > { %6144 = vmatprep.subr.bf16.mxu0 %v6740_v28  ;;  %v6769_v28 = vld [vmem:[#allocation8 + $0x64] ss:$12 sps:$4 sm:$0xff]  }
 0x180   : > { %6165 = vmatpush3.bf16.msra.mxu1 %v6739_v27  ;;  %v6767_v27 = vld [vmem:[#allocation8 + $0x60] ss:$12 sps:$4 sm:$0xff]  }
 0x181   : > { %6166 = vmatprep.subr.bf16.mxu1 %v6742_v30  ;;  %v6773_v30 = vld [vmem:[#allocation8 + $0x7c] ss:$12 sps:$4 sm:$0xff]  }
 0x182   : > { %6145 = vmatpush3.bf16.msra.mxu0 %v6741_v29  ;;  %v6770_v29 = vld [vmem:[#allocation8 + $0x68] ss:$12 sps:$4 sm:$0xff]  }
 0x183   : > { %6408 = vmatprep.subr.bf16.mxu0 %v7510_v34 }
 0x184   : > { %6167 = vmatpush3.bf16.msra.mxu1 %v6744_v33  ;;  %v6777_v33 = vld [vmem:[#allocation8 + $0x94] ss:$12 sps:$4 sm:$0xff]  }
 0x185   : > { %1310 = vmatmul.mubr.bf16.vlgmr.msra.gmra.mrb[0].mxu0 %v962_v36  ;;  %1614 = vmatprep.subr.bf16.mxu1 %v6753_v11  ;;  %v6775_v36 = vld [vmem:[#allocation8 + $0x90] ss:$12 sps:$4 sm:$0xff]  }
 0x186   : > { %6409 = vmatpush3.bf16.msra.mxu0 %v6746_v40  ;;  %6418 = vmatprep.mubr.msk.bf16.mxu0 %vm7511_vm0, %v7510_v34  ;;  %v6782_v40 = vld [vmem:[#allocation8 + $0xb0] ss:$12 sps:$4 sm:$0xff]  }
 0x187   : > { %1350 = vmatmul.mubr.bf16.vlgmr.msra.gmra.mrb[0].mxu1 %v964_v39  ;;  %6410 = vmatprep.subr.bf16.mxu0 %v7510_v34  ;;  %v6779_v39 = vld [vmem:[#allocation8 + $0xa8] ss:$12 sps:$4 sm:$0xff]  }
 0x188   : > { %1615 = vmatpush1.bf16.msra.mxu1 %v6751_v10  ;;  %1646 = vmatprep.mubr.bf16.mxu1 %v7512_v35  ;;  %v7514_v10 = vmov 65535  }
 0x189   : > { %1616 = vmatprep.subr.bf16.mxu1 %v6757_v13  ;;  %v1764_v11 = vsel %vm1762_vm5, 4294967295, %v7514_v10 }
 0x18a   : > { %6411 = vmatpush3.bf16.msra.mxu0 %v6747_v42 }
 0x18b   : > { %6412 = vmatprep.subr.bf16.mxu0 %v7510_v34 }
 0x18c   : > { %1617 = vmatpush1.bf16.msra.mxu1 %v6755_v15 }
 0x18d   : > { %1618 = vmatprep.subr.bf16.mxu1 %v6761_v16 }
 0x18e   : > { %6413 = vmatpush3.bf16.msra.mxu0 %v6748_v43 }
 0x18f   : > { %6414 = vmatprep.subr.bf16.mxu0 %v7510_v34 }
 0x190   : > { %1619 = vmatpush1.bf16.msra.mxu1 %v6759_v17 }
 0x191   : > { %1620 = vmatprep.subr.bf16.mxu1 %v6765_v24 }
 0x192   : > { %6415 = vmatpush3.bf16.msra.mxu0 %v6749_v45  ;;  %v5666_v45 = vld [vmem:[%s9035_s7] ss:$0 sm:$0xff] }
 0x193   : > { %6416 = vmatprep.subr.bf16.mxu0 %v7510_v34 }
 0x194   : > { %1621 = vmatpush1.bf16.msra.mxu1 %v6763_v25 }
 0x195   : > { %1622 = vmatprep.subr.bf16.mxu1 %v6769_v28 }
 0x196   : > { %6417 = vmatpush3.bf16.msra.mxu0 %v1275_v46 }
 0x197   : > { %6422 = vmatprep.subr.bf16.mxu0 %v7510_v34 }
 0x198   : > { %1623 = vmatpush1.bf16.msra.mxu1 %v6767_v27 }
 0x199   : > { %6419 = vmatmul.mubr.msk.bf16.vlgmr.msra.gmra.mrb[4].mxu0 %vm1269_vm2, %v966_v48  ;;  %1624 = vmatprep.subr.bf16.mxu1 %v6773_v30 }
 0x19a   : > { %6438 = vmatprep.mubr.msk.bf16.mxu0 %vm7511_vm0, %v7510_v34  ;;  %6423 = vmatpush3.bf16.msra.mxu0 %v6754_v12 }
 0x19b   : > { %6424 = vmatprep.subr.bf16.mxu0 %v7510_v34 }
 0x19c   : > { %1625 = vmatpush1.bf16.msra.mxu1 %v6771_v31 }
 0x19d   : > { %1626 = vmatprep.subr.bf16.mxu1 %v6777_v33 }
 0x19e   : > { %6425 = vmatpush3.bf16.msra.mxu0 %v6758_v14  ;;  %v8058_v14 = vsel %vm1763_vm6, %v1764_v11, 0  ;;  %v5696_v11 = vld [vmem:[%s9040_s23] ss:$0 sm:$0xff] }
 0x19f   : > { %6426 = vmatprep.subr.bf16.mxu0 %v7510_v34 }
 0x1a0   : > { %1627 = vmatpush1.bf16.msra.mxu1 %v6775_v36 }
 0x1a1   : > { %1628 = vmatprep.subr.bf16.mxu1 %v6781_v38 }
 0x1a2   : > { %6427 = vmatpush3.bf16.msra.mxu0 %v6762_v23 }
 0x1a3   : > { %6428 = vmatprep.subr.bf16.mxu0 %v7510_v34 }
 0x1a4   : > { %1629 = vmatpush1.bf16.msra.mxu1 %v6779_v39 }
 0x1a5   : > { %6454 = vmatprep.subr.bf16.mxu1 %v7510_v34 }
 0x1a6   : > { %6429 = vmatpush3.bf16.msra.mxu0 %v6766_v26 }
 0x1a7   : > { %6430 = vmatprep.subr.bf16.mxu0 %v7510_v34 }
 0x1aa   : > { %6431 = vmatpush3.bf16.msra.mxu0 %v6770_v29 }
 0x1ab   : > { %6432 = vmatprep.subr.bf16.mxu0 %v7510_v34 }
 0x1ae   : > { %6433 = vmatpush3.bf16.msra.mxu0 %v6774_v32 }
 0x1af   : > { %6434 = vmatprep.subr.bf16.mxu0 %v7510_v34 }
 0x1b2   : > { %6435 = vmatpush3.bf16.msra.mxu0 %v6778_v37 }
 0x1b3   : > { %6436 = vmatprep.subr.bf16.mxu0 %v7510_v34 }
 0x1b6   : > { %6437 = vmatpush3.bf16.msra.mxu0 %v6782_v40 }
 0x1b7   : > { %6442 = vmatprep.subr.bf16.mxu0 %v7510_v34 }
 0x258   : > { %v6146_v52 = vpop.f32.mrb[0].mxu0 }
 0x259   : > { %v6147_v54 = vpop.f32.mrb[1].mxu0 }
 0x25a   : > { %v6168_v55 = vpop.f32.mrb[0].mxu1  ;;  %v6148_v56 = vadd.f32 %v6147_v54, %v6146_v52  ;;  %v6149_v57 = vpop.f32.mrb[2].mxu0  ;;  %v8038_v52 = vshrl.u32 %v1471_v51, 7  ;;  %v1469_v54 = vld [vmem:[%s9038_s1] sm:$0x7] }
 0x25b   : > { %v6169_v58 = vpop.f32.mrb[1].mxu1  ;;  %v6150_v59 = vpop.f32.mrb[3].mxu0  ;;  %v6783_v51 = vld [vmem:[%s9039_s11] sm:$0xff]  }
 0x25c   : > { %v6170_v60 = vadd.f32 %v6169_v58, %v6168_v55  ;;  %v6171_v61 = vpop.f32.mrb[2].mxu1  ;;  %v1312_v62 = vadd.f32 %v6148_v56, %v5627_v53  ;;  %v8041_v53 = vsub.s32 1, %v8038_v52  ;;  %v8047_v55 = vsub.s32 0, %v8038_v52 }
 0x25d   : > { %v6172_v63 = vpop.f32.mrb[3].mxu1  ;;  %v8050_v56 = vsub.s32 2, %v8038_v52 }
 0x25e   : > { %v1352_v0 = vadd.f32 %v6170_v60, %v1312_v62  ;;  %v1478_v57 = vrot.slane %v1469_v54, %v8041_v53  ;;  %v1474_v58 = vrot.slane %v1469_v54, %v8047_v55 }
 0x25f   : > { %v1482_v61 = vrot.slane %v1469_v54, %v8050_v56  ;;  %v6784_v54 = vld [vmem:[%s9039_s11 + $0x8] sm:$0xff]  }
 0x26c   : > { %v1391_v1 = vpop.f32.mrb[4].mxu0 }
 0x26d   : > { %v1392_v3 = vadd.f32 %v1391_v1, %v1352_v0  ;;  %v6420_v4 = vpop.f32.mrb[5].mxu0 }
 0x26e   : > { %v1394_v5 = vpop.f32.mrb[6].mxu0 }
 0x26f   : > { %v1402_v6 = vadd.f32 %v1401_v2, %v1392_v3  ;;  %v6421_v7 = vpop.f32.mrb[7].mxu0 }
 0x271   : > { %1403 = vst [vmem:[#allocation2 + $0x1] sm:$0xf] %v1402_v6 }
 0x278   : > { %v8012_v8 = vld [vmem:[#allocation2] sm:$0x1f] }
 0x279   : > { %v1408_v9 = vsel %vm1407_vm3, %v8012_v8, 0.0 }
 0x27a   : > { %1409 = vadd.xlane.f32.xlu0 %v1408_v9 }
 0x307   : > { %v1410_v18 = vpop.xlane.xlu0 %1409 }
 0x308   : > { %v1412_v19 = vmul.f32 0.0078125, %v1410_v18 }
 0x30a   : > { %v1413_v20 = vsub.f32 %v8012_v8, %v1412_v19 }
 0x30c   : > { %v1414_v21 = vmul.f32 %v1413_v20, %v1413_v20 }
 0x30e   : > { %v1415_v22 = vsel %vm1407_vm3, %v1414_v21, 0.0 }
 0x30f   : > { %1416 = vadd.xlane.f32.xlu0 %v1415_v22 }
 0x39c   : > { %v1417_v41 = vpop.xlane.xlu0 %1416 }
 0x39d   : > { %v1418_v42 = vmul.f32 0.0078125, %v1417_v41 }
 0x39f   : > { %v1419_v43 = vadd.f32 1e-06, %v1418_v42 }
 0x3a1   : > { %7055 = vrsqrt.f32 %v1419_v43 }
 0x3ab   : > { %v7056_v44 = vpop.eup %7055 }
 0x3ac   : > { %v1421_v46 = vmul.f32 %v7056_v44, %v1413_v20 }
 0x3ae   : > { %v1428_v48 = vmul.f32 %v5666_v45, %v1421_v46 }
 0x3b0   : > { %v1435_v49 = vadd.f32 %v5667_v47, %v1428_v48 }
 0x3b2   : > { %v1436_v50 = vpack.c.bf16 %v1435_v49, %v1435_v49 }
 0x3b4   : > { %1647 = vmatmul.mubr.bf16.vlgmr.msra.gmra.mrb[4].mxu1 %v1436_v50  ;;  %6439 = vmatmul.mubr.bf16.vlgmr.msra.gmra.mrb[8].mxu0 %v1436_v50 }
 0x3b5   : > { %6444 = vmatprep.mubr.msk.bf16.mxu0 %vm7511_vm0, %v7510_v34  ;;  %6456 = vmatprep.mubr.msk.bf16.mxu1 %vm7511_vm0, %v7510_v34 }
 0x487   : > { %v1648_v59 = vpop.f32.mrb[4].mxu1  ;;  %v1689_v60 = vpop.f32.mrb[8].mxu0 }
 0x488   : > { %v1650_v62 = vpop.f32.mrb[5].mxu1  ;;  %v6440_v63 = vpop.f32.mrb[9].mxu0  ;;  %v1649_v5 = vadd.f32 %v1648_v59, %v1474_v58  ;;  %v1690_v7 = vadd.f32 %v1689_v60, %v1482_v61  ;;  %v6786_v59 = vld [vmem:[%s9039_s11 + $0x18] sm:$0xff]  }
 0x489   : > { %v1651_v0 = vadd.f32 %v1650_v62, %v1478_v57  ;;  %v1652_v1 = vpop.f32.mrb[6].mxu1  ;;  %v1692_v2 = vpop.f32.mrb[10].mxu0  ;;  %v6785_v57 = vld [vmem:[%s9039_s11 + $0x10] sm:$0xff]   ;;  %v6787_v63 = vld [vmem:[%s9039_s11 + $0x20] sm:$0xff]  }
 0x48a   : > { %v1653_v3 = vpop.f32.mrb[7].mxu1  ;;  %v6441_v4 = vpop.f32.mrb[11].mxu0  ;;  %v1695_v12 = vpack.c.bf16 %v1649_v5, %v1649_v5  ;;  %v1757_v13 = vpack.c.bf16 %v1690_v7, %v1690_v7  ;;  %v6789_v1 = vld [vmem:[%s9039_s11 + $0x30] sm:$0xff]   ;;  %v6790_v2 = vld [vmem:[%s9039_s11 + $0x38] sm:$0xff]  }
 0x48b   : > { %v1696_v6 = vpack.c.bf16 %v1651_v0, %v1651_v0  ;;  %v6788_v0 = vld [vmem:[%s9039_s11 + $0x28] sm:$0xff]  }
 0x48c   : > { %v1767_v15 = vand.u32 %v8058_v14, %v1757_v13 }
 0x48d   : > { %v1702_v9 = vsel %vm1697_vm4, %v1696_v6, 0  ;;  %1813 = vrot.lane.b32.xlu1 %v1696_v6, %s7513_s30 }
 0x48e   : > { %6443 = vmatpush3.bf16.xpose.msra.mxu0 %v1702_v9 }
 0x48f   : > { %6448 = vmatprep.subr.bf16.mxu0 %v7510_v34 }
 0x491   : > { %1810 = vrot.lane.b32.xlu1 %v1695_v12, %s7513_s30 }
 0x495   : > { %6445 = vmatmul.mubr.msk.bf16.vlgmr.msra.gmra.mrb[12].mxu0 %vm1697_vm4, %v1695_v12 }
 0x496   : > { %6449 = vmatpush3.bf16.msra.mxu0 %v1767_v15  ;;  %6450 = vmatprep.mubr.msk.bf16.mxu0 %vm7511_vm0, %v7510_v34 }
 0x497   : > { %6460 = vmatprep.subr.bf16.mxu0 %v7510_v34 }
 0x4ff   : > { %v1814_v16 = vpop.permute.xlu1 %1813 }
 0x500   : > { %v1819_v17 = vsel %vm1697_vm4, %v1814_v16, 0 }
 0x501   : > { %6455 = vmatpush3.bf16.xpose.msra.mxu1 %v1819_v17 }
 0x502   : > { %6466 = vmatprep.subr.bf16.mxu1 %v7510_v34 }
 0x503   : > { %v1811_v18 = vpop.permute.xlu1 %1810 }
 0x508   : > { %6457 = vmatmul.mubr.msk.bf16.vlgmr.msra.gmra.mrb[8].mxu1 %vm1697_vm4, %v1811_v18 }
 0x509   : > { %6482 = vmatprep.mubr.msk.bf16.mxu1 %vm7511_vm0, %v7510_v34  ;;  %6467 = vmatpush3.bf16.msra.mxu1 %v6783_v51  ;;  %v6824_v51 = vld [vmem:[%s8933_s14 + $0xa8] ss:$16 sps:$4 sm:$0xff]  }
 0x50a   : > { %6468 = vmatprep.subr.bf16.mxu1 %v7510_v34 }
 0x50d   : > { %6469 = vmatpush3.bf16.msra.mxu1 %v6784_v54  ;;  %v6829_v54 = vld [vmem:[%s8933_s14 + $0xc4] ss:$16 sps:$4 sm:$0xff]  }
 0x50e   : > { %6470 = vmatprep.subr.bf16.mxu1 %v7510_v34 }
 0x511   : > { %6471 = vmatpush3.bf16.msra.mxu1 %v6785_v57  ;;  %v6832_v57 = vld [vmem:[%s8933_s14 + $0xcc] ss:$16 sps:$4 sm:$0xff]  }
 0x512   : > { %6472 = vmatprep.subr.bf16.mxu1 %v7510_v34 }
 0x515   : > { %6473 = vmatpush3.bf16.msra.mxu1 %v6786_v59  ;;  %v6830_v59 = vld [vmem:[%s8933_s14 + $0xc8] ss:$16 sps:$4 sm:$0xff]  }
 0x516   : > { %6474 = vmatprep.subr.bf16.mxu1 %v7510_v34 }
 0x519   : > { %6475 = vmatpush3.bf16.msra.mxu1 %v6787_v63  ;;  %v6836_v63 = vld [vmem:[%s8933_s14 + $0xe8] ss:$16 sps:$4 sm:$0xff]  }
 0x51a   : > { %6476 = vmatprep.subr.bf16.mxu1 %v7510_v34 }
 0x51d   : > { %6477 = vmatpush3.bf16.msra.mxu1 %v6788_v0  ;;  %v6839_v0 = vld [vmem:[%s8935_s16 + $0x40] sm:$0xff]  }
 0x51e   : > { %6478 = vmatprep.subr.bf16.mxu1 %v7510_v34 }
 0x521   : > { %6479 = vmatpush3.bf16.msra.mxu1 %v6789_v1  ;;  %v6840_v1 = vld [vmem:[%s8935_s16 + $0xc0] sm:$0xff]  }
 0x522   : > { %6480 = vmatprep.subr.bf16.mxu1 %v7510_v34 }
 0x525   : > { %6481 = vmatpush3.bf16.msra.mxu1 %v6790_v2 }
 0x568   : > { %v1738_v19 = vpop.f32.mrb[12].mxu0 }
 0x569   : > { %v6446_v20 = vpop.f32.mrb[13].mxu0  ;;  %v1745_v21 = vsel %vm1744_vm7, %v1738_v19, -inf }
 0x56a   : > { %1746 = vmax.xlane.f32.xlu0 %v1745_v21  ;;  %v1741_v22 = vpop.f32.mrb[14].mxu0 }
 0x56b   : > { %v6447_v23 = vpop.f32.mrb[15].mxu0  ;;  %v6791_v22 = vld [vmem:[%s8933_s14] ss:$16 sps:$4 sm:$0xff]  }
 0x56c   : > { %v6793_v23 = vld [vmem:[%s8933_s14 + $0x4] ss:$16 sps:$4 sm:$0xff]  }
 0x5db   : > { %v1855_v24 = vpop.f32.mrb[8].mxu1 }
 0x5dc   : > { %v6458_v25 = vpop.f32.mrb[9].mxu1  ;;  %v1861_v26 = vsel %vm1744_vm7, %v1855_v24, -inf }
 0x5dd   : > { %1862 = vmax.xlane.f32.xlu1 %v1861_v26  ;;  %v1858_v27 = vpop.f32.mrb[10].mxu1  ;;  %v6799_v25 = vld [vmem:[%s8933_s14 + $0x24] ss:$16 sps:$4 sm:$0xff]   ;;  %v6802_v26 = vld [vmem:[%s8933_s14 + $0x2c] ss:$16 sps:$4 sm:$0xff]  }
 0x5de   : > { %v6459_v28 = vpop.f32.mrb[11].mxu1  ;;  %v6797_v27 = vld [vmem:[%s8933_s14 + $0x20] ss:$16 sps:$4 sm:$0xff]  }
 0x5df   : > { %v6800_v28 = vld [vmem:[%s8933_s14 + $0x28] ss:$16 sps:$4 sm:$0xff]  }
 0x5f7   : > { %v1747_v29 = vpop.xlane.xlu0 %1746 }
 0x5f8   : > { %v1748_v30 = vsub.f32 %v1738_v19, %v1747_v29  ;;  %v6805_v29 = vld [vmem:[%s8933_s14 + $0x44] ss:$16 sps:$4 sm:$0xff]  }
 0x5fa   : > { %v1749_v31 = vmul.f32 1.442695, %v1748_v30  ;;  %v6808_v30 = vld [vmem:[%s8933_s14 + $0x4c] ss:$16 sps:$4 sm:$0xff]  }
 0x5fc   : > { %7057 = vpow2.f32 %v1749_v31  ;;  %v6803_v31 = vld [vmem:[%s8933_s14 + $0x40] ss:$16 sps:$4 sm:$0xff]  }
 0x606   : > { %v7058_v32 = vpop.eup %7057 }
 0x607   : > { %v1751_v33 = vsel %vm1744_vm7, %v7058_v32, 0.0 }
 0x608   : > { %1752 = vadd.xlane.f32.xlu0 %v1751_v33 }
 0x66a   : > { %v1863_v36 = vpop.xlane.xlu1 %1862 }
 0x66b   : > { %v1864_v37 = vsub.f32 %v1855_v24, %v1863_v36  ;;  %v6794_v24 = vld [vmem:[%s8933_s14 + $0x8] ss:$16 sps:$4 sm:$0xff]  }
 0x66d   : > { %v1865_v38 = vmul.f32 1.442695, %v1864_v37 }
 0x66f   : > { %7059 = vpow2.f32 %v1865_v38 }
 0x679   : > { %v7060_v39 = vpop.eup %7059 }
 0x67a   : > { %v1867_v40 = vsel %vm1744_vm7, %v7060_v39, 0.0 }
 0x67b   : > { %1868 = vadd.xlane.f32.xlu0 %v1867_v40  ;;  %v6811_v40 = vld [vmem:[%s8933_s14 + $0x64] ss:$16 sps:$4 sm:$0xff]  }
 0x691   : > { %1874 = vrot.lane.b32.xlu0 %v1757_v13, %s7513_s30  ;;  %v5705_v13 = vld [vmem:[#allocation9] ss:$0 sm:$0xff] }
 0x695   : > { %v1753_v41 = vpop.xlane.xlu0 %1752 }
 0x696   : > { %7061 = vrcp.f32 %v1753_v41  ;;  %v6814_v41 = vld [vmem:[%s8933_s14 + $0x6c] ss:$16 sps:$4 sm:$0xff]  }
 0x6a0   : > { %v7062_v42 = vpop.eup %7061 }
 0x6a1   : > { %v1755_v43 = vmul.f32 %v7062_v42, %v7058_v32  ;;  %v6806_v32 = vld [vmem:[%s8933_s14 + $0x48] ss:$16 sps:$4 sm:$0xff]   ;;  %v6809_v42 = vld [vmem:[%s8933_s14 + $0x60] ss:$16 sps:$4 sm:$0xff]  }
 0x6a3   : > { %v1756_v44 = vpack.c.bf16 %v1755_v43, %v1755_v43  ;;  %v6812_v43 = vld [vmem:[%s8933_s14 + $0x68] ss:$16 sps:$4 sm:$0xff]  }
 0x6a5   : > { %6451 = vmatmul.mubr.msk.bf16.vlgmr.msra.gmra.mrb[16].mxu0 %vm1758_vm8, %v1756_v44  ;;  %v6815_v44 = vld [vmem:[%s8933_s14 + $0x80] ss:$16 sps:$4 sm:$0xff]  }
 0x6a6   : > { %6462 = vmatprep.mubr.msk.bf16.mxu0 %vm7511_vm0, %v7510_v34 }
 0x708   : > { %v1869_v45 = vpop.xlane.xlu0 %1868 }
 0x709   : > { %7063 = vrcp.f32 %v1869_v45  ;;  %v6817_v45 = vld [vmem:[%s8933_s14 + $0x84] ss:$16 sps:$4 sm:$0xff]  }
 0x70c   : > { %v1875_v46 = vpop.permute.xlu0 %1874 }
 0x70d   : > { %v1880_v47 = vand.u32 %v1875_v46, %v8058_v14  ;;  %v6818_v46 = vld [vmem:[%s8933_s14 + $0x88] ss:$16 sps:$4 sm:$0xff]  }
 0x70f   : > { %6461 = vmatpush3.bf16.msra.mxu0 %v1880_v47  ;;  %v6820_v47 = vld [vmem:[%s8933_s14 + $0x8c] ss:$16 sps:$4 sm:$0xff]  }
 0x710   : > { %2292 = vmatprep.subr.bf16.mxu0 %v6793_v23  ;;  %v6849_v23 = vld [vmem:[%s8935_s16 + $0x10] sm:$0xff]  }
 0x713   : > { %v7064_v48 = vpop.eup %7063 }
 0x714   : > { %v1871_v49 = vmul.f32 %v7064_v48, %v7060_v39  ;;  %v6823_v48 = vld [vmem:[%s8933_s14 + $0xa4] ss:$16 sps:$4 sm:$0xff]  }
 0x716   : > { %v1872_v50 = vpack.c.bf16 %v1871_v49, %v1871_v49  ;;  %v6826_v49 = vld [vmem:[%s8933_s14 + $0xac] ss:$16 sps:$4 sm:$0xff]  }
 0x718   : > { %6463 = vmatmul.mubr.msk.bf16.vlgmr.msra.gmra.mrb[20].mxu0 %vm1758_vm8, %v1872_v50  ;;  %v6821_v50 = vld [vmem:[%s8933_s14 + $0xa0] ss:$16 sps:$4 sm:$0xff]  }
 0x719   : > { %2324 = vmatprep.mubr.bf16.mxu0 %v7512_v35  ;;  %2293 = vmatpush1.bf16.msra.mxu0 %v6791_v22  ;;  %v6848_v22 = vld [vmem:[%s8935_s16 + $0xd0] sm:$0xff]  }
 0x71a   : > { %2294 = vmatprep.subr.bf16.mxu0 %v6799_v25  ;;  %v6852_v25 = vld [vmem:[%s8935_s16 + $0xd8] sm:$0xff]  }
 0x71d   : > { %2295 = vmatpush1.bf16.msra.mxu0 %v6797_v27  ;;  %v6854_v27 = vld [vmem:[%s8935_s16 + $0x98] sm:$0xff]  }
 0x71e   : > { %2296 = vmatprep.subr.bf16.mxu0 %v6805_v29  ;;  %v6856_v29 = vld [vmem:[%s8935_s16 + $0xe0] sm:$0xff]  }
 0x721   : > { %2297 = vmatpush1.bf16.msra.mxu0 %v6803_v31  ;;  %v6858_v31 = vld [vmem:[%s8935_s16 + $0xa0] sm:$0xff]  }
 0x722   : > { %2298 = vmatprep.subr.bf16.mxu0 %v6811_v40  ;;  %v6865_v40 = vld [vmem:[%s8935_s16 + $0x30] sm:$0xff]  }
 0x725   : > { %2299 = vmatpush1.bf16.msra.mxu0 %v6809_v42  ;;  %v6867_v42 = vld [vmem:[%s8935_s16 + $0x78] sm:$0xff]  }
 0x726   : > { %2300 = vmatprep.subr.bf16.mxu0 %v6817_v45  ;;  %v6870_v45 = vld [vmem:[%s8935_s16 + $0xb8] sm:$0xff]  }
 0x729   : > { %2301 = vmatpush1.bf16.msra.mxu0 %v6815_v44  ;;  %v6869_v44 = vld [vmem:[%s8935_s16 + $0x38] sm:$0xff]  }
 0x72a   : > { %2302 = vmatprep.subr.bf16.mxu0 %v6823_v48 }
 0x72d   : > { %2303 = vmatpush1.bf16.msra.mxu0 %v6821_v50 }
 0x72e   : > { %2304 = vmatprep.subr.bf16.mxu0 %v6829_v54 }
 0x778   : > { %v1803_v58 = vpop.f32.mrb[16].mxu0 }
 0x779   : > { %v6452_v60 = vpop.f32.mrb[17].mxu0 }
 0x77a   : > { %v1806_v61 = vpop.f32.mrb[18].mxu0  ;;  %v6835_v60 = vld [vmem:[%s8933_s14 + $0xe4] ss:$16 sps:$4 sm:$0xff]  }
 0x77b   : > { %v6453_v62 = vpop.f32.mrb[19].mxu0  ;;  %v6838_v61 = vld [vmem:[%s8933_s14 + $0xec] ss:$16 sps:$4 sm:$0xff]  }
 0x77c   : > { %v6833_v62 = vld [vmem:[%s8933_s14 + $0xe0] ss:$16 sps:$4 sm:$0xff]  }
 0x7eb   : > { %v1916_v3 = vpop.f32.mrb[20].mxu0 }
 0x7ec   : > { %1923 = vrot.lane.b32.xlu0 %v1916_v3, %s7513_s30  ;;  %v6464_v4 = vpop.f32.mrb[21].mxu0 }
 0x7ed   : > { %v1919_v5 = vpop.f32.mrb[22].mxu0 }
 0x7ee   : > { %v6465_v6 = vpop.f32.mrb[23].mxu0 }
 0x7ef   : > { %v5706_v6 = vld [vmem:[#allocation11] ss:$0 sm:$0xff] }
 0x85e   : > { %v1924_v7 = vpop.permute.xlu0 %1923 }
 0x85f   : > { %v1926_v9 = vsel %vm1697_vm4, %v1803_v58, %v1924_v7  ;;  %v6827_v58 = vld [vmem:[%s8933_s14 + $0xc0] ss:$16 sps:$4 sm:$0xff]  }
 0x860   : > { %v1927_v10 = vpack.c.bf16 %v1926_v9, %v1926_v9  ;;  %2305 = vmatpush1.bf16.msra.mxu0 %v6827_v58  ;;  %v5707_v9 = vld [vmem:[#allocation12] ss:$0 sm:$0xff] }
 0x861   : > { %2306 = vmatprep.subr.bf16.mxu0 %v6835_v60 }
 0x862   : > { %6483 = vmatmul.mubr.bf16.vlgmr.msra.gmra.mrb[12].mxu1 %v1927_v10 }
 0x863   : > { %2365 = vmatprep.mubr.bf16.mxu1 %v7512_v35 }
 0x864   : > { %2307 = vmatpush1.bf16.msra.mxu0 %v6833_v62 }
 0x865   : > { %6206 = vmatprep.subr.bf16.mxu0 %v6839_v0 }
 0x935   : > { %v2033_v12 = vpop.f32.mrb[12].mxu1 }
 0x936   : > { %v2034_v15 = vadd.f32 %v5696_v11, %v2033_v12  ;;  %v6484_v16 = vpop.f32.mrb[13].mxu1  ;;  %v6841_v12 = vld [vmem:[%s8935_s16] sm:$0xff]  }
 0x937   : > { %v2036_v17 = vpop.f32.mrb[14].mxu1  ;;  %v6843_v16 = vld [vmem:[%s8935_s16 + $0x48] sm:$0xff]  }
 0x938   : > { %v2046_v18 = vmul.f32 %v5705_v13, %v2034_v15  ;;  %v6485_v19 = vpop.f32.mrb[15].mxu1  ;;  %v6842_v13 = vld [vmem:[%s8935_s16 + $0x80] sm:$0xff]   ;;  %v6844_v17 = vld [vmem:[%s8935_s16 + $0xc8] sm:$0xff]  }
 0x939   : > { %v6846_v19 = vld [vmem:[%s8935_s16 + $0x88] sm:$0xff]  }
 0x93a   : > { %v8120_v20 = vadd.f32 %v2046_v18, %v8012_v8  ;;  %v6796_v8 = vld [vmem:[%s8933_s14 + $0xc] ss:$16 sps:$4 sm:$0xff]  }
 0x93b   : > { %2333 = vmatprep.subr.bf16.mxu1 %v6796_v8  ;;  %v6845_v18 = vld [vmem:[%s8935_s16 + $0x8] sm:$0xff]   ;;  %v6851_v8 = vld [vmem:[%s8935_s16 + $0x58] sm:$0xff]  }
 0x93c   : > { %v2050_v21 = vsel %vm1407_vm3, %v8120_v20, 0.0  ;;  %2334 = vmatpush1.bf16.msra.mxu1 %v6794_v24  ;;  %v6850_v24 = vld [vmem:[%s8935_s16 + $0x90] sm:$0xff]  }
 0x93d   : > { %2051 = vadd.xlane.f32.xlu1 %v2050_v21  ;;  %2335 = vmatprep.subr.bf16.mxu1 %v6802_v26  ;;  %v6847_v21 = vld [vmem:[%s8935_s16 + $0x50] sm:$0xff]   ;;  %v6853_v26 = vld [vmem:[%s8935_s16 + $0x18] sm:$0xff]  }
 0x940   : > { %2336 = vmatpush1.bf16.msra.mxu1 %v6800_v28  ;;  %v6855_v28 = vld [vmem:[%s8935_s16 + $0x60] sm:$0xff]  }
 0x941   : > { %2337 = vmatprep.subr.bf16.mxu1 %v6808_v30  ;;  %v6857_v30 = vld [vmem:[%s8935_s16 + $0x20] sm:$0xff]  }
 0x944   : > { %2338 = vmatpush1.bf16.msra.mxu1 %v6806_v32  ;;  %v6859_v32 = vld [vmem:[%s8935_s16 + $0x68] sm:$0xff]  }
 0x945   : > { %2339 = vmatprep.subr.bf16.mxu1 %v6814_v41  ;;  %v6866_v41 = vld [vmem:[%s8935_s16 + $0xb0] sm:$0xff]  }
 0x948   : > { %2340 = vmatpush1.bf16.msra.mxu1 %v6812_v43  ;;  %v6868_v43 = vld [vmem:[%s8935_s16 + $0xf8] sm:$0xff]  }
 0x949   : > { %2341 = vmatprep.subr.bf16.mxu1 %v6820_v47  ;;  %v8320_v47 = vsub.s32 3, %v8038_v52 }
 0x94c   : > { %2342 = vmatpush1.bf16.msra.mxu1 %v6818_v46  ;;  %v2110_v46 = vld [vmem:[#allocation14] sm:$0xf] }
 0x94d   : > { %2343 = vmatprep.subr.bf16.mxu1 %v6826_v49  ;;  %v2115_v48 = vrot.slane %v2110_v46, %v8047_v55  ;;  %v2123_v49 = vrot.slane %v2110_v46, %v8050_v56  ;;  %v2119_v50 = vrot.slane %v2110_v46, %v8041_v53 }
 0x950   : > { %2344 = vmatpush1.bf16.msra.mxu1 %v6824_v51  ;;  %v2127_v51 = vrot.slane %v2110_v46, %v8320_v47 }
 0x951   : > { %2345 = vmatprep.subr.bf16.mxu1 %v6832_v57 }
 0x954   : > { %2346 = vmatpush1.bf16.msra.mxu1 %v6830_v59 }
 0x955   : > { %2347 = vmatprep.subr.bf16.mxu1 %v6838_v61 }
 0x958   : > { %2348 = vmatpush1.bf16.msra.mxu1 %v6836_v63 }
 0x959   : > { %6228 = vmatprep.subr.bf16.mxu1 %v6840_v1 }
 0x9ca   : > { %v2052_v33 = vpop.xlane.xlu1 %2051 }
 0x9cb   : > { %v2053_v36 = vmul.f32 0.0078125, %v2052_v33  ;;  %v6860_v33 = vld [vmem:[%s8935_s16 + $0xe8] sm:$0xff]  }
 0x9cd   : > { %v2054_v37 = vsub.f32 %v8120_v20, %v2053_v36  ;;  %v6861_v36 = vld [vmem:[%s8935_s16 + $0x28] sm:$0xff]  }
 0x9cf   : > { %v2055_v38 = vmul.f32 %v2054_v37, %v2054_v37 }
 0x9d1   : > { %v2056_v39 = vsel %vm1407_vm3, %v2055_v38, 0.0  ;;  %v6863_v38 = vld [vmem:[%s8935_s16 + $0x70] sm:$0xff]  }
 0x9d2   : > { %2057 = vadd.xlane.f32.xlu0 %v2056_v39  ;;  %v6864_v39 = vld [vmem:[%s8935_s16 + $0xf0] sm:$0xff]  }
 0xa5f   : > { %v2058_v2 = vpop.xlane.xlu0 %2057 }
 0xa60   : > { %v2059_v3 = vmul.f32 0.0078125, %v2058_v2 }
 0xa62   : > { %v2060_v4 = vadd.f32 1e-06, %v2059_v3 }
 0xa64   : > { %7065 = vrsqrt.f32 %v2060_v4 }
 0xa6e   : > { %v7066_v5 = vpop.eup %7065 }
 0xa6f   : > { %v2062_v7 = vmul.f32 %v7066_v5, %v2054_v37  ;;  %v6862_v37 = vld [vmem:[%s8935_s16 + $0xa8] sm:$0xff]  }
 0xa71   : > { %v2069_v10 = vmul.f32 %v5706_v6, %v2062_v7 }
 0xa73   : > { %v2076_v11 = vadd.f32 %v5707_v9, %v2069_v10 }
 0xa75   : > { %v2077_v15 = vpack.c.bf16 %v2076_v11, %v2076_v11 }
 0xa77   : > { %2325 = vmatmul.mubr.bf16.vlgmr.msra.gmra.mrb[24].mxu0 %v2077_v15  ;;  %2366 = vmatmul.mubr.bf16.vlgmr.msra.gmra.mrb[16].mxu1 %v2077_v15 }
 0xa78   : > { %6207 = vmatpush3.bf16.msra.mxu0 %v6841_v12  ;;  %6229 = vmatpush3.bf16.msra.mxu1 %v6842_v13 }
 0xa79   : > { %6208 = vmatprep.subr.bf16.mxu0 %v6843_v16  ;;  %6230 = vmatprep.subr.bf16.mxu1 %v6844_v17 }
 0xa7c   : > { %6209 = vmatpush3.bf16.msra.mxu0 %v6845_v18  ;;  %6231 = vmatpush3.bf16.msra.mxu1 %v6846_v19 }
 0xa7d   : > { %6210 = vmatprep.subr.bf16.mxu0 %v6847_v21  ;;  %6232 = vmatprep.subr.bf16.mxu1 %v6848_v22 }
 0xa80   : > { %6211 = vmatpush3.bf16.msra.mxu0 %v6849_v23  ;;  %6233 = vmatpush3.bf16.msra.mxu1 %v6850_v24 }
 0xa81   : > { %6212 = vmatprep.subr.bf16.mxu0 %v6851_v8  ;;  %6234 = vmatprep.subr.bf16.mxu1 %v6852_v25 }
 0xa84   : > { %6213 = vmatpush3.bf16.msra.mxu0 %v6853_v26  ;;  %6235 = vmatpush3.bf16.msra.mxu1 %v6854_v27 }
 0xa85   : > { %6214 = vmatprep.subr.bf16.mxu0 %v6855_v28  ;;  %6236 = vmatprep.subr.bf16.mxu1 %v6856_v29 }
 0xa88   : > { %6215 = vmatpush3.bf16.msra.mxu0 %v6857_v30  ;;  %6237 = vmatpush3.bf16.msra.mxu1 %v6858_v31 }
 0xa89   : > { %6216 = vmatprep.subr.bf16.mxu0 %v6859_v32  ;;  %6238 = vmatprep.subr.bf16.mxu1 %v6860_v33  ;;  %v5740_v32 = vld [vmem:[#allocation15] ss:$0 sm:$0xff] }
 0xa8c   : > { %6217 = vmatpush3.bf16.msra.mxu0 %v6861_v36  ;;  %6239 = vmatpush3.bf16.msra.mxu1 %v6862_v37 }
 0xa8d   : > { %6218 = vmatprep.subr.bf16.mxu0 %v6863_v38  ;;  %6240 = vmatprep.subr.bf16.mxu1 %v6864_v39 }
 0xa90   : > { %6219 = vmatpush3.bf16.msra.mxu0 %v6865_v40  ;;  %6241 = vmatpush3.bf16.msra.mxu1 %v6866_v41 }
 0xa91   : > { %6220 = vmatprep.subr.bf16.mxu0 %v6867_v42  ;;  %6242 = vmatprep.subr.bf16.mxu1 %v6868_v43 }
 0xa94   : > { %6221 = vmatpush3.bf16.msra.mxu0 %v6869_v44  ;;  %6243 = vmatpush3.bf16.msra.mxu1 %v6870_v45  ;;  %v5773_v44 = vld [vmem:[%s8937_s18] ss:$0 sm:$0xff] }
 0xa95   : > { %6486 = vmatprep.subr.bf16.mxu1 %v7510_v34 }
 0xb4a   : > { %v2326_v54 = vpop.f32.mrb[24].mxu0  ;;  %v2367_v57 = vpop.f32.mrb[16].mxu1 }
 0xb4b   : > { %v2327_v58 = vadd.f32 %v2326_v54, %v2115_v48  ;;  %v2368_v59 = vadd.f32 %v2367_v57, %v2123_v49  ;;  %v2328_v60 = vpop.f32.mrb[25].mxu0  ;;  %v2369_v61 = vpop.f32.mrb[17].mxu1  ;;  %v6874_v54 = vld [vmem:[#allocation8 + $0xc8] ss:$12 sps:$4 sm:$0xff]  }
 0xb4c   : > { %v2329_v62 = vadd.f32 %v2328_v60, %v2119_v50  ;;  %v2370_v63 = vadd.f32 %v2369_v61, %v2127_v51  ;;  %v2330_v0 = vpop.f32.mrb[26].mxu0  ;;  %v2371_v1 = vpop.f32.mrb[18].mxu1  ;;  %v6871_v50 = vld [vmem:[#allocation8 + $0xc0] ss:$12 sps:$4 sm:$0xff]   ;;  %v6873_v51 = vld [vmem:[#allocation8 + $0xc4] ss:$12 sps:$4 sm:$0xff]  }
 0xb4d   : > { %v2378_v2 = vmul.f32 0.70710677, %v2327_v58  ;;  %v2380_v3 = vmul.f32 0.70710677, %v2368_v59  ;;  %v2331_v6 = vpop.f32.mrb[27].mxu0  ;;  %v2372_v7 = vpop.f32.mrb[19].mxu1  ;;  %2961 = vmatprep.subr.bf16.mxu0 %v6873_v51 }
 0xb4e   : > { %v2379_v4 = vmul.f32 0.70710677, %v2329_v62  ;;  %v2381_v5 = vmul.f32 0.70710677, %v2370_v63  ;;  %v2374_v13 = vmul.f32 0.5, %v2327_v58  ;;  %v2376_v17 = vmul.f32 0.5, %v2368_v59 }
 0xb4f   : > { %7067 = verf.f32 %v2378_v2  ;;  %v2375_v18 = vmul.f32 0.5, %v2329_v62  ;;  %v2377_v22 = vmul.f32 0.5, %v2370_v63  ;;  %v6877_v57 = vld [vmem:[#allocation8 + $0xdc] ss:$12 sps:$4 sm:$0xff]   ;;  %v6878_v58 = vld [vmem:[#allocation8 + $0xe0] ss:$12 sps:$4 sm:$0xff]  }
 0xb50   : > { %7069 = verf.f32 %v2380_v3  ;;  %v6875_v59 = vld [vmem:[#allocation8 + $0xd8] ss:$12 sps:$4 sm:$0xff]   ;;  %v6881_v60 = vld [vmem:[#allocation8 + $0xf4] ss:$12 sps:$4 sm:$0xff]  }
 0xb51   : > { %7071 = verf.f32 %v2379_v4  ;;  %v6882_v2 = vld [vmem:[#allocation8 + $0xf8] ss:$12 sps:$4 sm:$0xff]   ;;  %v6883_v4 = vld [vmem:[#allocation8 + $0x108] ss:$12 sps:$4 sm:$0xff]   ;;  %v6887_v7 = vld [vmem:[#allocation8 + $0x120] ss:$12 sps:$4 sm:$0xff]  }
 0xb52   : > { %7073 = verf.f32 %v2381_v5  ;;  %v6885_v3 = vld [vmem:[#allocation8 + $0x10c] ss:$12 sps:$4 sm:$0xff]   ;;  %v6886_v5 = vld [vmem:[#allocation8 + $0x110] ss:$12 sps:$4 sm:$0xff]  }
 0xb53   : > { %v6889_v6 = vld [vmem:[#allocation8 + $0x124] ss:$12 sps:$4 sm:$0xff]  }
 0xb59   : > { %v7068_v9 = vpop.eup %7067 }
 0xb5a   : > { %v7070_v10 = vpop.eup %7069  ;;  %v2386_v11 = vadd.f32 1.0, %v7068_v9  ;;  %v6890_v9 = vld [vmem:[#allocation8 + $0x128] ss:$12 sps:$4 sm:$0xff]  }
 0xb5b   : > { %v7072_v12 = vpop.eup %7071  ;;  %v2388_v15 = vadd.f32 1.0, %v7070_v10  ;;  %v6893_v10 = vld [vmem:[#allocation8 + $0x13c] ss:$12 sps:$4 sm:$0xff]  }
 0xb5c   : > { %v7074_v16 = vpop.eup %7073  ;;  %v2387_v19 = vadd.f32 1.0, %v7072_v12  ;;  %v2390_v21 = vmul.f32 %v2386_v11, %v2374_v13  ;;  %v6891_v11 = vld [vmem:[#allocation8 + $0x138] ss:$12 sps:$4 sm:$0xff]   ;;  %v6894_v12 = vld [vmem:[#allocation8 + $0x140] ss:$12 sps:$4 sm:$0xff]  }
 0xb5d   : > { %v2389_v23 = vadd.f32 1.0, %v7074_v16  ;;  %v2392_v24 = vmul.f32 %v2388_v15, %v2376_v17  ;;  %v6897_v13 = vld [vmem:[#allocation8 + $0x154] ss:$12 sps:$4 sm:$0xff]   ;;  %v6895_v15 = vld [vmem:[#allocation8 + $0x150] ss:$12 sps:$4 sm:$0xff]  }
 0xb5e   : > { %v2391_v8 = vmul.f32 %v2387_v19, %v2375_v18  ;;  %v2394_v27 = vpack.c.bf16 %v2390_v21, %v2390_v21  ;;  %v6898_v16 = vld [vmem:[#allocation8 + $0x158] ss:$12 sps:$4 sm:$0xff]   ;;  %v6899_v18 = vld [vmem:[#allocation8 + $0x168] ss:$12 sps:$4 sm:$0xff]   ;;  %v6902_v19 = vld [vmem:[#allocation8 + $0x170] ss:$12 sps:$4 sm:$0xff]  }
 0xb5f   : > { %v2393_v25 = vmul.f32 %v2389_v23, %v2377_v22  ;;  %v2396_v29 = vpack.c.bf16 %v2392_v24, %v2392_v24  ;;  %v6901_v17 = vld [vmem:[#allocation8 + $0x16c] ss:$12 sps:$4 sm:$0xff]  }
 0xb60   : > { %v2395_v26 = vpack.c.bf16 %v2391_v8, %v2391_v8  ;;  %v5776_v8 = vld [vmem:[%s9036_s26 + $0x1] ss:$0 sm:$0xff] }
 0xb61   : > { %v2397_v28 = vpack.c.bf16 %v2393_v25, %v2393_v25 }
 0xb62   : > { %2693 = vmatprep.mubr.bf16.mxu0 %v2395_v26  ;;  %v5777_v26 = vld [vmem:[%s9037_s13 + $0x1] ss:$0 sm:$0xff] }
 0xb63   : > { %2733 = vmatprep.mubr.bf16.mxu1 %v2397_v28  ;;  %2694 = vmatmul.mubr.bf16.vlgmr.msra.gmra.mrb[28].mxu0 %v2394_v27 }
 0xb64   : > { %2734 = vmatmul.mubr.bf16.vlgmr.msra.gmra.mrb[20].mxu1 %v2396_v29  ;;  %2993 = vmatprep.mubr.bf16.mxu0 %v7512_v35 }
 0xb65   : > { %6502 = vmatprep.mubr.msk.bf16.mxu1 %vm7511_vm0, %v7510_v34  ;;  %6487 = vmatpush3.bf16.msra.mxu1 %v6874_v54 }
 0xb66   : > { %2962 = vmatpush1.bf16.msra.mxu0 %v6871_v50  ;;  %6488 = vmatprep.subr.bf16.mxu1 %v7510_v34 }
 0xb67   : > { %2963 = vmatprep.subr.bf16.mxu0 %v6877_v57 }
 0xb69   : > { %6489 = vmatpush3.bf16.msra.mxu1 %v6878_v58 }
 0xb6a   : > { %2964 = vmatpush1.bf16.msra.mxu0 %v6875_v59  ;;  %6490 = vmatprep.subr.bf16.mxu1 %v7510_v34 }
 0xb6b   : > { %2965 = vmatprep.subr.bf16.mxu0 %v6881_v60 }
 0xb6d   : > { %6491 = vmatpush3.bf16.msra.mxu1 %v6882_v2 }
 0xb6e   : > { %6492 = vmatprep.subr.bf16.mxu1 %v7510_v34 }
 0xb71   : > { %6493 = vmatpush3.bf16.msra.mxu1 %v6886_v5 }
 0xb72   : > { %6494 = vmatprep.subr.bf16.mxu1 %v7510_v34 }
 0xb75   : > { %6495 = vmatpush3.bf16.msra.mxu1 %v6890_v9 }
 0xb76   : > { %6496 = vmatprep.subr.bf16.mxu1 %v7510_v34 }
 0xb79   : > { %6497 = vmatpush3.bf16.msra.mxu1 %v6894_v12 }
 0xb7a   : > { %6498 = vmatprep.subr.bf16.mxu1 %v7510_v34 }
 0xb7d   : > { %6499 = vmatpush3.bf16.msra.mxu1 %v6898_v16 }
 0xb7e   : > { %6500 = vmatprep.subr.bf16.mxu1 %v7510_v34 }
 0xb81   : > { %6501 = vmatpush3.bf16.msra.mxu1 %v6902_v19 }
 0xb82   : > { %6530 = vmatprep.subr.bf16.mxu1 %v7510_v34 }
 0xc36   : > { %v6222_v30 = vpop.f32.mrb[28].mxu0 }
 0xc37   : > { %v6244_v31 = vpop.f32.mrb[20].mxu1  ;;  %v6223_v33 = vpop.f32.mrb[29].mxu0 }
 0xc38   : > { %v6224_v36 = vadd.f32 %v6223_v33, %v6222_v30  ;;  %v6245_v37 = vpop.f32.mrb[21].mxu1  ;;  %v6225_v38 = vpop.f32.mrb[30].mxu0  ;;  %v5778_v30 = vld [vmem:[%s9038_s1 + $0x3] sm:$0x7]  ;;  %s7411_s1 = scalar_lea.vmem %s7410_s0, 32 }
 0xc39   : > { %v6246_v39 = vadd.f32 %v6245_v37, %v6244_v31  ;;  %v6247_v40 = vpop.f32.mrb[22].mxu1  ;;  %v6226_v41 = vpop.f32.mrb[31].mxu0  ;;  %v2821_v31 = vrot.slane %v5778_v30, %v8047_v55  ;;  %v2829_v38 = vrot.slane %v5778_v30, %v8050_v56 }
 0xc3a   : > { %v2696_v42 = vadd.f32 %v6224_v36, %v5740_v32  ;;  %v6248_v43 = vpop.f32.mrb[23].mxu1  ;;  %v2825_v32 = vrot.slane %v5778_v30, %v8041_v53 }
 0xc3c   : > { %v2736_v45 = vadd.f32 %v6246_v39, %v2696_v42 }
 0xc3e   : > { %v2748_v46 = vmul.f32 %v5773_v44, %v2736_v45 }
 0xc40   : > { %v8333_v48 = vadd.f32 %v2748_v46, %v8120_v20  ;;  %v6879_v20 = vld [vmem:[#allocation8 + $0xf0] ss:$12 sps:$4 sm:$0xff]  }
 0xc41   : > { %2966 = vmatpush1.bf16.msra.mxu0 %v6879_v20 }
 0xc42   : > { %v2754_v49 = vsel %vm1407_vm3, %v8333_v48, 0.0  ;;  %2967 = vmatprep.subr.bf16.mxu0 %v6885_v3 }
 0xc43   : > { %2755 = vadd.xlane.f32.xlu1 %v2754_v49 }
 0xc45   : > { %2968 = vmatpush1.bf16.msra.mxu0 %v6883_v4 }
 0xc46   : > { %2969 = vmatprep.subr.bf16.mxu0 %v6889_v6 }
 0xc49   : > { %2970 = vmatpush1.bf16.msra.mxu0 %v6887_v7 }
 0xc4a   : > { %2971 = vmatprep.subr.bf16.mxu0 %v6893_v10 }
 0xc4d   : > { %2972 = vmatpush1.bf16.msra.mxu0 %v6891_v11 }
 0xc4e   : > { %2973 = vmatprep.subr.bf16.mxu0 %v6897_v13 }
 0xc51   : > { %2974 = vmatpush1.bf16.msra.mxu0 %v6895_v15 }
 0xc52   : > { %2975 = vmatprep.subr.bf16.mxu0 %v6901_v17 }
 0xc55   : > { %2976 = vmatpush1.bf16.msra.mxu0 %v6899_v18 }
 0xc56   : > { %6506 = vmatprep.subr.bf16.mxu0 %v7510_v34 }
 0xcd0   : > { %v2756_v61 = vpop.xlane.xlu1 %2755 }
 0xcd1   : > { %v2757_v62 = vmul.f32 0.0078125, %v2756_v61 }
 0xcd3   : > { %v2758_v63 = vsub.f32 %v8333_v48, %v2757_v62 }
 0xcd5   : > { %v2759_v0 = vmul.f32 %v2758_v63, %v2758_v63 }
 0xcd7   : > { %v2760_v1 = vsel %vm1407_vm3, %v2759_v0, 0.0 }
 0xcd8   : > { %2761 = vadd.xlane.f32.xlu1 %v2760_v1 }
 0xd65   : > { %v2762_v21 = vpop.xlane.xlu1 %2761 }
 0xd66   : > { %v2763_v22 = vmul.f32 0.0078125, %v2762_v21 }
 0xd68   : > { %v2764_v23 = vadd.f32 1e-06, %v2763_v22 }
 0xd6a   : > { %7075 = vrsqrt.f32 %v2764_v23 }
 0xd74   : > { %v7076_v24 = vpop.eup %7075 }
 0xd75   : > { %v2766_v25 = vmul.f32 %v7076_v24, %v2758_v63 }
 0xd77   : > { %v2773_v27 = vmul.f32 %v5776_v8, %v2766_v25 }
 0xd79   : > { %v2780_v28 = vadd.f32 %v5777_v26, %v2773_v27 }
 0xd7b   : > { %v2781_v29 = vpack.c.bf16 %v2780_v28, %v2780_v28 }
 0xd7d   : > { %2994 = vmatmul.mubr.bf16.vlgmr.msra.gmra.mrb[32].mxu0 %v2781_v29  ;;  %6503 = vmatmul.mubr.bf16.vlgmr.msra.gmra.mrb[24].mxu1 %v2781_v29 }
 0xd7e   : > { %6508 = vmatprep.mubr.msk.bf16.mxu0 %vm7511_vm0, %v7510_v34  ;;  %6546 = vmatprep.mubr.msk.bf16.mxu1 %vm7511_vm0, %v7510_v34 }
 0xe50   : > { %v2995_v33 = vpop.f32.mrb[32].mxu0  ;;  %v3036_v36 = vpop.f32.mrb[24].mxu1 }
 0xe51   : > { %v2996_v37 = vadd.f32 %v2995_v33, %v2821_v31  ;;  %v2997_v39 = vpop.f32.mrb[33].mxu0  ;;  %v6504_v40 = vpop.f32.mrb[25].mxu1  ;;  %v3037_v50 = vadd.f32 %v3036_v36, %v2829_v38  ;;  %v6905_v33 = vld [vmem:[%s9039_s11 + $0x50] sm:$0xff]   ;;  %v6906_v36 = vld [vmem:[%s9039_s11 + $0x58] sm:$0xff]   ;;  %v6908_v38 = vld [vmem:[%s9039_s11 + $0x68] sm:$0xff]  }
 0xe52   : > { %v2998_v41 = vadd.f32 %v2997_v39, %v2825_v32  ;;  %v2999_v42 = vpop.f32.mrb[34].mxu0  ;;  %v3039_v43 = vpop.f32.mrb[26].mxu1  ;;  %v6903_v32 = vld [vmem:[%s9039_s11 + $0x40] sm:$0xff]   ;;  %v6909_v39 = vld [vmem:[%s9039_s11 + $0x70] sm:$0xff]   ;;  %v6910_v40 = vld [vmem:[%s9039_s11 + $0x78] sm:$0xff]  }
 0xe53   : > { %v3042_v44 = vpack.c.bf16 %v2996_v37, %v2996_v37  ;;  %v3000_v45 = vpop.f32.mrb[35].mxu0  ;;  %v6505_v46 = vpop.f32.mrb[27].mxu1  ;;  %v3102_v54 = vpack.c.bf16 %v3037_v50, %v3037_v50  ;;  %6531 = vmatpush3.bf16.msra.mxu1 %v6903_v32  ;;  %v6907_v37 = vld [vmem:[%s9039_s11 + $0x60] sm:$0xff]  }
 0xe54   : > { %v3043_v49 = vpack.c.bf16 %v2998_v41, %v2998_v41  ;;  %6532 = vmatprep.subr.bf16.mxu1 %v7510_v34  ;;  %v6955_v32 = vld [vmem:[%s8933_s14 + $0x1e4] ss:$16 sps:$4 sm:$0xff]  }
 0xe55   : > { %3150 = vrot.lane.b32.xlu0 %v3042_v44, %s7513_s30  ;;  %v3107_v57 = vand.u32 %v3102_v54, %v8058_v14 }
 0xe56   : > { %v3048_v51 = vsel %vm1697_vm4, %v3043_v49, 0 }
 0xe57   : > { %6507 = vmatpush3.bf16.xpose.msra.mxu0 %v3048_v51  ;;  %v5833_v51 = vld [vmem:[#allocation9 + $0x1] ss:$0 sm:$0xff] }
 0xe58   : > { %6512 = vmatprep.subr.bf16.mxu0 %v7510_v34 }
 0xe5e   : > { %6509 = vmatmul.mubr.msk.bf16.vlgmr.msra.gmra.mrb[36].mxu0 %vm1697_vm4, %v3042_v44 }
 0xe5f   : > { %6513 = vmatpush3.bf16.msra.mxu0 %v3107_v57  ;;  %6514 = vmatprep.mubr.msk.bf16.mxu0 %vm7511_vm0, %v7510_v34 }
 0xe60   : > { %6518 = vmatprep.subr.bf16.mxu0 %v7510_v34 }
 0xec7   : > { %v3151_v10 = vpop.permute.xlu0 %3150 }
 0xf31   : > { %v3084_v58 = vpop.f32.mrb[36].mxu0 }
 0xf32   : > { %v6510_v59 = vpop.f32.mrb[37].mxu0  ;;  %v3090_v60 = vsel %vm1744_vm7, %v3084_v58, -inf }
 0xf33   : > { %3091 = vmax.xlane.f32.xlu1 %v3090_v60  ;;  %v3087_v20 = vpop.f32.mrb[38].mxu0 }
 0xf34   : > { %v6511_v61 = vpop.f32.mrb[39].mxu0 }
 0xfc0   : > { %v3092_v62 = vpop.xlane.xlu1 %3091 }
 0xfc1   : > { %v3093_v63 = vsub.f32 %v3084_v58, %v3092_v62  ;;  %v6911_v62 = vld [vmem:[%s8933_s14 + $0x100] ss:$16 sps:$4 sm:$0xff]  }
 0xfc3   : > { %v3094_v0 = vmul.f32 1.442695, %v3093_v63  ;;  %v6913_v63 = vld [vmem:[%s8933_s14 + $0x104] ss:$16 sps:$4 sm:$0xff]  }
 0xfc5   : > { %7077 = vpow2.f32 %v3094_v0  ;;  %v6914_v0 = vld [vmem:[%s8933_s14 + $0x108] ss:$16 sps:$4 sm:$0xff]  }
 0xfcf   : > { %v7078_v1 = vpop.eup %7077 }
 0xfd0   : > { %v3096_v2 = vsel %vm1744_vm7, %v7078_v1, 0.0 }
 0xfd1   : > { %3097 = vadd.xlane.f32.xlu1 %v3096_v2  ;;  %v6922_v2 = vld [vmem:[%s8933_s14 + $0x12c] ss:$16 sps:$4 sm:$0xff]  }
 0xfe2   : > { %3153 = vrot.lane.b32.xlu1 %v3043_v49, %s7513_s30 }
0x105e   : > { %v3098_v3 = vpop.xlane.xlu1 %3097 }
0x105f   : > { %7079 = vrcp.f32 %v3098_v3  ;;  %v6917_v3 = vld [vmem:[%s8933_s14 + $0x120] ss:$16 sps:$4 sm:$0xff]  }
0x1062   : > { %v3154_v6 = vpop.permute.xlu1 %3153 }
0x1063   : > { %v3159_v9 = vsel %vm1697_vm4, %v3154_v6, 0  ;;  %v6928_v6 = vld [vmem:[%s8933_s14 + $0x14c] ss:$16 sps:$4 sm:$0xff]  }
0x1069   : > { %v7080_v4 = vpop.eup %7079 }
0x106a   : > { %v3100_v5 = vmul.f32 %v7080_v4, %v7078_v1  ;;  %v6919_v1 = vld [vmem:[%s8933_s14 + $0x124] ss:$16 sps:$4 sm:$0xff]   ;;  %v6920_v4 = vld [vmem:[%s8933_s14 + $0x128] ss:$16 sps:$4 sm:$0xff]  }
0x106c   : > { %v3101_v7 = vpack.c.bf16 %v3100_v5, %v3100_v5  ;;  %v6925_v5 = vld [vmem:[%s8933_s14 + $0x144] ss:$16 sps:$4 sm:$0xff]  }
0x106e   : > { %6515 = vmatmul.mubr.msk.bf16.vlgmr.msra.gmra.mrb[40].mxu0 %vm1758_vm8, %v3101_v7  ;;  %v6923_v7 = vld [vmem:[%s8933_s14 + $0x140] ss:$16 sps:$4 sm:$0xff]  }
0x106f   : > { %6519 = vmatpush3.bf16.xpose.msra.mxu0 %v3159_v9  ;;  %6520 = vmatprep.mubr.msk.bf16.mxu0 %vm7511_vm0, %v7510_v34  ;;  %v6926_v9 = vld [vmem:[%s8933_s14 + $0x148] ss:$16 sps:$4 sm:$0xff]  }
0x1070   : > { %6524 = vmatprep.subr.bf16.mxu0 %v7510_v34 }
0x1076   : > { %6521 = vmatmul.mubr.msk.bf16.vlgmr.msra.gmra.mrb[44].mxu0 %vm1697_vm4, %v3151_v10 }
0x1077   : > { %6526 = vmatprep.mubr.msk.bf16.mxu0 %vm7511_vm0, %v7510_v34 }
0x1141   : > { %v3143_v11 = vpop.f32.mrb[40].mxu0 }
0x1142   : > { %v6516_v12 = vpop.f32.mrb[41].mxu0 }
0x1143   : > { %v3146_v13 = vpop.f32.mrb[42].mxu0 }
0x1144   : > { %v6517_v15 = vpop.f32.mrb[43].mxu0 }
0x1149   : > { %v3195_v16 = vpop.f32.mrb[44].mxu0 }
0x114a   : > { %v6522_v17 = vpop.f32.mrb[45].mxu0  ;;  %v3201_v18 = vsel %vm1744_vm7, %v3195_v16, -inf }
0x114b   : > { %3202 = vmax.xlane.f32.xlu1 %v3201_v18  ;;  %v3198_v19 = vpop.f32.mrb[46].mxu0  ;;  %v6934_v17 = vld [vmem:[%s8933_s14 + $0x16c] ss:$16 sps:$4 sm:$0xff]   ;;  %v6929_v18 = vld [vmem:[%s8933_s14 + $0x160] ss:$16 sps:$4 sm:$0xff]  }
0x114c   : > { %v6523_v21 = vpop.f32.mrb[47].mxu0  ;;  %v6932_v19 = vld [vmem:[%s8933_s14 + $0x168] ss:$16 sps:$4 sm:$0xff]  }
0x114d   : > { %v6937_v21 = vld [vmem:[%s8933_s14 + $0x184] ss:$16 sps:$4 sm:$0xff]  }
0x115c   : > { %3214 = vrot.lane.b32.xlu1 %v3102_v54, %s7513_s30 }
0x11d8   : > { %v3203_v22 = vpop.xlane.xlu1 %3202 }
0x11d9   : > { %v3204_v23 = vsub.f32 %v3195_v16, %v3203_v22  ;;  %v6931_v16 = vld [vmem:[%s8933_s14 + $0x164] ss:$16 sps:$4 sm:$0xff]   ;;  %v6940_v22 = vld [vmem:[%s8933_s14 + $0x18c] ss:$16 sps:$4 sm:$0xff]  }
0x11db   : > { %v3205_v24 = vmul.f32 1.442695, %v3204_v23  ;;  %v6935_v23 = vld [vmem:[%s8933_s14 + $0x180] ss:$16 sps:$4 sm:$0xff]  }
0x11dc   : > { %v3215_v8 = vpop.permute.xlu1 %3214 }
0x11dd   : > { %7081 = vpow2.f32 %v3205_v24  ;;  %v3220_v25 = vand.u32 %v3215_v8, %v8058_v14  ;;  %v6904_v14 = vld [vmem:[%s9039_s11 + $0x48] sm:$0xff]   ;;  %v6943_v8 = vld [vmem:[%s8933_s14 + $0x1a4] ss:$16 sps:$4 sm:$0xff]  }
0x11de   : > { %6533 = vmatpush3.bf16.msra.mxu1 %v6904_v14  ;;  %v6938_v24 = vld [vmem:[%s8933_s14 + $0x188] ss:$16 sps:$4 sm:$0xff]   ;;  %v6958_v14 = vld [vmem:[%s8933_s14 + $0x1ec] ss:$16 sps:$4 sm:$0xff]  }
0x11df   : > { %6525 = vmatpush3.bf16.msra.mxu0 %v3220_v25  ;;  %6534 = vmatprep.subr.bf16.mxu1 %v7510_v34  ;;  %v6946_v25 = vld [vmem:[%s8933_s14 + $0x1ac] ss:$16 sps:$4 sm:$0xff]  }
0x11e0   : > { %3639 = vmatprep.subr.bf16.mxu0 %v6913_v63  ;;  %v6970_v63 = vld [vmem:[%s8935_s16 + $0x190] sm:$0xff]  }
0x11e2   : > { %6535 = vmatpush3.bf16.msra.mxu1 %v6905_v33  ;;  %v6953_v33 = vld [vmem:[%s8933_s14 + $0x1e0] ss:$16 sps:$4 sm:$0xff]  }
0x11e3   : > { %6536 = vmatprep.subr.bf16.mxu1 %v7510_v34 }
0x11e6   : > { %6537 = vmatpush3.bf16.msra.mxu1 %v6906_v36  ;;  %v6956_v36 = vld [vmem:[%s8933_s14 + $0x1e8] ss:$16 sps:$4 sm:$0xff]  }
0x11e7   : > { %v7082_v26 = vpop.eup %7081  ;;  %6538 = vmatprep.subr.bf16.mxu1 %v7510_v34 }
0x11e8   : > { %v3207_v27 = vsel %vm1744_vm7, %v7082_v26, 0.0 }
0x11e9   : > { %3208 = vadd.xlane.f32.xlu0 %v3207_v27  ;;  %v6944_v27 = vld [vmem:[%s8933_s14 + $0x1a8] ss:$16 sps:$4 sm:$0xff]  }
0x11ea   : > { %6539 = vmatpush3.bf16.msra.mxu1 %v6907_v37  ;;  %v6959_v37 = vld [vmem:[%s8935_s16 + $0x140] sm:$0xff]  }
0x11eb   : > { %6540 = vmatprep.subr.bf16.mxu1 %v7510_v34 }
0x11ee   : > { %6541 = vmatpush3.bf16.msra.mxu1 %v6908_v38  ;;  %v6960_v38 = vld [vmem:[%s8935_s16 + $0x1c0] sm:$0xff]  }
0x11ef   : > { %6542 = vmatprep.subr.bf16.mxu1 %v7510_v34 }
0x11f2   : > { %6543 = vmatpush3.bf16.msra.mxu1 %v6909_v39 }
0x11f3   : > { %6544 = vmatprep.subr.bf16.mxu1 %v7510_v34  ;;  %v5824_v34 = vld [vmem:[%s9040_s23 + $0x1] ss:$0 sm:$0xff] }
0x11f6   : > { %6545 = vmatpush3.bf16.msra.mxu1 %v6910_v40 }
0x1276   : > { %v3209_v28 = vpop.xlane.xlu0 %3208 }
0x1277   : > { %7083 = vrcp.f32 %v3209_v28  ;;  %v6949_v28 = vld [vmem:[%s8933_s14 + $0x1c4] ss:$16 sps:$4 sm:$0xff]  }
0x1281   : > { %v7084_v29 = vpop.eup %7083 }
0x1282   : > { %v3211_v30 = vmul.f32 %v7084_v29, %v7082_v26  ;;  %v6941_v26 = vld [vmem:[%s8933_s14 + $0x1a0] ss:$16 sps:$4 sm:$0xff]   ;;  %v6952_v29 = vld [vmem:[%s8933_s14 + $0x1cc] ss:$16 sps:$4 sm:$0xff]  }
0x1284   : > { %v3212_v31 = vpack.c.bf16 %v3211_v30, %v3211_v30  ;;  %v6947_v30 = vld [vmem:[%s8933_s14 + $0x1c0] ss:$16 sps:$4 sm:$0xff]  }
0x1286   : > { %6527 = vmatmul.mubr.msk.bf16.vlgmr.msra.gmra.mrb[48].mxu0 %vm1758_vm8, %v3212_v31  ;;  %v6950_v31 = vld [vmem:[%s8933_s14 + $0x1c8] ss:$16 sps:$4 sm:$0xff]  }
0x1287   : > { %3671 = vmatprep.mubr.bf16.mxu0 %v7512_v35  ;;  %3640 = vmatpush1.bf16.msra.mxu0 %v6911_v62  ;;  %v6969_v62 = vld [vmem:[%s8935_s16 + $0x110] sm:$0xff]  }
0x1288   : > { %3641 = vmatprep.subr.bf16.mxu0 %v6919_v1  ;;  %v6973_v1 = vld [vmem:[%s8935_s16 + $0x118] sm:$0xff]  }
0x128b   : > { %3642 = vmatpush1.bf16.msra.mxu0 %v6917_v3  ;;  %v6975_v3 = vld [vmem:[%s8935_s16 + $0x160] sm:$0xff]  }
0x128c   : > { %3643 = vmatprep.subr.bf16.mxu0 %v6925_v5  ;;  %v6977_v5 = vld [vmem:[%s8935_s16 + $0x120] sm:$0xff]  }
0x128f   : > { %3644 = vmatpush1.bf16.msra.mxu0 %v6923_v7  ;;  %v6979_v7 = vld [vmem:[%s8935_s16 + $0x168] sm:$0xff]  }
0x1290   : > { %3645 = vmatprep.subr.bf16.mxu0 %v6931_v16  ;;  %v6986_v16 = vld [vmem:[%s8935_s16 + $0x1b0] sm:$0xff]  }
0x1293   : > { %3646 = vmatpush1.bf16.msra.mxu0 %v6929_v18  ;;  %v6988_v18 = vld [vmem:[%s8935_s16 + $0x1f8] sm:$0xff]  }
0x1294   : > { %3647 = vmatprep.subr.bf16.mxu0 %v6937_v21  ;;  %v6990_v21 = vld [vmem:[%s8935_s16 + $0x1b8] sm:$0xff]  }
0x1297   : > { %3648 = vmatpush1.bf16.msra.mxu0 %v6935_v23 }
0x1298   : > { %3649 = vmatprep.subr.bf16.mxu0 %v6943_v8 }
0x129b   : > { %3650 = vmatpush1.bf16.msra.mxu0 %v6941_v26 }
0x129c   : > { %3651 = vmatprep.subr.bf16.mxu0 %v6949_v28 }
0x129f   : > { %3652 = vmatpush1.bf16.msra.mxu0 %v6947_v30 }
0x12a0   : > { %3653 = vmatprep.subr.bf16.mxu0 %v6955_v32 }
0x12a3   : > { %3654 = vmatpush1.bf16.msra.mxu0 %v6953_v33 }
0x12a4   : > { %6276 = vmatprep.subr.bf16.mxu0 %v6959_v37 }
0x1359   : > { %v3256_v41 = vpop.f32.mrb[48].mxu0 }
0x135a   : > { %3263 = vrot.lane.b32.xlu0 %v3256_v41, %s7513_s30  ;;  %v6528_v42 = vpop.f32.mrb[49].mxu0  ;;  %s937_s30 = sand.u32 1, %s7483_s3  }
0x135b   : > { %v3259_v43 = vpop.f32.mrb[50].mxu0  ;;  %s5401_s6 = scalar_lea.sflag [#allocation5], %s937_s30 }
0x135c   : > { %v6529_v44 = vpop.f32.mrb[51].mxu0  ;;  %v5834_v43 = vld [vmem:[#allocation11 + $0x1] ss:$0 sm:$0xff] }
0x13cc   : > { %v3264_v45 = vpop.permute.xlu0 %3263 }
0x13cd   : > { %v3266_v46 = vsel %vm1697_vm4, %v3143_v11, %v3264_v45  ;;  %v5835_v45 = vld [vmem:[#allocation12 + $0x1] ss:$0 sm:$0xff] }
0x13ce   : > { %v3267_v49 = vpack.c.bf16 %v3266_v46, %v3266_v46 }
0x13d0   : > { %6547 = vmatmul.mubr.bf16.vlgmr.msra.gmra.mrb[28].mxu1 %v3267_v49 }
0x13d1   : > { %3712 = vmatprep.mubr.bf16.mxu1 %v7512_v35 }
0x14a3   : > { %v3375_v50 = vpop.f32.mrb[28].mxu1 }
0x14a4   : > { %v3376_v54 = vadd.f32 %v5824_v34, %v3375_v50  ;;  %v6548_v57 = vpop.f32.mrb[29].mxu1  ;;  %v6961_v34 = vld [vmem:[%s8935_s16 + $0x100] sm:$0xff]  }
0x14a5   : > { %v3378_v58 = vpop.f32.mrb[30].mxu1  ;;  %v6962_v50 = vld [vmem:[%s8935_s16 + $0x180] sm:$0xff]   ;;  %v6964_v57 = vld [vmem:[%s8935_s16 + $0x1c8] sm:$0xff]  }
0x14a6   : > { %v3389_v59 = vmul.f32 %v5833_v51, %v3376_v54  ;;  %v6549_v60 = vpop.f32.mrb[31].mxu1  ;;  %v6963_v54 = vld [vmem:[%s8935_s16 + $0x148] sm:$0xff]  }
0x14a7   : > { %v6965_v58 = vld [vmem:[%s8935_s16 + $0x108] sm:$0xff]   ;;  %v6967_v60 = vld [vmem:[%s8935_s16 + $0x150] sm:$0xff]  }
0x14a8   : > { %v8427_v20 = vadd.f32 %v3389_v59, %v8333_v48  ;;  %v6916_v48 = vld [vmem:[%s8933_s14 + $0x10c] ss:$16 sps:$4 sm:$0xff]  }
0x14a9   : > { %3680 = vmatprep.subr.bf16.mxu1 %v6916_v48  ;;  %v6966_v59 = vld [vmem:[%s8935_s16 + $0x188] sm:$0xff]   ;;  %v6972_v48 = vld [vmem:[%s8935_s16 + $0x1d8] sm:$0xff]  }
0x14aa   : > { %v3395_v61 = vsel %vm1407_vm3, %v8427_v20, 0.0  ;;  %3681 = vmatpush1.bf16.msra.mxu1 %v6914_v0  ;;  %v6971_v0 = vld [vmem:[%s8935_s16 + $0x158] sm:$0xff]  }
0x14ab   : > { %3396 = vadd.xlane.f32.xlu1 %v3395_v61  ;;  %3682 = vmatprep.subr.bf16.mxu1 %v6922_v2  ;;  %v6968_v61 = vld [vmem:[%s8935_s16 + $0x1d0] sm:$0xff]   ;;  %v6974_v2 = vld [vmem:[%s8935_s16 + $0x198] sm:$0xff]  }
0x14ae   : > { %3683 = vmatpush1.bf16.msra.mxu1 %v6920_v4  ;;  %v6976_v4 = vld [vmem:[%s8935_s16 + $0x1e0] sm:$0xff]  }
0x14af   : > { %3684 = vmatprep.subr.bf16.mxu1 %v6928_v6  ;;  %v6978_v6 = vld [vmem:[%s8935_s16 + $0x1a0] sm:$0xff]  }
0x14b2   : > { %3685 = vmatpush1.bf16.msra.mxu1 %v6926_v9  ;;  %v6980_v9 = vld [vmem:[%s8935_s16 + $0x1e8] sm:$0xff]  }
0x14b3   : > { %3686 = vmatprep.subr.bf16.mxu1 %v6934_v17  ;;  %v6987_v17 = vld [vmem:[%s8935_s16 + $0x178] sm:$0xff]  }
0x14b6   : > { %3687 = vmatpush1.bf16.msra.mxu1 %v6932_v19  ;;  %v6989_v19 = vld [vmem:[%s8935_s16 + $0x138] sm:$0xff]  }
0x14b7   : > { %3688 = vmatprep.subr.bf16.mxu1 %v6940_v22  ;;  %v3457_v22 = vld [vmem:[#allocation14 + $0x4] sm:$0xf] }
0x14b8   : > { %v3462_v23 = vrot.slane %v3457_v22, %v8047_v55  ;;  %v3466_v8 = vrot.slane %v3457_v22, %v8041_v53 }
0x14ba   : > { %3689 = vmatpush1.bf16.msra.mxu1 %v6938_v24  ;;  %v3470_v24 = vrot.slane %v3457_v22, %v8050_v56 }
0x14bb   : > { %3690 = vmatprep.subr.bf16.mxu1 %v6946_v25  ;;  %v3474_v25 = vrot.slane %v3457_v22, %v8320_v47 }
0x14be   : > { %3691 = vmatpush1.bf16.msra.mxu1 %v6944_v27 }
0x14bf   : > { %3692 = vmatprep.subr.bf16.mxu1 %v6952_v29 }
0x14c2   : > { %3693 = vmatpush1.bf16.msra.mxu1 %v6950_v31 }
0x14c3   : > { %3694 = vmatprep.subr.bf16.mxu1 %v6958_v14 }
0x14c6   : > { %3695 = vmatpush1.bf16.msra.mxu1 %v6956_v36 }
0x14c7   : > { %6298 = vmatprep.subr.bf16.mxu1 %v6960_v38 }
0x1538   : > { %v3397_v10 = vpop.xlane.xlu1 %3396 }
0x1539   : > { %v3398_v11 = vmul.f32 0.0078125, %v3397_v10  ;;  %v6981_v10 = vld [vmem:[%s8935_s16 + $0x128] sm:$0xff]  }
0x153b   : > { %v3399_v12 = vsub.f32 %v8427_v20, %v3398_v11  ;;  %v6982_v11 = vld [vmem:[%s8935_s16 + $0x1a8] sm:$0xff]  }
0x153d   : > { %v3400_v13 = vmul.f32 %v3399_v12, %v3399_v12 }
0x153f   : > { %v3401_v15 = vsel %vm1407_vm3, %v3400_v13, 0.0  ;;  %v6984_v13 = vld [vmem:[%s8935_s16 + $0x1f0] sm:$0xff]  }
0x1540   : > { %3402 = vadd.xlane.f32.xlu0 %v3401_v15  ;;  %v6985_v15 = vld [vmem:[%s8935_s16 + $0x130] sm:$0xff]  }
0x15cd   : > { %v3403_v39 = vpop.xlane.xlu0 %3402 }
0x15ce   : > { %v3404_v40 = vmul.f32 0.0078125, %v3403_v39 }
0x15d0   : > { %v3405_v41 = vadd.f32 1e-06, %v3404_v40 }
0x15d2   : > { %7085 = vrsqrt.f32 %v3405_v41 }
0x15dc   : > { %v7086_v42 = vpop.eup %7085 }
0x15dd   : > { %v3407_v44 = vmul.f32 %v7086_v42, %v3399_v12  ;;  %v6983_v12 = vld [vmem:[%s8935_s16 + $0x170] sm:$0xff]  }
0x15df   : > { %v3414_v46 = vmul.f32 %v5834_v43, %v3407_v44 }
0x15e1   : > { %v3421_v49 = vadd.f32 %v5835_v45, %v3414_v46 }
0x15e3   : > { %v3422_v51 = vpack.c.bf16 %v3421_v49, %v3421_v49 }
0x15e5   : > { %3672 = vmatmul.mubr.bf16.vlgmr.msra.gmra.mrb[52].mxu0 %v3422_v51  ;;  %3713 = vmatmul.mubr.bf16.vlgmr.msra.gmra.mrb[32].mxu1 %v3422_v51 }
0x15e6   : > { %6277 = vmatpush3.bf16.msra.mxu0 %v6961_v34  ;;  %6299 = vmatpush3.bf16.msra.mxu1 %v6962_v50 }
0x15e7   : > { %6278 = vmatprep.subr.bf16.mxu0 %v6963_v54  ;;  %6300 = vmatprep.subr.bf16.mxu1 %v6964_v57 }
0x15ea   : > { %6279 = vmatpush3.bf16.msra.mxu0 %v6965_v58  ;;  %6301 = vmatpush3.bf16.msra.mxu1 %v6966_v59 }
0x15eb   : > { %6280 = vmatprep.subr.bf16.mxu0 %v6967_v60  ;;  %6302 = vmatprep.subr.bf16.mxu1 %v6968_v61 }
0x15ee   : > { %6281 = vmatpush3.bf16.msra.mxu0 %v6969_v62  ;;  %6303 = vmatpush3.bf16.msra.mxu1 %v6970_v63 }
0x15ef   : > { %6282 = vmatprep.subr.bf16.mxu0 %v6971_v0  ;;  %6304 = vmatprep.subr.bf16.mxu1 %v6972_v48 }
0x15f2   : > { %6283 = vmatpush3.bf16.msra.mxu0 %v6973_v1  ;;  %6305 = vmatpush3.bf16.msra.mxu1 %v6974_v2 }
0x15f3   : > { %6284 = vmatprep.subr.bf16.mxu0 %v6975_v3  ;;  %6306 = vmatprep.subr.bf16.mxu1 %v6976_v4 }
0x15f6   : > { %6285 = vmatpush3.bf16.msra.mxu0 %v6977_v5  ;;  %6307 = vmatpush3.bf16.msra.mxu1 %v6978_v6  ;;  %v5964_v5 = vld [vmem:[#allocation15 + $0x1] ss:$0 sm:$0xff] }
0x15f7   : > { %6286 = vmatprep.subr.bf16.mxu0 %v6979_v7  ;;  %6308 = vmatprep.subr.bf16.mxu1 %v6980_v9 }
0x15fa   : > { %6287 = vmatpush3.bf16.msra.mxu0 %v6981_v10  ;;  %6309 = vmatpush3.bf16.msra.mxu1 %v6982_v11 }
0x15fb   : > { %6288 = vmatprep.subr.bf16.mxu0 %v6983_v12  ;;  %6310 = vmatprep.subr.bf16.mxu1 %v6984_v13 }
0x15fe   : > { %6289 = vmatpush3.bf16.msra.mxu0 %v6985_v15  ;;  %6311 = vmatpush3.bf16.msra.mxu1 %v6986_v16 }
0x15ff   : > { %6290 = vmatprep.subr.bf16.mxu0 %v6987_v17  ;;  %6312 = vmatprep.subr.bf16.mxu1 %v6988_v18  ;;  %v5998_v17 = vld [vmem:[%s8937_s18 + $0x1] ss:$0 sm:$0xff] }
0x1602   : > { %6291 = vmatpush3.bf16.msra.mxu0 %v6989_v19  ;;  %6313 = vmatpush3.bf16.msra.mxu1 %v6990_v21 }
0x16b8   : > { %v3673_v26 = vpop.f32.mrb[52].mxu0  ;;  %v3714_v27 = vpop.f32.mrb[32].mxu1 }
0x16b9   : > { %v3674_v28 = vadd.f32 %v3673_v26, %v3462_v23  ;;  %v3715_v29 = vadd.f32 %v3714_v27, %v3470_v24  ;;  %v3675_v30 = vpop.f32.mrb[53].mxu0  ;;  %v3716_v31 = vpop.f32.mrb[33].mxu1  ;;  %v4120_v23 = vld [vmem:[%s8940_s21] sm:$0xff] }
0x16ba   : > { %v3676_v32 = vadd.f32 %v3675_v30, %v3466_v8  ;;  %v3717_v14 = vadd.f32 %v3716_v31, %v3474_v25  ;;  %v3677_v33 = vpop.f32.mrb[54].mxu0  ;;  %v3718_v36 = vpop.f32.mrb[34].mxu1  ;;  %v4124_v24 = vld [vmem:[%s8940_s21 + $0x20] sm:$0xff]  ;;  %v4121_v8 = vld [vmem:[%s8940_s21 + $0x8] sm:$0xff] }
0x16bb   : > { %v3725_v37 = vmul.f32 0.70710677, %v3674_v28  ;;  %v3727_v38 = vmul.f32 0.70710677, %v3715_v29  ;;  %v3678_v41 = vpop.f32.mrb[55].mxu0  ;;  %v3719_v42 = vpop.f32.mrb[35].mxu1  ;;  %v5999_v25 = vcombine.low %v4120_v23, %v4124_v24  ;;  %v6000_v26 = vcombine.high %v4120_v23, %v4124_v24 }
0x16bc   : > { %v3726_v39 = vmul.f32 0.70710677, %v3676_v32  ;;  %v3728_v40 = vmul.f32 0.70710677, %v3717_v14  ;;  %v3721_v49 = vmul.f32 0.5, %v3674_v28  ;;  %v3723_v51 = vmul.f32 0.5, %v3715_v29 }
0x16bd   : > { %7087 = verf.f32 %v3725_v37  ;;  %v3722_v54 = vmul.f32 0.5, %v3676_v32  ;;  %v3724_v59 = vmul.f32 0.5, %v3717_v14  ;;  %v4128_v27 = vld [vmem:[%s8940_s21 + $0x40] sm:$0xff]  ;;  %v4129_v32 = vld [vmem:[%s8940_s21 + $0x48] sm:$0xff]  ;;  %4546 = vmatprep.subr.bf16.mxu0 %v6000_v26 }
0x16be   : > { %7089 = verf.f32 %v3727_v38  ;;  %v4132_v28 = vld [vmem:[%s8940_s21 + $0x60] sm:$0xff]  ;;  %v4133_v14 = vld [vmem:[%s8940_s21 + $0x68] sm:$0xff] }
0x16bf   : > { %7091 = verf.f32 %v3726_v39  ;;  %v6008_v31 = vcombine.high %v4128_v27, %v4132_v28  ;;  %v4136_v33 = vld [vmem:[%s8940_s21 + $0x80] sm:$0xff]  ;;  %v6010_v36 = vcombine.high %v4129_v32, %v4133_v14  ;;  %v4137_v38 = vld [vmem:[%s8940_s21 + $0x88] sm:$0xff]  ;;  %v6009_v41 = vcombine.low %v4129_v32, %v4133_v14 }
0x16c0   : > { %7093 = verf.f32 %v3728_v40  ;;  %v4140_v37 = vld [vmem:[%s8940_s21 + $0xa0] sm:$0xff]  ;;  %v4141_v39 = vld [vmem:[%s8940_s21 + $0xa8] sm:$0xff]  ;;  %v6007_v40 = vcombine.low %v4128_v27, %v4132_v28 }
0x16c1   : > { %v6016_v42 = vcombine.high %v4136_v33, %v4140_v37  ;;  %v4180_v26 = vld [vmem:[%s8940_s21 + $0x1e0] sm:$0xff] }
0x16c7   : > { %v7088_v43 = vpop.eup %7087 }
0x16c8   : > { %v7090_v44 = vpop.eup %7089  ;;  %v3733_v45 = vadd.f32 1.0, %v7088_v43  ;;  %v6018_v43 = vcombine.high %v4137_v38, %v4141_v39 }
0x16c9   : > { %v7092_v46 = vpop.eup %7091  ;;  %v3735_v34 = vadd.f32 1.0, %v7090_v44  ;;  %v6015_v44 = vcombine.low %v4136_v33, %v4140_v37  ;;  %v4123_v37 = vld [vmem:[%s8940_s21 + $0x18] sm:$0xff] }
0x16ca   : > { %v7094_v50 = vpop.eup %7093  ;;  %v3734_v57 = vadd.f32 1.0, %v7092_v46  ;;  %v3737_v58 = vmul.f32 %v3733_v45, %v3721_v49  ;;  %v6017_v45 = vcombine.low %v4137_v38, %v4141_v39  ;;  %v4127_v38 = vld [vmem:[%s8940_s21 + $0x38] sm:$0xff] }
0x16cb   : > { %v3736_v60 = vadd.f32 1.0, %v7094_v50  ;;  %v3739_v61 = vmul.f32 %v3735_v34, %v3723_v51  ;;  %v6005_v39 = vcombine.low %v4123_v37, %v4127_v38 }
0x16cc   : > { %v3738_v62 = vmul.f32 %v3734_v57, %v3722_v54  ;;  %v3741_v48 = vpack.c.bf16 %v3737_v58, %v3737_v58  ;;  %v4144_v54 = vld [vmem:[%s8940_s21 + $0xc0] sm:$0xff]  ;;  %v4145_v58 = vld [vmem:[%s8940_s21 + $0xc8] sm:$0xff] }
0x16cd   : > { %v3740_v63 = vmul.f32 %v3736_v60, %v3724_v59  ;;  %v3743_v2 = vpack.c.bf16 %v3739_v61, %v3739_v61  ;;  %v4148_v57 = vld [vmem:[%s8940_s21 + $0xe0] sm:$0xff]  ;;  %v4149_v60 = vld [vmem:[%s8940_s21 + $0xe8] sm:$0xff] }
0x16ce   : > { %v3742_v0 = vpack.c.bf16 %v3738_v62, %v3738_v62  ;;  %v6024_v59 = vcombine.high %v4144_v54, %v4148_v57  ;;  %v6023_v61 = vcombine.low %v4144_v54, %v4148_v57  ;;  %v6025_v62 = vcombine.low %v4145_v58, %v4149_v60  ;;  %v4134_v54 = vld [vmem:[%s8940_s21 + $0x70] sm:$0xff]  ;;  %v4131_v57 = vld [vmem:[%s8940_s21 + $0x58] sm:$0xff] }
0x16cf   : > { %v3744_v1 = vpack.c.bf16 %v3740_v63, %v3740_v63  ;;  %v6026_v63 = vcombine.high %v4145_v58, %v4149_v60 }
0x16d0   : > { %4042 = vmatprep.mubr.bf16.mxu0 %v3742_v0  ;;  %v4152_v0 = vld [vmem:[%s8940_s21 + $0x100] sm:$0xff] }
0x16d1   : > { %4082 = vmatprep.mubr.bf16.mxu1 %v3744_v1  ;;  %4043 = vmatmul.mubr.bf16.vlgmr.msra.gmra.mrb[56].mxu0 %v3741_v48  ;;  %v4156_v48 = vld [vmem:[%s8940_s21 + $0x120] sm:$0xff]  ;;  %v4153_v1 = vld [vmem:[%s8940_s21 + $0x108] sm:$0xff] }
0x16d2   : > { %4083 = vmatmul.mubr.bf16.vlgmr.msra.gmra.mrb[36].mxu1 %v3743_v2  ;;  %4578 = vmatprep.mubr.bf16.mxu0 %v7512_v35  ;;  %v6032_v2 = vcombine.high %v4152_v0, %v4156_v48 }
0x16d3   : > { %4619 = vmatprep.mubr.bf16.mxu1 %v7512_v35  ;;  %4547 = vmatpush1.bf16.msra.mxu0 %v5999_v25  ;;  %v4176_v25 = vld [vmem:[%s8940_s21 + $0x1c0] sm:$0xff] }
0x16d4   : > { %4548 = vmatprep.subr.bf16.mxu0 %v6008_v31  ;;  %v6055_v27 = vcombine.low %v4176_v25, %v4180_v26  ;;  %v6056_v28 = vcombine.high %v4176_v25, %v4180_v26  ;;  %v4126_v31 = vld [vmem:[%s8940_s21 + $0x30] sm:$0xff]  ;;  %v4167_v25 = vld [vmem:[%s8940_s21 + $0x178] sm:$0xff] }
0x16d7   : > { %4549 = vmatpush1.bf16.msra.mxu0 %v6007_v40  ;;  %v6006_v40 = vcombine.high %v4123_v37, %v4127_v38  ;;  %v4178_v38 = vld [vmem:[%s8940_s21 + $0x1d0] sm:$0xff] }
0x16d8   : > { %4550 = vmatprep.subr.bf16.mxu0 %v6016_v42 }
0x16db   : > { %4551 = vmatpush1.bf16.msra.mxu0 %v6015_v44 }
0x16dc   : > { %4552 = vmatprep.subr.bf16.mxu0 %v6024_v59 }
0x16df   : > { %4553 = vmatpush1.bf16.msra.mxu0 %v6023_v61 }
0x16e0   : > { %4554 = vmatprep.subr.bf16.mxu0 %v6032_v2 }
0x17a4   : > { %v6292_v3 = vpop.f32.mrb[56].mxu0 }
0x17a5   : > { %v6314_v4 = vpop.f32.mrb[36].mxu1  ;;  %v6293_v6 = vpop.f32.mrb[57].mxu0 }
0x17a6   : > { %v6294_v7 = vadd.f32 %v6293_v6, %v6292_v3  ;;  %v6315_v9 = vpop.f32.mrb[37].mxu1  ;;  %v6295_v10 = vpop.f32.mrb[58].mxu0  ;;  %v4157_v3 = vld [vmem:[%s8940_s21 + $0x128] sm:$0xff] }
0x17a7   : > { %v6316_v11 = vadd.f32 %v6315_v9, %v6314_v4  ;;  %v6317_v12 = vpop.f32.mrb[38].mxu1  ;;  %v6296_v13 = vpop.f32.mrb[59].mxu0  ;;  %v6031_v4 = vcombine.low %v4152_v0, %v4156_v48  ;;  %v6034_v6 = vcombine.high %v4153_v1, %v4157_v3  ;;  %v4164_v9 = vld [vmem:[%s8940_s21 + $0x160] sm:$0xff]  ;;  %v4161_v10 = vld [vmem:[%s8940_s21 + $0x148] sm:$0xff]  ;;  %v4139_v0 = vld [vmem:[%s8940_s21 + $0x98] sm:$0xff] }
0x17a8   : > { %v4045_v15 = vadd.f32 %v6294_v7, %v5964_v5  ;;  %v6318_v16 = vpop.f32.mrb[39].mxu1  ;;  %v6033_v5 = vcombine.low %v4153_v1, %v4157_v3  ;;  %v4160_v7 = vld [vmem:[%s8940_s21 + $0x140] sm:$0xff]  ;;  %v4165_v12 = vld [vmem:[%s8940_s21 + $0x168] sm:$0xff]  ;;  %v4143_v48 = vld [vmem:[%s8940_s21 + $0xb8] sm:$0xff] }
0x17a9   : > { %4555 = vmatpush1.bf16.msra.mxu0 %v6031_v4  ;;  %v6039_v13 = vcombine.low %v4160_v7, %v4164_v9  ;;  %v6042_v16 = vcombine.high %v4161_v10, %v4165_v12  ;;  %v6022_v4 = vcombine.high %v4139_v0, %v4143_v48 }
0x17aa   : > { %v4085_v18 = vadd.f32 %v6316_v11, %v4045_v15  ;;  %v6040_v11 = vcombine.high %v4160_v7, %v4164_v9  ;;  %v6041_v15 = vcombine.low %v4161_v10, %v4165_v12  ;;  %v4147_v7 = vld [vmem:[%s8940_s21 + $0xd8] sm:$0xff] }
0x17ab   : > { %v4151_v9 = vld [vmem:[%s8940_s21 + $0xf8] sm:$0xff] }
0x17ac   : > { %v4098_v19 = vmul.f32 %v5998_v17, %v4085_v18  ;;  %4556 = vmatprep.subr.bf16.mxu0 %v6040_v11  ;;  %v4168_v17 = vld [vmem:[%s8940_s21 + $0x180] sm:$0xff]  ;;  %v6021_v11 = vcombine.low %v4139_v0, %v4143_v48  ;;  %v7001_v0 = vld [vmem:[#allocation18 + $0x10] sm:$0xff]  }
0x17ad   : > { %4557 = vmatpush1.bf16.msra.mxu0 %v6039_v13  ;;  %v4172_v18 = vld [vmem:[%s8940_s21 + $0x1a0] sm:$0xff]  ;;  %v6030_v13 = vcombine.high %v4147_v7, %v4151_v9  ;;  %v7002_v48 = vld [vmem:[#allocation18 + $0x90] sm:$0xff]  }
0x17ae   : > { %v4099_v21 = vadd.f32 %v4098_v19, %v8427_v20  ;;  %v4125_v20 = vld [vmem:[%s8940_s21 + $0x28] sm:$0xff]  ;;  %v6047_v23 = vcombine.low %v4168_v17, %v4172_v18 }
0x17af   : > { %v6001_v29 = vcombine.low %v4121_v8, %v4125_v20  ;;  %v6002_v30 = vcombine.high %v4121_v8, %v4125_v20  ;;  %v4169_v19 = vld [vmem:[%s8940_s21 + $0x188] sm:$0xff] }
0x17b0   : > { %v4103_v22 = vsel %vm4102_vm9, %v4099_v21, 0.0  ;;  %v4177_v20 = vld [vmem:[%s8940_s21 + $0x1c8] sm:$0xff] }
0x17b1   : > { %4104 = vadd.xlane.f32.xlu1 %v4103_v22  ;;  %4587 = vmatprep.subr.bf16.mxu1 %v6002_v30  ;;  %v4173_v22 = vld [vmem:[%s8940_s21 + $0x1a8] sm:$0xff]  ;;  %v4122_v30 = vld [vmem:[%s8940_s21 + $0x10] sm:$0xff] }
0x17b2   : > { %4588 = vmatpush1.bf16.msra.mxu1 %v6001_v29  ;;  %v6049_v24 = vcombine.low %v4169_v19, %v4173_v22  ;;  %v6050_v8 = vcombine.high %v4169_v19, %v4173_v22  ;;  %v4181_v29 = vld [vmem:[%s8940_s21 + $0x1e8] sm:$0xff]  ;;  %v6003_v33 = vcombine.low %v4122_v30, %v4126_v31  ;;  %v6029_v19 = vcombine.low %v4147_v7, %v4151_v9  ;;  %v7010_v7 = vld [vmem:[#allocation18 + $0xa0] sm:$0xff]  }
0x17b3   : > { %4589 = vmatprep.subr.bf16.mxu1 %v6010_v36  ;;  %v6057_v32 = vcombine.low %v4177_v20, %v4181_v29  ;;  %v6058_v14 = vcombine.high %v4177_v20, %v4181_v29  ;;  %v6004_v36 = vcombine.high %v4122_v30, %v4126_v31  ;;  %v4170_v29 = vld [vmem:[%s8940_s21 + $0x190] sm:$0xff]  ;;  %v4171_v31 = vld [vmem:[%s8940_s21 + $0x198] sm:$0xff]  ;;  %v7011_v9 = vld [vmem:[#allocation18 + $0x68] sm:$0xff]  }
0x17b4   : > { %v4174_v30 = vld [vmem:[%s8940_s21 + $0x1b0] sm:$0xff] }
0x17b6   : > { %4590 = vmatpush1.bf16.msra.mxu1 %v6009_v41 }
0x17b7   : > { %4591 = vmatprep.subr.bf16.mxu1 %v6018_v43 }
0x17ba   : > { %4592 = vmatpush1.bf16.msra.mxu1 %v6017_v45  ;;  %v4100_v45 = vld [vmem:[%s8938_s19] sm:$0x1] }
0x17bb   : > { %4593 = vmatprep.subr.bf16.mxu1 %v6026_v63  ;;  %v4142_v63 = vld [vmem:[%s8940_s21 + $0xb0] sm:$0xff] }
0x17be   : > { %4594 = vmatpush1.bf16.msra.mxu1 %v6025_v62  ;;  %v4138_v62 = vld [vmem:[%s8940_s21 + $0x90] sm:$0xff] }
0x17bf   : > { %4595 = vmatprep.subr.bf16.mxu1 %v6034_v6  ;;  %v6020_v3 = vcombine.high %v4138_v62, %v4142_v63  ;;  %v4150_v6 = vld [vmem:[%s8940_s21 + $0xf0] sm:$0xff]  ;;  %v6019_v10 = vcombine.low %v4138_v62, %v4142_v63 }
0x17c0   : > { %v6999_v62 = vld [vmem:[#allocation18 + $0x50] sm:$0xff]  }
0x17c1   : > { %v7000_v63 = vld [vmem:[#allocation18 + $0xd0] sm:$0xff]  }
0x17c2   : > { %4596 = vmatpush1.bf16.msra.mxu1 %v6033_v5  ;;  %v4146_v5 = vld [vmem:[%s8940_s21 + $0xd0] sm:$0xff] }
0x17c3   : > { %4597 = vmatprep.subr.bf16.mxu1 %v6042_v16  ;;  %v6028_v12 = vcombine.high %v4146_v5, %v4150_v6  ;;  %v4158_v16 = vld [vmem:[%s8940_s21 + $0x130] sm:$0xff] }
0x17c6   : > { %4598 = vmatpush1.bf16.msra.mxu1 %v6041_v15  ;;  %v4154_v15 = vld [vmem:[%s8940_s21 + $0x110] sm:$0xff] }
0x17c7   : > { %4599 = vmatprep.subr.bf16.mxu1 %v6050_v8  ;;  %v4163_v8 = vld [vmem:[%s8940_s21 + $0x158] sm:$0xff]  ;;  %v6035_v26 = vcombine.low %v4154_v15, %v4158_v16 }
0x17ca   : > { %4600 = vmatpush1.bf16.msra.mxu1 %v6049_v24  ;;  %v4166_v24 = vld [vmem:[%s8940_s21 + $0x170] sm:$0xff] }
0x17cb   : > { %4601 = vmatprep.subr.bf16.mxu1 %v6058_v14 }
0x17ce   : > { %4602 = vmatpush1.bf16.msra.mxu1 %v6057_v32  ;;  %v4175_v32 = vld [vmem:[%s8940_s21 + $0x1b8] sm:$0xff] }
0x17cf   : > { %4669 = vmatprep.subr.bf16.mxu1 %v6006_v40  ;;  %v6054_v37 = vcombine.high %v4171_v31, %v4175_v32  ;;  %v4179_v40 = vld [vmem:[%s8940_s21 + $0x1d8] sm:$0xff] }
0x183e   : > { %v4105_v46 = vpop.xlane.xlu1 %4104 }
0x183f   : > { %v4106_v49 = vmul.f32 0.0078125, %v4105_v46 }
0x1841   : > { %v8672_v34 = vsub.f32 %v4099_v21, %v4106_v49  ;;  %v6048_v21 = vcombine.high %v4168_v17, %v4172_v18  ;;  %v4101_v49 = vld [vmem:[%s9041_s4] sm:$0x1]  ;;  %s8776_s4 = scalar_lea.vmem [#allocation21], %s937_s30  ;;  %v4159_v17 = vld [vmem:[%s8940_s21 + $0x138] sm:$0xff]  ;;  %v6027_v18 = vcombine.low %v4146_v5, %v4150_v6 }
0x1842   : > { %v7008_v5 = vld [vmem:[#allocation18 + $0xe0] sm:$0xff]   ;;  %s5416_s7 = sshll.u32 %s8776_s4, 4  ;;  %s5417_s7 = int_to_ptr.vmem [resolvable:$true] %s5416_s7 }
0x1843   : > { %v4108_v50 = vmul.f32 %v8672_v34, %v8672_v34  ;;  %4558 = vmatprep.subr.bf16.mxu0 %v6048_v21  ;;  %v6036_v21 = vcombine.high %v4154_v15, %v4158_v16  ;;  %v7009_v6 = vld [vmem:[#allocation18 + $0x20] sm:$0xff]   ;;  %v7016_v15 = vld [vmem:[#allocation18 + $0xf0] sm:$0xff]   ;;  %s7405_s20 = scalar_lea.vmem %s5417_s7, 16  ;;  %p7412_p5 = scmp.lt.s32.totalorder %s5417_s7, %s7410_s0 }
0x1844   : > { %4559 = vmatpush1.bf16.msra.mxu0 %v6047_v23  ;;  %v4162_v23 = vld [vmem:[%s8940_s21 + $0x150] sm:$0xff]  ;;  %p7406_p13 = scmp.ne.s32.totalorder %s5417_s7, %s7405_s20  ;;  %p7413_p9 = scmp.lt.s32.totalorder %s7411_s1, %s7405_s20 }
0x1845   : > { %v4109_v51 = vsel %vm4102_vm9, %v4108_v50, 0.0  ;;  %4560 = vmatprep.subr.bf16.mxu0 %v6056_v28  ;;  %v6046_v28 = vcombine.high %v4163_v8, %v4167_v25  ;;  %v6043_v14 = vcombine.low %v4162_v23, %v4166_v24  ;;  %v7017_v16 = vld [vmem:[#allocation18 + $0x30] sm:$0xff]  }
0x1846   : > { %4110 = vadd.xlane.f32.xlu1 %v4109_v51  ;;  %v4130_v51 = vld [vmem:[%s8940_s21 + $0x50] sm:$0xff]  ;;  %p7407_p0 = pnand %p7406_p13, %p9044_p1  ;;  %p7414_p12 = por %p7413_p9, %p7412_p5 }
0x1847   : > { %v6012_v60 = vcombine.high %v4130_v51, %v4134_v54  ;;  %v6011_v1 = vcombine.low %v4130_v51, %v4134_v54  ;;  %v6992_v51 = vld [vmem:[#allocation18 + $0xc0] sm:$0xff]  }
0x1848   : > { %4561 = vmatpush1.bf16.msra.mxu0 %v6055_v27  ;;  %v6044_v27 = vcombine.high %v4162_v23, %v4166_v24  ;;  %v6993_v54 = vld [vmem:[#allocation18] sm:$0xff]   ;;  %v8854_v24 = vld [vmem:[#allocation17] sm:$0xff]  ;;  %p7408_p6 = pneg %p7407_p0 }
0x1849   : > { %4628 = vmatprep.subr.bf16.mxu0 %v6004_v36  ;;  %v6052_v36 = vcombine.high %v4170_v29, %v4174_v30  ;;  %v7024_v23 = vld [vmem:[#allocation18 + $0x1c0] sm:$0xff]  }
0x184a   : > { %p7415_p10 = pnand %p7414_p12, %p7408_p6 }
0x18d3   : > { %v4111_v41 = vpop.xlane.xlu1 %4110 }
0x18d4   : > { %v4112_v42 = vmul.f32 0.0078125, %v4111_v41  ;;  %v4183_v41 = vld [vmem:[%s8940_s21 + $0x1f8] sm:$0xff] }
0x18d6   : > { %v4113_v43 = vadd.f32 1e-06, %v4112_v42  ;;  %v6051_v42 = vcombine.low %v4170_v29, %v4174_v30 }
0x18d8   : > { %7095 = vrsqrt.f32 %v4113_v43  ;;  %v6053_v43 = vcombine.low %v4171_v31, %v4175_v32 }
0x18e2   : > { %v7096_v44 = vpop.eup %7095 }
0x18e3   : > { %v4115_v46 = vmul.f32 %v7096_v44, %v8672_v34  ;;  %v4135_v34 = vld [vmem:[%s8940_s21 + $0x78] sm:$0xff] }
0x18e4   : > { %v6014_v61 = vcombine.high %v4131_v57, %v4135_v34  ;;  %v6013_v2 = vcombine.low %v4131_v57, %v4135_v34  ;;  %v6994_v57 = vld [vmem:[#allocation18 + $0x80] sm:$0xff]   ;;  %v6995_v34 = vld [vmem:[#allocation18 + $0x48] sm:$0xff]  }
0x18e5   : > { %v4116_v50 = vmul.f32 %v4115_v46, %v4100_v45  ;;  %v6062_v45 = vcombine.high %v4179_v40, %v4183_v41 }
0x18e7   : > { %v4117_v58 = vadd.f32 %v4116_v50, %v4101_v49  ;;  %v6061_v49 = vcombine.low %v4179_v40, %v4183_v41  ;;  %v6991_v50 = vld [vmem:[#allocation18 + $0x40] sm:$0xff]  }
0x18e9   : > { %v8769_v59 = vpack.c.bf16 %v4117_v58, %v4117_v58  ;;  %4118 = vst [vmem:[%s8776_s4] sm:$0x1] %v4117_v58  ;;  %v6996_v58 = vld [vmem:[#allocation18 + $0xc8] sm:$0xff]  }
0x18eb   : > { %4579 = vmatmul.mubr.bf16.vlgmr.msra.gmra.mrb[60].mxu0 %v8769_v59  ;;  %4620 = vmatmul.mubr.bf16.vlgmr.msra.gmra.mrb[40].mxu1 %v8769_v59 }
0x18ec   : > { %4629 = vmatpush1.bf16.msra.mxu0 %v6003_v33  ;;  %4670 = vmatpush1.bf16.msra.mxu1 %v6005_v39  ;;  %v6045_v33 = vcombine.low %v4163_v8, %v4167_v25  ;;  %v4182_v39 = vld [vmem:[%s8940_s21 + $0x1f0] sm:$0xff]  ;;  %v4509_v8 = vrot.slane %v8854_v24, %v8047_v55  ;;  %v4517_v25 = vrot.slane %v8854_v24, %v8050_v56 }
0x18ed   : > { %4630 = vmatprep.subr.bf16.mxu0 %v6012_v60  ;;  %4671 = vmatprep.subr.bf16.mxu1 %v6014_v61  ;;  %v6060_v44 = vcombine.high %v4178_v38, %v4182_v39  ;;  %v6059_v46 = vcombine.low %v4178_v38, %v4182_v39  ;;  %v6997_v60 = vld [vmem:[#allocation18 + $0x8] sm:$0xff]  }
0x18ee   : > { %4660 = vmatprep.mubr.bf16.mxu0 %v7512_v35  ;;  %4701 = vmatprep.mubr.bf16.mxu1 %v7512_v35  ;;  %v4155_v35 = vld [vmem:[%s8940_s21 + $0x118] sm:$0xff]  ;;  %v6998_v61 = vld [vmem:[#allocation18 + $0x88] sm:$0xff]  }
0x18ef   : > { %v6038_v22 = vcombine.high %v4155_v35, %v4159_v17  ;;  %v6037_v20 = vcombine.low %v4155_v35, %v4159_v17  ;;  %v7018_v35 = vld [vmem:[#allocation18 + $0xb0] sm:$0xff]   ;;  %v7019_v17 = vld [vmem:[#allocation18 + $0x78] sm:$0xff]  }
0x18f0   : > { %4631 = vmatpush1.bf16.msra.mxu0 %v6011_v1  ;;  %4672 = vmatpush1.bf16.msra.mxu1 %v6013_v2  ;;  %v7003_v1 = vld [vmem:[#allocation18 + $0x58] sm:$0xff]  }
0x18f1   : > { %4632 = vmatprep.subr.bf16.mxu0 %v6020_v3  ;;  %4673 = vmatprep.subr.bf16.mxu1 %v6022_v4  ;;  %v7004_v2 = vld [vmem:[#allocation18 + $0xd8] sm:$0xff]   ;;  %v7007_v4 = vld [vmem:[#allocation18 + $0x60] sm:$0xff]  }
0x18f2   : > { %v7005_v3 = vld [vmem:[#allocation18 + $0x18] sm:$0xff]  }
0x18f4   : > { %4633 = vmatpush1.bf16.msra.mxu0 %v6019_v10  ;;  %4674 = vmatpush1.bf16.msra.mxu1 %v6021_v11  ;;  %v7012_v10 = vld [vmem:[#allocation18 + $0xe8] sm:$0xff]  }
0x18f5   : > { %4634 = vmatprep.subr.bf16.mxu0 %v6028_v12  ;;  %4675 = vmatprep.subr.bf16.mxu1 %v6030_v13  ;;  %v7013_v11 = vld [vmem:[#allocation18 + $0x28] sm:$0xff]   ;;  %v7015_v13 = vld [vmem:[#allocation18 + $0x70] sm:$0xff]  }
0x18f6   : > { %v7014_v12 = vld [vmem:[#allocation18 + $0xa8] sm:$0xff]  }
0x18f8   : > { %4635 = vmatpush1.bf16.msra.mxu0 %v6027_v18  ;;  %4676 = vmatpush1.bf16.msra.mxu1 %v6029_v19  ;;  %v7020_v18 = vld [vmem:[#allocation18 + $0xf8] sm:$0xff]  }
0x18f9   : > { %4636 = vmatprep.subr.bf16.mxu0 %v6036_v21  ;;  %4677 = vmatprep.subr.bf16.mxu1 %v6038_v22  ;;  %v7021_v19 = vld [vmem:[#allocation18 + $0x38] sm:$0xff]   ;;  %v7023_v22 = vld [vmem:[#allocation18 + $0x140] sm:$0xff]  }
0x18fa   : > { %v7022_v21 = vld [vmem:[#allocation18 + $0xb8] sm:$0xff]  }
0x18fc   : > { %4637 = vmatpush1.bf16.msra.mxu0 %v6035_v26  ;;  %4678 = vmatpush1.bf16.msra.mxu1 %v6037_v20  ;;  %v4513_v26 = vrot.slane %v8854_v24, %v8041_v53  ;;  %v4521_v20 = vrot.slane %v8854_v24, %v8320_v47  ;;  %v7026_v47 = vld [vmem:[#allocation18 + $0x180] sm:$0xff]  }
0x18fd   : > { %4638 = vmatprep.subr.bf16.mxu0 %v6044_v27  ;;  %4679 = vmatprep.subr.bf16.mxu1 %v6046_v28 }
0x1900   : > { %4639 = vmatpush1.bf16.msra.mxu0 %v6043_v14  ;;  %4680 = vmatpush1.bf16.msra.mxu1 %v6045_v33 }
0x1901   : > { %4640 = vmatprep.subr.bf16.mxu0 %v6052_v36  ;;  %4681 = vmatprep.subr.bf16.mxu1 %v6054_v37 }
0x1904   : > { %4641 = vmatpush1.bf16.msra.mxu0 %v6051_v42  ;;  %4682 = vmatpush1.bf16.msra.mxu1 %v6053_v43  ;;  %v7025_v43 = vld [vmem:[#allocation18 + $0x100] sm:$0xff]  }
0x1905   : > { %4642 = vmatprep.subr.bf16.mxu0 %v6060_v44  ;;  %4683 = vmatprep.subr.bf16.mxu1 %v6062_v45 }
0x1908   : > { %4643 = vmatpush1.bf16.msra.mxu0 %v6059_v46  ;;  %4684 = vmatpush1.bf16.msra.mxu1 %v6061_v49  ;;  %v7027_v46 = vld [vmem:[#allocation18 + $0x148] sm:$0xff]  }
0x1909   : > { %6320 = vmatprep.subr.bf16.mxu0 %v6991_v50  ;;  %6342 = vmatprep.subr.bf16.mxu1 %v6992_v51  ;;  %v7028_v49 = vld [vmem:[#allocation18 + $0x1c8] sm:$0xff]  }
0x190a   : > { %v7029_v50 = vld [vmem:[#allocation18 + $0x108] sm:$0xff]  }
0x190b   : > { %4661 = vmatmul.mubr.bf16.vlgmr.msra.gmra.mrb[64].mxu0 %v8769_v59  ;;  %4702 = vmatmul.mubr.bf16.vlgmr.msra.gmra.mrb[44].mxu1 %v8769_v59  ;;  %v7006_v59 = vld [vmem:[#allocation18 + $0x98] sm:$0xff]   ;;  %v7030_v51 = vld [vmem:[#allocation18 + $0x188] sm:$0xff]  }
0x190c   : > { %6321 = vmatpush3.bf16.msra.mxu0 %v6993_v54  ;;  %6343 = vmatpush3.bf16.msra.mxu1 %v6994_v57  ;;  %v7031_v54 = vld [vmem:[#allocation18 + $0x150] sm:$0xff]  }
0x190d   : > { %6322 = vmatprep.subr.bf16.mxu0 %v6995_v34  ;;  %6344 = vmatprep.subr.bf16.mxu1 %v6996_v58  ;;  %v7032_v57 = vld [vmem:[#allocation18 + $0x1d0] sm:$0xff]  }
0x190e   : > { %v7033_v34 = vld [vmem:[#allocation18 + $0x110] sm:$0xff]  }
0x190f   : > { %v7034_v58 = vld [vmem:[#allocation18 + $0x190] sm:$0xff]  }
0x1910   : > { %6323 = vmatpush3.bf16.msra.mxu0 %v6997_v60  ;;  %6345 = vmatpush3.bf16.msra.mxu1 %v6998_v61  ;;  %v7035_v60 = vld [vmem:[#allocation18 + $0x158] sm:$0xff]  }
0x1911   : > { %6324 = vmatprep.subr.bf16.mxu0 %v6999_v62  ;;  %6346 = vmatprep.subr.bf16.mxu1 %v7000_v63  ;;  %v7036_v61 = vld [vmem:[#allocation18 + $0x1d8] sm:$0xff]  }
0x1912   : > { %v7037_v62 = vld [vmem:[#allocation18 + $0x118] sm:$0xff]  }
0x1913   : > { %v7038_v63 = vld [vmem:[#allocation18 + $0x198] sm:$0xff]  }
0x1914   : > { %6325 = vmatpush3.bf16.msra.mxu0 %v7001_v0  ;;  %6347 = vmatpush3.bf16.msra.mxu1 %v7002_v48  ;;  %v7039_v0 = vld [vmem:[#allocation18 + $0x160] sm:$0xff]  }
0x1915   : > { %6326 = vmatprep.subr.bf16.mxu0 %v7003_v1  ;;  %6348 = vmatprep.subr.bf16.mxu1 %v7004_v2  ;;  %v7040_v48 = vld [vmem:[#allocation18 + $0x1e0] sm:$0xff]  }
0x1916   : > { %v7041_v1 = vld [vmem:[#allocation18 + $0x120] sm:$0xff]  }
0x1917   : > { %v7042_v2 = vld [vmem:[#allocation18 + $0x1a0] sm:$0xff]  }
0x1918   : > { %6327 = vmatpush3.bf16.msra.mxu0 %v7005_v3  ;;  %6349 = vmatpush3.bf16.msra.mxu1 %v7006_v59  ;;  %v7043_v3 = vld [vmem:[#allocation18 + $0x168] sm:$0xff]  }
0x1919   : > { %6328 = vmatprep.subr.bf16.mxu0 %v7007_v4  ;;  %6350 = vmatprep.subr.bf16.mxu1 %v7008_v5  ;;  %v7044_v59 = vld [vmem:[#allocation18 + $0x1e8] sm:$0xff]   ;;  %v4524_v4 = vsub.s32 4, %v8038_v52  ;;  %v4532_v5 = vsub.s32 6, %v8038_v52 }
0x191c   : > { %6329 = vmatpush3.bf16.msra.mxu0 %v7009_v6  ;;  %6351 = vmatpush3.bf16.msra.mxu1 %v7010_v7  ;;  %v7045_v6 = vld [vmem:[#allocation18 + $0x128] sm:$0xff]  }
0x191d   : > { %6330 = vmatprep.subr.bf16.mxu0 %v7011_v9  ;;  %6352 = vmatprep.subr.bf16.mxu1 %v7012_v10  ;;  %v7046_v7 = vld [vmem:[#allocation18 + $0x1a8] sm:$0xff]   ;;  %v4528_v9 = vsub.s32 5, %v8038_v52  ;;  %v4536_v10 = vsub.s32 7, %v8038_v52  ;;  %v7052_v52 = vld [vmem:[#allocation18 + $0x1f8] sm:$0xff]  }
0x1920   : > { %6331 = vmatpush3.bf16.msra.mxu0 %v7013_v11  ;;  %6353 = vmatpush3.bf16.msra.mxu1 %v7014_v12  ;;  %v7047_v11 = vld [vmem:[#allocation18 + $0x170] sm:$0xff]  }
0x1921   : > { %6332 = vmatprep.subr.bf16.mxu0 %v7015_v13  ;;  %6354 = vmatprep.subr.bf16.mxu1 %v7016_v15  ;;  %v7048_v12 = vld [vmem:[#allocation18 + $0x1f0] sm:$0xff]   ;;  %v4525_v13 = vrot.slane %v8854_v24, %v4524_v4  ;;  %v4533_v15 = vrot.slane %v8854_v24, %v4532_v5 }
0x1924   : > { %6333 = vmatpush3.bf16.msra.mxu0 %v7017_v16  ;;  %6355 = vmatpush3.bf16.msra.mxu1 %v7018_v35  ;;  %v4529_v16 = vrot.slane %v8854_v24, %v4528_v9  ;;  %v4537_v35 = vrot.slane %v8854_v24, %v4536_v10  ;;  %v7054_v24 = vld [vmem:[#allocation18 + $0x1b8] sm:$0xff]  }
0x1925   : > { %6334 = vmatprep.subr.bf16.mxu0 %v7019_v17  ;;  %6356 = vmatprep.subr.bf16.mxu1 %v7020_v18  ;;  %v7049_v17 = vld [vmem:[#allocation18 + $0x130] sm:$0xff]  }
0x1926   : > { %v7050_v18 = vld [vmem:[#allocation18 + $0x1b0] sm:$0xff]  }
0x1928   : > { %6335 = vmatpush3.bf16.msra.mxu0 %v7021_v19  ;;  %6357 = vmatpush3.bf16.msra.mxu1 %v7022_v21  ;;  %v7051_v19 = vld [vmem:[#allocation18 + $0x178] sm:$0xff]  }
0x1929   : > { %6364 = vmatprep.subr.bf16.mxu0 %v7023_v22  ;;  %6386 = vmatprep.subr.bf16.mxu1 %v7024_v23 }
0x19be   : > { %v4580_v27 = vpop.f32.mrb[60].mxu0  ;;  %v4621_v28 = vpop.f32.mrb[40].mxu1 }
0x19bf   : > { %v4581_v29 = vadd.f32 %v4580_v27, %v4509_v8  ;;  %v4622_v30 = vadd.f32 %v4621_v28, %v4517_v25  ;;  %v4582_v31 = vpop.f32.mrb[61].mxu0  ;;  %v4623_v32 = vpop.f32.mrb[41].mxu1 }
0x19c0   : > { %v4583_v14 = vadd.f32 %v4582_v31, %v4513_v26  ;;  %v4624_v33 = vadd.f32 %v4623_v32, %v4521_v20  ;;  %v4584_v36 = vpop.f32.mrb[62].mxu0  ;;  %v4625_v37 = vpop.f32.mrb[42].mxu1 }
0x19c1   : > { %v4710_v55 = vmax.f32 %v4581_v29, 0.0  ;;  %v4712_v38 = vmax.f32 %v4622_v30, 0.0  ;;  %v4585_v39 = vpop.f32.mrb[63].mxu0  ;;  %v4626_v56 = vpop.f32.mrb[43].mxu1  ;;  %v7053_v30 = vld [vmem:[#allocation18 + $0x138] sm:$0xff]  }
0x19c2   : > { %v4711_v40 = vmax.f32 %v4583_v14, 0.0  ;;  %v4713_v41 = vmax.f32 %v4624_v33, 0.0 }
0x19c3   : > { %v4718_v44 = vpack.c.bf16 %v4710_v55, %v4710_v55  ;;  %v4720_v45 = vpack.c.bf16 %v4712_v38, %v4712_v38 }
0x19c4   : > { %v4719_v53 = vpack.c.bf16 %v4711_v40, %v4711_v40  ;;  %v4721_v42 = vpack.c.bf16 %v4713_v41, %v4713_v41 }
0x19c6   : > { %5271 = vmatprep.mubr.bf16.mxu0 %v4719_v53  ;;  %5311 = vmatprep.mubr.bf16.mxu1 %v4721_v42 }
0x19c7   : > { %5272 = vmatmul.mubr.bf16.vlgmr.msra.gmra.mrb[68].mxu0 %v4718_v44  ;;  %5312 = vmatmul.mubr.bf16.vlgmr.msra.gmra.mrb[48].mxu1 %v4720_v45 }
0x19c8   : > { %6365 = vmatpush3.bf16.msra.mxu0 %v7025_v43  ;;  %6387 = vmatpush3.bf16.msra.mxu1 %v7026_v47 }
0x19c9   : > { %6366 = vmatprep.subr.bf16.mxu0 %v7027_v46  ;;  %6388 = vmatprep.subr.bf16.mxu1 %v7028_v49 }
0x19cc   : > { %6367 = vmatpush3.bf16.msra.mxu0 %v7029_v50  ;;  %6389 = vmatpush3.bf16.msra.mxu1 %v7030_v51 }
0x19cd   : > { %6368 = vmatprep.subr.bf16.mxu0 %v7031_v54  ;;  %6390 = vmatprep.subr.bf16.mxu1 %v7032_v57 }
0x19d0   : > { %6369 = vmatpush3.bf16.msra.mxu0 %v7033_v34  ;;  %6391 = vmatpush3.bf16.msra.mxu1 %v7034_v58 }
0x19d1   : > { %6370 = vmatprep.subr.bf16.mxu0 %v7035_v60  ;;  %6392 = vmatprep.subr.bf16.mxu1 %v7036_v61 }
0x19d4   : > { %6371 = vmatpush3.bf16.msra.mxu0 %v7037_v62  ;;  %6393 = vmatpush3.bf16.msra.mxu1 %v7038_v63 }
0x19d5   : > { %6372 = vmatprep.subr.bf16.mxu0 %v7039_v0  ;;  %6394 = vmatprep.subr.bf16.mxu1 %v7040_v48 }
0x19d8   : > { %6373 = vmatpush3.bf16.msra.mxu0 %v7041_v1  ;;  %6395 = vmatpush3.bf16.msra.mxu1 %v7042_v2 }
0x19d9   : > { %6374 = vmatprep.subr.bf16.mxu0 %v7043_v3  ;;  %6396 = vmatprep.subr.bf16.mxu1 %v7044_v59 }
0x19dc   : > { %6375 = vmatpush3.bf16.msra.mxu0 %v7045_v6  ;;  %6397 = vmatpush3.bf16.msra.mxu1 %v7046_v7 }
0x19dd   : > { %6376 = vmatprep.subr.bf16.mxu0 %v7047_v11  ;;  %6398 = vmatprep.subr.bf16.mxu1 %v7048_v12 }
0x19de   : > { %v4662_v21 = vpop.f32.mrb[64].mxu0  ;;  %v4703_v22 = vpop.f32.mrb[44].mxu1 }
0x19df   : > { %v4663_v23 = vadd.f32 %v4662_v21, %v4525_v13  ;;  %v4704_v8 = vadd.f32 %v4703_v22, %v4533_v15  ;;  %v4664_v25 = vpop.f32.mrb[65].mxu0  ;;  %v4705_v26 = vpop.f32.mrb[45].mxu1 }
0x19e0   : > { %v4665_v20 = vadd.f32 %v4664_v25, %v4529_v16  ;;  %v4706_v27 = vadd.f32 %v4705_v26, %v4537_v35  ;;  %v4666_v28 = vpop.f32.mrb[66].mxu0  ;;  %v4707_v29 = vpop.f32.mrb[46].mxu1  ;;  %6377 = vmatpush3.bf16.msra.mxu0 %v7049_v17  ;;  %6399 = vmatpush3.bf16.msra.mxu1 %v7050_v18 }
0x19e1   : > { %v4714_v31 = vmax.f32 %v4663_v23, 0.0  ;;  %v4716_v32 = vmax.f32 %v4704_v8, 0.0  ;;  %v4667_v14 = vpop.f32.mrb[67].mxu0  ;;  %v4708_v33 = vpop.f32.mrb[47].mxu1  ;;  %6378 = vmatprep.subr.bf16.mxu0 %v7051_v19  ;;  %6400 = vmatprep.subr.bf16.mxu1 %v7052_v52 }
0x19e2   : > { %v4715_v36 = vmax.f32 %v4665_v20, 0.0  ;;  %v4717_v37 = vmax.f32 %v4706_v27, 0.0 }
0x19e3   : > { %v4722_v39 = vpack.c.bf16 %v4714_v31, %v4714_v31  ;;  %v4724_v56 = vpack.c.bf16 %v4716_v32, %v4716_v32 }
0x19e4   : > { %v4723_v55 = vpack.c.bf16 %v4715_v36, %v4715_v36  ;;  %v4725_v38 = vpack.c.bf16 %v4717_v37, %v4717_v37  ;;  %6379 = vmatpush3.bf16.msra.mxu0 %v7053_v30  ;;  %6401 = vmatpush3.bf16.msra.mxu1 %v7054_v24 }
0x19e6   : > { %5351 = vmatprep.mubr.bf16.mxu0 %v4723_v55  ;;  %5391 = vmatprep.mubr.bf16.mxu1 %v4725_v38 }
0x19e7   : > { %5352 = vmatmul.mubr.bf16.vlgmr.msra.gmra.mrb[72].mxu0 %v4722_v39  ;;  %5392 = vmatmul.mubr.bf16.vlgmr.msra.gmra.mrb[52].mxu1 %v4724_v56 }
0x19e8   : > { %7418 = shalt.err (!%p7415_p10)
}
0x19e9   : > { %s7419_s8 = scalar_lea.hbm %s8877_s27, 16  ;;  %s7423_s25 = scalar_lea.hbm %s9043_s5, 32 }
0x19ea   : > { %p7420_p2 = scmp.ne.s32.totalorder %s8877_s27, %s7419_s8  ;;  %p7424_p7 = scmp.lt.u32.totalorder %s8877_s27, %s9043_s5 }
0x19eb   : > { %p7425_p8 = scmp.lt.u32.totalorder %s7423_s25, %s7419_s8  ;;  %p7427_p13 = scmp.lt.u32.totalorder %s7419_s8, %s8877_s27 }
0x19ec   : > { %p7421_p3 = pnand %p7420_p2, %p9044_p1 }
0x19ed   : > { %p7426_p11 = por %p7425_p8, %p7424_p7 }
0x19ee   : > { %p7422_p4 = pneg %p7421_p3 }
0x19ef   : > { %p7428_p0 = por %p7427_p13, %p7426_p11 }
0x19f1   : > { %p7429_p6 = pnand %p7428_p0, %p7422_p4 }
0x19f3   : > { %7432 = shalt.err (!%p7429_p6)
}
0x19f4   : > { %6595 = dma.vmem_to_hbm [thread:$0]  (%p9044_p1), %s5417_s7, 16, %s8877_s27, %s5401_s6   ;;  %v4854_v53 = vld [vmem:[#allocation20] sm:$0x1] }
0x19f5   : > { %s9045_s7 = sld [smem:[#allocation53_spill]] }
0x19fb   : > { %s951_s2 = scalar_lea.vmem %s9045_s7, %s7982_s10 }
0x1a9a   : > { %v6336_v40 = vpop.f32.mrb[68].mxu0  ;;  %v6358_v41 = vpop.f32.mrb[48].mxu1 }
0x1a9b   : > { %v6337_v42 = vpop.f32.mrb[69].mxu0  ;;  %v6359_v43 = vpop.f32.mrb[49].mxu1 }
0x1a9c   : > { %v6338_v47 = vadd.f32 %v6337_v42, %v6336_v40  ;;  %v6360_v44 = vadd.f32 %v6359_v43, %v6358_v41  ;;  %v6339_v45 = vpop.f32.mrb[70].mxu0  ;;  %v6361_v46 = vpop.f32.mrb[50].mxu1 }
0x1a9d   : > { %v6340_v49 = vpop.f32.mrb[71].mxu0  ;;  %v6362_v50 = vpop.f32.mrb[51].mxu1 }
0x1a9e   : > { %v5274_v51 = vadd.f32 %v6338_v47, %v4854_v53 }
0x1aa0   : > { %v5314_v54 = vadd.f32 %v6360_v44, %v5274_v51 }
0x1aba   : > { %v6380_v57 = vpop.f32.mrb[72].mxu0  ;;  %v6402_v34 = vpop.f32.mrb[52].mxu1 }
0x1abb   : > { %v6381_v58 = vpop.f32.mrb[73].mxu0  ;;  %v6403_v60 = vpop.f32.mrb[53].mxu1 }
0x1abc   : > { %v6382_v61 = vadd.f32 %v6381_v58, %v6380_v57  ;;  %v6404_v62 = vadd.f32 %v6403_v60, %v6402_v34  ;;  %v6383_v63 = vpop.f32.mrb[74].mxu0  ;;  %v6405_v0 = vpop.f32.mrb[54].mxu1 }
0x1abd   : > { %v6384_v48 = vpop.f32.mrb[75].mxu0  ;;  %v6406_v1 = vpop.f32.mrb[55].mxu1 }
0x1abe   : > { %v5354_v2 = vadd.f32 %v6382_v61, %v5314_v54 }
0x1ac0   : > { %v5394_v3 = vadd.f32 %v6404_v62, %v5354_v2 }
0x1ac2   : > { %5399 = vst [vmem:[%s951_s2] sm:$0x1] %v5394_v3 }
0x1ac3 PF: > { %s9046_s27 = sld [smem:[#allocation31_spill]]  ;;  %s9047_s6 = sld [smem:[#allocation29_spill]] }
0x1ac4   : > { %s9048_s20 = sld [smem:[#allocation35_spill]] }
0x1ac9   : > { %p6657_p1 = scmp.ge.s32.totalorder %s9046_s27, 2  ;;  %s5431_s17 = sand.u32 1, %s9047_s6  }
0x1aca   : > { %p9049_p5 = scmp.ne.s32.totalorder %s9048_s20, 0  ;;  %s5432_s8 = scalar_lea.sflag [#allocation5], %s5431_s17 }
0x1acc   : > { %p6632_p9 = pnand %p6657_p1, %p9049_p5 }
0x1ace   : > { %7474 = dma.done.wait (!%p6632_p9), %s5432_s8, 16  }
0x1acf   : > { %7476 = vsyncadd (!%p6632_p9), %s5432_s8, 4294967280  ;;  %s9050_s28 = sld [smem:[#allocation32_spill]]  ;;  %s9051_s30 = sld [smem:[#allocation30_spill]] }
0x1ad0   : > { %s9052_s7 = sld [smem:[#allocation33_spill]]  ;;  %s9053_s27 = smov %s7483_s3 }
0x1ad5   : > { %p43_p12 = scmp.ge.s32.totalorder %s9050_s28, 4   ;;  %s9054_s3 = smov %s9051_s30 }
0x1ad7   :  { %45 = sbr.rel (!%p43_p12) target bundleno = 28 (0x1c), region = 226 }
0x1ade   :  { %5442 = vsyncpa [#allocation4], 1 }
0x1adf   :  { %5444 = vsyncpa [#allocation4 + $0x1], 1 }
0x1ae0   :  { %5445 = vsyncpa [#allocation7], 1 }
0x1ae1   :  { %5446 = vsyncpa [#allocation10], 1 }
0x1ae2   :  { %5447 = vsyncpa [#allocation13], 1 }
0x1ae3   :  { %5448 = vsyncpa [#allocation16], 1 }
0x1ae4   :  { %5449 = vsyncpa [#allocation19], 1 }
0x1ae5   :  { %5450 = vsyncpa [#allocation5], 1 }
0x1ae6   :  { %5452 = vsyncpa [#allocation5 + $0x1], 1 }

</bundles_post_ra>
